<compile_context>
chip_gen: v7x
topology: tpu7x:2x2x1
jax: 0.10.0
libtpu: 0.0.40
codegen_flags: <defaults>
</compile_context>

<pallas_src>
import jax
import jax.numpy as jnp
import numpy as np
from jax import lax
from jax.experimental import pallas as pl
from jax.experimental.pallas import tpu as pltpu

N_NODES = 16                            # nodes per component graph
GRAPHS_PER_BLOCK = 8                    # graphs folded into one grid step
NUM_BLOCKS = 2                          # grid length (>= 2 so both v7x TCs work)
M_ROWS = GRAPHS_PER_BLOCK * N_NODES     # 128 rows per block (native MXU M)
N_EDGES = 48                            # edges per component graph
HIDDEN = 64
BN_EPS = 1e-5


def gin_kernel(x_ref, adj_ref, w_ref, v_ref, out_ref):
    # x_ref:   [M, 1]        stacked node features of this block
    # adj_ref: [4, M, M]     per-layer block-diagonal (adj + (1+eps_l) * I)
    # w_ref:   [7, 64, 64]   stacked 64x64 weights: w1b, w2a, w2b, w3a, w3b, w4a, w4b
    # v_ref:   [19, 64]      w1a row, (ba, bb, gamma, beta) x 4 layers, fcw row, fcb row
    # out_ref: [1, M]        lane-dense per-node outputs

    def row(i):
        return v_ref[i:i + 1, :]                       # [1, 64] static view

    inv_n = 1.0 / M_ROWS

    def relu_bn(z, gamma, beta):
        # outer F.relu, then training-mode BatchNorm1d (biased batch var) over
        # all M rows of the block; two-pass variance matches the reference.
        z = jnp.maximum(z, 0.0)
        mean = jnp.sum(z, axis=0, keepdims=True) * inv_n       # [1, 64]
        c = z - mean
        var = jnp.sum(c * c, axis=0, keepdims=True) * inv_n    # [1, 64]
        inv = lax.rsqrt(var + BN_EPS) * gamma                  # EUP rsqrt
        return c * inv + beta                                  # one FMA sweep

    # ---- layer 1: Linear(1,64) commuted with the (linear) aggregation ----
    # x_emb = x @ w1a  ==  x * w1a_row   (VPU broadcast outer product, no K=1 MXU)
    x_emb = x_ref[...] * row(0)                                # [M, 64]
    z = jnp.dot(adj_ref[0], x_emb, preferred_element_type=jnp.float32) + row(1)
    z = jnp.maximum(z, 0.0)                                    # MLP-internal ReLU
    z = jnp.dot(z, w_ref[0], preferred_element_type=jnp.float32) + row(2)
    h = relu_bn(z, row(3), row(4))

    # ---- layers 2..4 ----
    for l in range(1, 4):
        base = 1 + 4 * l                                       # v rows: ba, bb, gamma, beta
        agg = jnp.dot(adj_ref[l], h, preferred_element_type=jnp.float32)
        z = jnp.dot(agg, w_ref[2 * l - 1],
                    preferred_element_type=jnp.float32) + row(base)
        z = jnp.maximum(z, 0.0)
        z = jnp.dot(z, w_ref[2 * l],
                    preferred_element_type=jnp.float32) + row(base + 1)
        h = relu_bn(z, row(base + 2), row(base + 3))

    # ---- fc2: Linear(64,1) as fcw_row . h^T (NT matmul) -> lane-dense [1, M] ----
    out_ref[...] = lax.dot_general(
        row(17), h, dimension_numbers=(((1,), (1,)), ((), ())),
        preferred_element_type=jnp.float32) + v_ref[18:19, 0:1]


def gin_net_pallas(x, adj_eps, w_stack, v_stack):
    B, M, _ = x.shape
    out = pl.pallas_call(
        gin_kernel,
        out_shape=jax.ShapeDtypeStruct((B, 1, M), jnp.float32),
        grid=(B,),
        in_specs=[
            pl.BlockSpec((pl.Squeezed(), M, 1), lambda b: (b, 0, 0)),
            pl.BlockSpec((pl.Squeezed(), 4, M, M), lambda b: (b, 0, 0, 0)),
            pl.BlockSpec((7, HIDDEN, HIDDEN), lambda b: (0, 0, 0)),
            pl.BlockSpec((19, HIDDEN), lambda b: (0, 0)),
        ],
        out_specs=pl.BlockSpec((pl.Squeezed(), 1, M), lambda b: (b, 0, 0)),
        compiler_params=pltpu.CompilerParams(
            dimension_semantics=("parallel",)),
    )(x, adj_eps, w_stack, v_stack)
    # [B, 1, M] -> [B, M, 1]: per-node scalar outputs (free reshape, same order)
    return out.reshape(B, M, 1)


def _linear_init(key, fan_in, fan_out):
    kw, kb = jax.random.split(key)
    bound = 1.0 / np.sqrt(fan_in)
    w = jax.random.uniform(kw, (fan_in, fan_out), jnp.float32, -bound, bound)
    b = jax.random.uniform(kb, (1, fan_out), jnp.float32, -bound, bound)
    return w, b


def make_params(key):
    params = []
    dims = [(1, HIDDEN), (HIDDEN, HIDDEN), (HIDDEN, HIDDEN), (HIDDEN, HIDDEN)]
    for (din, _) in dims:
        key, k1, k2 = jax.random.split(key, 3)
        wa, ba = _linear_init(k1, din, HIDDEN)
        wb, bb = _linear_init(k2, HIDDEN, HIDDEN)
        gamma = jnp.ones((1, HIDDEN), jnp.float32)   # BatchNorm1d default init
        beta = jnp.zeros((1, HIDDEN), jnp.float32)
        params += [wa, ba, wb, bb, gamma, beta]
    key, kf = jax.random.split(key)
    fcw, fcb = _linear_init(kf, HIDDEN, 1)
    params += [fcw, fcb]
    return params


def pack_params(params):
    (w1a, b1a, w1b, b1b, g1, be1,
     w2a, b2a, w2b, b2b, g2, be2,
     w3a, b3a, w3b, b3b, g3, be3,
     w4a, b4a, w4b, b4b, g4, be4,
     fcw, fcb) = params
    w_stack = jnp.stack([w1b, w2a, w2b, w3a, w3b, w4a, w4b])      # [7, 64, 64]
    rows = [
        w1a.reshape(HIDDEN),
        b1a.reshape(HIDDEN), b1b.reshape(HIDDEN), g1.reshape(HIDDEN), be1.reshape(HIDDEN),
        b2a.reshape(HIDDEN), b2b.reshape(HIDDEN), g2.reshape(HIDDEN), be2.reshape(HIDDEN),
        b3a.reshape(HIDDEN), b3b.reshape(HIDDEN), g3.reshape(HIDDEN), be3.reshape(HIDDEN),
        b4a.reshape(HIDDEN), b4b.reshape(HIDDEN), g4.reshape(HIDDEN), be4.reshape(HIDDEN),
        fcw.reshape(HIDDEN),
        jnp.broadcast_to(fcb.reshape(()), (HIDDEN,)),
    ]
    v_stack = jnp.stack(rows)                                     # [19, 64]
    return w_stack, v_stack


def reference_forward_single(x, adj, eps, params):
    """Pure-JAX reference: original GinNet forward on one (batched) graph."""
    h = x
    for layer in range(4):
        wa, ba, wb, bb, gamma, beta = params[layer * 6:(layer + 1) * 6]
        z = (1.0 + eps[layer]) * h + adj @ h
        z = jnp.maximum(z @ wa + ba, 0.0)
        z = z @ wb + bb
        z = jnp.maximum(z, 0.0)
        mean = jnp.mean(z, axis=0, keepdims=True)
        var = jnp.mean(jnp.square(z - mean), axis=0, keepdims=True)
        h = (z - mean) / jnp.sqrt(var + BN_EPS) * gamma + beta
    fcw, fcb = params[-2:]
    return h @ fcw + fcb


if __name__ == "__main__":
    key = jax.random.PRNGKey(0)
    k_params, k_data = jax.random.split(key)

    params = make_params(k_params)
    # GINConv(train_eps=True) initializes eps = 0
    eps = jnp.zeros((4,), jnp.float32)

    # Build NUM_BLOCKS batched graphs, each the disjoint union of
    # GRAPHS_PER_BLOCK random component graphs (PyG-style batching): node rows
    # are stacked, adjacency is block-diagonal; adj[i, j] = #edges j -> i.
    xs, adjs = [], []
    for _ in range(NUM_BLOCKS):
        adj_np = np.zeros((M_ROWS, M_ROWS), np.float32)
        rows = []
        for g in range(GRAPHS_PER_BLOCK):
            k_data, kx, ks, kd = jax.random.split(k_data, 4)
            x_g = jax.random.normal(kx, (N_NODES, 1), jnp.float32)
            src = np.asarray(jax.random.randint(ks, (N_EDGES,), 0, N_NODES))
            dst = np.asarray(jax.random.randint(kd, (N_EDGES,), 0, N_NODES))
            off = g * N_NODES
            np.add.at(adj_np, (dst + off, src + off), 1.0)
            rows.append(x_g)
        xs.append(jnp.concatenate(rows, axis=0))
        adjs.append(jnp.asarray(adj_np))
    x = jnp.stack(xs)       # [NUM_BLOCKS, M, 1]
    adj = jnp.stack(adjs)   # [NUM_BLOCKS, M, M]

    # Fold (1 + eps_l) into the adjacency: adj_eps[b, l] = adj[b] + (1+eps_l)*I
    eye = jnp.eye(M_ROWS, dtype=jnp.float32)
    adj_eps = (adj[:, None, :, :]
               + (1.0 + eps)[None, :, None, None] * eye[None, None])  # [B,4,M,M]

    w_stack, v_stack = pack_params(params)

    out = gin_net_pallas(x, adj_eps, w_stack, v_stack)
    out = jax.block_until_ready(out)

    ref = jnp.stack([reference_forward_single(x[b], adj[b], eps, params)
                     for b in range(NUM_BLOCKS)])                 # [B, M, 1]
    np.testing.assert_allclose(np.asarray(out), np.asarray(ref),
                               rtol=1e-4, atol=1e-4)
    assert out.shape == (NUM_BLOCKS, M_ROWS, 1)
    print("KERNEL_OK")
</pallas_src>

<mosaic_0001>
module attributes {stable_mosaic.version = 11 : i64} {
  func.func @gin_kernel(%arg0: i32, %arg1: memref<1x128x1xf32, #tpu.memory_space<vmem>>, %arg2: memref<1x4x128x128xf32, #tpu.memory_space<vmem>>, %arg3: memref<7x64x64xf32, #tpu.memory_space<vmem>>, %arg4: memref<19x64xf32, #tpu.memory_space<vmem>>, %arg5: memref<1x1x128xf32, #tpu.memory_space<vmem>>) attributes {dimension_semantics = [#tpu.dimension_semantics<parallel>], iteration_bounds = array<i64: 2>, scalar_prefetch = 0 : i64, scratch_operands = 0 : i64, tpu.core_type = #tpu.core_type<tc>, window_params = [{transform_indices = @transform_0, window_bounds = array<i64: 1, 128, 1>}, {transform_indices = @transform_1, window_bounds = array<i64: 1, 4, 128, 128>}, {pipeline_mode = #tpu.pipeline_mode<synchronous>, transform_indices = @transform_2, window_bounds = array<i64: 7, 64, 64>}, {pipeline_mode = #tpu.pipeline_mode<synchronous>, transform_indices = @transform_3, window_bounds = array<i64: 19, 64>}, {transform_indices = @transform_4, window_bounds = array<i64: 1, 1, 128>}]} {
    %c0 = arith.constant 0 : index
    %c0_0 = arith.constant 0 : index
    %c0_1 = arith.constant 0 : index
    %0 = vector.load %arg1[%c0, %c0_0, %c0_1] : memref<1x128x1xf32, #tpu.memory_space<vmem>>, vector<1x128x1xf32>
    %1 = vector.shape_cast %0 : vector<1x128x1xf32> to vector<128x1xf32>
    %c0_2 = arith.constant 0 : index
    %c0_3 = arith.constant 0 : index
    %2 = vector.load %arg4[%c0_2, %c0_3] : memref<19x64xf32, #tpu.memory_space<vmem>>, vector<1x64xf32>
    %3 = vector.broadcast %1 : vector<128x1xf32> to vector<128x64xf32>
    %4 = vector.broadcast %2 : vector<1x64xf32> to vector<128x64xf32>
    %5 = arith.mulf %3, %4 : vector<128x64xf32>
    %c0_4 = arith.constant 0 : index
    %c0_5 = arith.constant 0 : index
    %c0_6 = arith.constant 0 : index
    %c0_7 = arith.constant 0 : index
    %6 = vector.load %arg2[%c0_4, %c0_5, %c0_6, %c0_7] : memref<1x4x128x128xf32, #tpu.memory_space<vmem>>, vector<1x1x128x128xf32>
    %7 = vector.shape_cast %6 : vector<1x1x128x128xf32> to vector<128x128xf32>
    %cst = arith.constant dense<0.000000e+00> : vector<128x64xf32>
    %8 = tpu.matmul %7, %5, %cst {dimension_numbers = #tpu.dot_dimension_numbers<[1], [0], [0], [1], [0, 0, 1, 1], [], []>} : vector<128x128xf32>, vector<128x64xf32>, vector<128x64xf32> -> vector<128x64xf32>
    %c1 = arith.constant 1 : index
    %c0_8 = arith.constant 0 : index
    %9 = vector.load %arg4[%c1, %c0_8] : memref<19x64xf32, #tpu.memory_space<vmem>>, vector<1x64xf32>
    %10 = vector.broadcast %9 : vector<1x64xf32> to vector<128x64xf32>
    %11 = arith.addf %8, %10 : vector<128x64xf32>
    %cst_9 = arith.constant 0.000000e+00 : f32
    %12 = vector.broadcast %cst_9 : f32 to vector<128x64xf32>
    %13 = arith.maximumf %11, %12 : vector<128x64xf32>
    %c0_10 = arith.constant 0 : index
    %c0_11 = arith.constant 0 : index
    %c0_12 = arith.constant 0 : index
    %14 = vector.load %arg3[%c0_10, %c0_11, %c0_12] : memref<7x64x64xf32, #tpu.memory_space<vmem>>, vector<1x64x64xf32>
    %15 = vector.shape_cast %14 : vector<1x64x64xf32> to vector<64x64xf32>
    %cst_13 = arith.constant dense<0.000000e+00> : vector<128x64xf32>
    %16 = tpu.matmul %13, %15, %cst_13 {dimension_numbers = #tpu.dot_dimension_numbers<[1], [0], [0], [1], [0, 0, 1, 1], [], []>} : vector<128x64xf32>, vector<64x64xf32>, vector<128x64xf32> -> vector<128x64xf32>
    %c2 = arith.constant 2 : index
    %c0_14 = arith.constant 0 : index
    %17 = vector.load %arg4[%c2, %c0_14] : memref<19x64xf32, #tpu.memory_space<vmem>>, vector<1x64xf32>
    %18 = vector.broadcast %17 : vector<1x64xf32> to vector<128x64xf32>
    %19 = arith.addf %16, %18 : vector<128x64xf32>
    %c3 = arith.constant 3 : index
    %c0_15 = arith.constant 0 : index
    %20 = vector.load %arg4[%c3, %c0_15] : memref<19x64xf32, #tpu.memory_space<vmem>>, vector<1x64xf32>
    %c4 = arith.constant 4 : index
    %c0_16 = arith.constant 0 : index
    %21 = vector.load %arg4[%c4, %c0_16] : memref<19x64xf32, #tpu.memory_space<vmem>>, vector<1x64xf32>
    %cst_17 = arith.constant 0.000000e+00 : f32
    %22 = vector.broadcast %cst_17 : f32 to vector<128x64xf32>
    %23 = arith.maximumf %19, %22 : vector<128x64xf32>
    %cst_18 = arith.constant dense<0.000000e+00> : vector<64xf32>
    %24 = vector.multi_reduction <add>, %23, %cst_18 [0] : vector<128x64xf32> to vector<64xf32>
    %25 = vector.shape_cast %24 : vector<64xf32> to vector<1x64xf32>
    %cst_19 = arith.constant 7.812500e-03 : f32
    %26 = vector.broadcast %cst_19 : f32 to vector<1x64xf32>
    %27 = arith.mulf %25, %26 : vector<1x64xf32>
    %28 = vector.broadcast %27 : vector<1x64xf32> to vector<128x64xf32>
    %29 = arith.subf %23, %28 : vector<128x64xf32>
    %30 = arith.mulf %29, %29 : vector<128x64xf32>
    %cst_20 = arith.constant dense<0.000000e+00> : vector<64xf32>
    %31 = vector.multi_reduction <add>, %30, %cst_20 [0] : vector<128x64xf32> to vector<64xf32>
    %32 = vector.shape_cast %31 : vector<64xf32> to vector<1x64xf32>
    %cst_21 = arith.constant 7.812500e-03 : f32
    %33 = vector.broadcast %cst_21 : f32 to vector<1x64xf32>
    %34 = arith.mulf %32, %33 : vector<1x64xf32>
    %cst_22 = arith.constant 9.99999974E-6 : f32
    %35 = vector.broadcast %cst_22 : f32 to vector<1x64xf32>
    %36 = arith.addf %34, %35 : vector<1x64xf32>
    %37 = math.rsqrt %36 : vector<1x64xf32>
    %38 = arith.mulf %37, %20 : vector<1x64xf32>
    %39 = vector.broadcast %38 : vector<1x64xf32> to vector<128x64xf32>
    %40 = arith.mulf %29, %39 : vector<128x64xf32>
    %41 = vector.broadcast %21 : vector<1x64xf32> to vector<128x64xf32>
    %42 = arith.addf %40, %41 : vector<128x64xf32>
    %c0_23 = arith.constant 0 : index
    %c1_24 = arith.constant 1 : index
    %c0_25 = arith.constant 0 : index
    %c0_26 = arith.constant 0 : index
    %43 = vector.load %arg2[%c0_23, %c1_24, %c0_25, %c0_26] : memref<1x4x128x128xf32, #tpu.memory_space<vmem>>, vector<1x1x128x128xf32>
    %44 = vector.shape_cast %43 : vector<1x1x128x128xf32> to vector<128x128xf32>
    %cst_27 = arith.constant dense<0.000000e+00> : vector<128x64xf32>
    %45 = tpu.matmul %44, %42, %cst_27 {dimension_numbers = #tpu.dot_dimension_numbers<[1], [0], [0], [1], [0, 0, 1, 1], [], []>} : vector<128x128xf32>, vector<128x64xf32>, vector<128x64xf32> -> vector<128x64xf32>
    %c1_28 = arith.constant 1 : index
    %c0_29 = arith.constant 0 : index
    %c0_30 = arith.constant 0 : index
    %46 = vector.load %arg3[%c1_28, %c0_29, %c0_30] : memref<7x64x64xf32, #tpu.memory_space<vmem>>, vector<1x64x64xf32>
    %47 = vector.shape_cast %46 : vector<1x64x64xf32> to vector<64x64xf32>
    %cst_31 = arith.constant dense<0.000000e+00> : vector<128x64xf32>
    %48 = tpu.matmul %45, %47, %cst_31 {dimension_numbers = #tpu.dot_dimension_numbers<[1], [0], [0], [1], [0, 0, 1, 1], [], []>} : vector<128x64xf32>, vector<64x64xf32>, vector<128x64xf32> -> vector<128x64xf32>
    %c5 = arith.constant 5 : index
    %c0_32 = arith.constant 0 : index
    %49 = vector.load %arg4[%c5, %c0_32] : memref<19x64xf32, #tpu.memory_space<vmem>>, vector<1x64xf32>
    %50 = vector.broadcast %49 : vector<1x64xf32> to vector<128x64xf32>
    %51 = arith.addf %48, %50 : vector<128x64xf32>
    %cst_33 = arith.constant 0.000000e+00 : f32
    %52 = vector.broadcast %cst_33 : f32 to vector<128x64xf32>
    %53 = arith.maximumf %51, %52 : vector<128x64xf32>
    %c2_34 = arith.constant 2 : index
    %c0_35 = arith.constant 0 : index
    %c0_36 = arith.constant 0 : index
    %54 = vector.load %arg3[%c2_34, %c0_35, %c0_36] : memref<7x64x64xf32, #tpu.memory_space<vmem>>, vector<1x64x64xf32>
    %55 = vector.shape_cast %54 : vector<1x64x64xf32> to vector<64x64xf32>
    %cst_37 = arith.constant dense<0.000000e+00> : vector<128x64xf32>
    %56 = tpu.matmul %53, %55, %cst_37 {dimension_numbers = #tpu.dot_dimension_numbers<[1], [0], [0], [1], [0, 0, 1, 1], [], []>} : vector<128x64xf32>, vector<64x64xf32>, vector<128x64xf32> -> vector<128x64xf32>
    %c6 = arith.constant 6 : index
    %c0_38 = arith.constant 0 : index
    %57 = vector.load %arg4[%c6, %c0_38] : memref<19x64xf32, #tpu.memory_space<vmem>>, vector<1x64xf32>
    %58 = vector.broadcast %57 : vector<1x64xf32> to vector<128x64xf32>
    %59 = arith.addf %56, %58 : vector<128x64xf32>
    %c7 = arith.constant 7 : index
    %c0_39 = arith.constant 0 : index
    %60 = vector.load %arg4[%c7, %c0_39] : memref<19x64xf32, #tpu.memory_space<vmem>>, vector<1x64xf32>
    %c8 = arith.constant 8 : index
    %c0_40 = arith.constant 0 : index
    %61 = vector.load %arg4[%c8, %c0_40] : memref<19x64xf32, #tpu.memory_space<vmem>>, vector<1x64xf32>
    %cst_41 = arith.constant 0.000000e+00 : f32
    %62 = vector.broadcast %cst_41 : f32 to vector<128x64xf32>
    %63 = arith.maximumf %59, %62 : vector<128x64xf32>
    %cst_42 = arith.constant dense<0.000000e+00> : vector<64xf32>
    %64 = vector.multi_reduction <add>, %63, %cst_42 [0] : vector<128x64xf32> to vector<64xf32>
    %65 = vector.shape_cast %64 : vector<64xf32> to vector<1x64xf32>
    %cst_43 = arith.constant 7.812500e-03 : f32
    %66 = vector.broadcast %cst_43 : f32 to vector<1x64xf32>
    %67 = arith.mulf %65, %66 : vector<1x64xf32>
    %68 = vector.broadcast %67 : vector<1x64xf32> to vector<128x64xf32>
    %69 = arith.subf %63, %68 : vector<128x64xf32>
    %70 = arith.mulf %69, %69 : vector<128x64xf32>
    %cst_44 = arith.constant dense<0.000000e+00> : vector<64xf32>
    %71 = vector.multi_reduction <add>, %70, %cst_44 [0] : vector<128x64xf32> to vector<64xf32>
    %72 = vector.shape_cast %71 : vector<64xf32> to vector<1x64xf32>
    %cst_45 = arith.constant 7.812500e-03 : f32
    %73 = vector.broadcast %cst_45 : f32 to vector<1x64xf32>
    %74 = arith.mulf %72, %73 : vector<1x64xf32>
    %cst_46 = arith.constant 9.99999974E-6 : f32
    %75 = vector.broadcast %cst_46 : f32 to vector<1x64xf32>
    %76 = arith.addf %74, %75 : vector<1x64xf32>
    %77 = math.rsqrt %76 : vector<1x64xf32>
    %78 = arith.mulf %77, %60 : vector<1x64xf32>
    %79 = vector.broadcast %78 : vector<1x64xf32> to vector<128x64xf32>
    %80 = arith.mulf %69, %79 : vector<128x64xf32>
    %81 = vector.broadcast %61 : vector<1x64xf32> to vector<128x64xf32>
    %82 = arith.addf %80, %81 : vector<128x64xf32>
    %c0_47 = arith.constant 0 : index
    %c2_48 = arith.constant 2 : index
    %c0_49 = arith.constant 0 : index
    %c0_50 = arith.constant 0 : index
    %83 = vector.load %arg2[%c0_47, %c2_48, %c0_49, %c0_50] : memref<1x4x128x128xf32, #tpu.memory_space<vmem>>, vector<1x1x128x128xf32>
    %84 = vector.shape_cast %83 : vector<1x1x128x128xf32> to vector<128x128xf32>
    %cst_51 = arith.constant dense<0.000000e+00> : vector<128x64xf32>
    %85 = tpu.matmul %84, %82, %cst_51 {dimension_numbers = #tpu.dot_dimension_numbers<[1], [0], [0], [1], [0, 0, 1, 1], [], []>} : vector<128x128xf32>, vector<128x64xf32>, vector<128x64xf32> -> vector<128x64xf32>
    %c3_52 = arith.constant 3 : index
    %c0_53 = arith.constant 0 : index
    %c0_54 = arith.constant 0 : index
    %86 = vector.load %arg3[%c3_52, %c0_53, %c0_54] : memref<7x64x64xf32, #tpu.memory_space<vmem>>, vector<1x64x64xf32>
    %87 = vector.shape_cast %86 : vector<1x64x64xf32> to vector<64x64xf32>
    %cst_55 = arith.constant dense<0.000000e+00> : vector<128x64xf32>
    %88 = tpu.matmul %85, %87, %cst_55 {dimension_numbers = #tpu.dot_dimension_numbers<[1], [0], [0], [1], [0, 0, 1, 1], [], []>} : vector<128x64xf32>, vector<64x64xf32>, vector<128x64xf32> -> vector<128x64xf32>
    %c9 = arith.constant 9 : index
    %c0_56 = arith.constant 0 : index
    %89 = vector.load %arg4[%c9, %c0_56] : memref<19x64xf32, #tpu.memory_space<vmem>>, vector<1x64xf32>
    %90 = vector.broadcast %89 : vector<1x64xf32> to vector<128x64xf32>
    %91 = arith.addf %88, %90 : vector<128x64xf32>
    %cst_57 = arith.constant 0.000000e+00 : f32
    %92 = vector.broadcast %cst_57 : f32 to vector<128x64xf32>
    %93 = arith.maximumf %91, %92 : vector<128x64xf32>
    %c4_58 = arith.constant 4 : index
    %c0_59 = arith.constant 0 : index
    %c0_60 = arith.constant 0 : index
    %94 = vector.load %arg3[%c4_58, %c0_59, %c0_60] : memref<7x64x64xf32, #tpu.memory_space<vmem>>, vector<1x64x64xf32>
    %95 = vector.shape_cast %94 : vector<1x64x64xf32> to vector<64x64xf32>
    %cst_61 = arith.constant dense<0.000000e+00> : vector<128x64xf32>
    %96 = tpu.matmul %93, %95, %cst_61 {dimension_numbers = #tpu.dot_dimension_numbers<[1], [0], [0], [1], [0, 0, 1, 1], [], []>} : vector<128x64xf32>, vector<64x64xf32>, vector<128x64xf32> -> vector<128x64xf32>
    %c10 = arith.constant 10 : index
    %c0_62 = arith.constant 0 : index
    %97 = vector.load %arg4[%c10, %c0_62] : memref<19x64xf32, #tpu.memory_space<vmem>>, vector<1x64xf32>
    %98 = vector.broadcast %97 : vector<1x64xf32> to vector<128x64xf32>
    %99 = arith.addf %96, %98 : vector<128x64xf32>
    %c11 = arith.constant 11 : index
    %c0_63 = arith.constant 0 : index
    %100 = vector.load %arg4[%c11, %c0_63] : memref<19x64xf32, #tpu.memory_space<vmem>>, vector<1x64xf32>
    %c12 = arith.constant 12 : index
    %c0_64 = arith.constant 0 : index
    %101 = vector.load %arg4[%c12, %c0_64] : memref<19x64xf32, #tpu.memory_space<vmem>>, vector<1x64xf32>
    %cst_65 = arith.constant 0.000000e+00 : f32
    %102 = vector.broadcast %cst_65 : f32 to vector<128x64xf32>
    %103 = arith.maximumf %99, %102 : vector<128x64xf32>
    %cst_66 = arith.constant dense<0.000000e+00> : vector<64xf32>
    %104 = vector.multi_reduction <add>, %103, %cst_66 [0] : vector<128x64xf32> to vector<64xf32>
    %105 = vector.shape_cast %104 : vector<64xf32> to vector<1x64xf32>
    %cst_67 = arith.constant 7.812500e-03 : f32
    %106 = vector.broadcast %cst_67 : f32 to vector<1x64xf32>
    %107 = arith.mulf %105, %106 : vector<1x64xf32>
    %108 = vector.broadcast %107 : vector<1x64xf32> to vector<128x64xf32>
    %109 = arith.subf %103, %108 : vector<128x64xf32>
    %110 = arith.mulf %109, %109 : vector<128x64xf32>
    %cst_68 = arith.constant dense<0.000000e+00> : vector<64xf32>
    %111 = vector.multi_reduction <add>, %110, %cst_68 [0] : vector<128x64xf32> to vector<64xf32>
    %112 = vector.shape_cast %111 : vector<64xf32> to vector<1x64xf32>
    %cst_69 = arith.constant 7.812500e-03 : f32
    %113 = vector.broadcast %cst_69 : f32 to vector<1x64xf32>
    %114 = arith.mulf %112, %113 : vector<1x64xf32>
    %cst_70 = arith.constant 9.99999974E-6 : f32
    %115 = vector.broadcast %cst_70 : f32 to vector<1x64xf32>
    %116 = arith.addf %114, %115 : vector<1x64xf32>
    %117 = math.rsqrt %116 : vector<1x64xf32>
    %118 = arith.mulf %117, %100 : vector<1x64xf32>
    %119 = vector.broadcast %118 : vector<1x64xf32> to vector<128x64xf32>
    %120 = arith.mulf %109, %119 : vector<128x64xf32>
    %121 = vector.broadcast %101 : vector<1x64xf32> to vector<128x64xf32>
    %122 = arith.addf %120, %121 : vector<128x64xf32>
    %c0_71 = arith.constant 0 : index
    %c3_72 = arith.constant 3 : index
    %c0_73 = arith.constant 0 : index
    %c0_74 = arith.constant 0 : index
    %123 = vector.load %arg2[%c0_71, %c3_72, %c0_73, %c0_74] : memref<1x4x128x128xf32, #tpu.memory_space<vmem>>, vector<1x1x128x128xf32>
    %124 = vector.shape_cast %123 : vector<1x1x128x128xf32> to vector<128x128xf32>
    %cst_75 = arith.constant dense<0.000000e+00> : vector<128x64xf32>
    %125 = tpu.matmul %124, %122, %cst_75 {dimension_numbers = #tpu.dot_dimension_numbers<[1], [0], [0], [1], [0, 0, 1, 1], [], []>} : vector<128x128xf32>, vector<128x64xf32>, vector<128x64xf32> -> vector<128x64xf32>
    %c5_76 = arith.constant 5 : index
    %c0_77 = arith.constant 0 : index
    %c0_78 = arith.constant 0 : index
    %126 = vector.load %arg3[%c5_76, %c0_77, %c0_78] : memref<7x64x64xf32, #tpu.memory_space<vmem>>, vector<1x64x64xf32>
    %127 = vector.shape_cast %126 : vector<1x64x64xf32> to vector<64x64xf32>
    %cst_79 = arith.constant dense<0.000000e+00> : vector<128x64xf32>
    %128 = tpu.matmul %125, %127, %cst_79 {dimension_numbers = #tpu.dot_dimension_numbers<[1], [0], [0], [1], [0, 0, 1, 1], [], []>} : vector<128x64xf32>, vector<64x64xf32>, vector<128x64xf32> -> vector<128x64xf32>
    %c13 = arith.constant 13 : index
    %c0_80 = arith.constant 0 : index
    %129 = vector.load %arg4[%c13, %c0_80] : memref<19x64xf32, #tpu.memory_space<vmem>>, vector<1x64xf32>
    %130 = vector.broadcast %129 : vector<1x64xf32> to vector<128x64xf32>
    %131 = arith.addf %128, %130 : vector<128x64xf32>
    %cst_81 = arith.constant 0.000000e+00 : f32
    %132 = vector.broadcast %cst_81 : f32 to vector<128x64xf32>
    %133 = arith.maximumf %131, %132 : vector<128x64xf32>
    %c6_82 = arith.constant 6 : index
    %c0_83 = arith.constant 0 : index
    %c0_84 = arith.constant 0 : index
    %134 = vector.load %arg3[%c6_82, %c0_83, %c0_84] : memref<7x64x64xf32, #tpu.memory_space<vmem>>, vector<1x64x64xf32>
    %135 = vector.shape_cast %134 : vector<1x64x64xf32> to vector<64x64xf32>
    %cst_85 = arith.constant dense<0.000000e+00> : vector<128x64xf32>
    %136 = tpu.matmul %133, %135, %cst_85 {dimension_numbers = #tpu.dot_dimension_numbers<[1], [0], [0], [1], [0, 0, 1, 1], [], []>} : vector<128x64xf32>, vector<64x64xf32>, vector<128x64xf32> -> vector<128x64xf32>
    %c14 = arith.constant 14 : index
    %c0_86 = arith.constant 0 : index
    %137 = vector.load %arg4[%c14, %c0_86] : memref<19x64xf32, #tpu.memory_space<vmem>>, vector<1x64xf32>
    %138 = vector.broadcast %137 : vector<1x64xf32> to vector<128x64xf32>
    %139 = arith.addf %136, %138 : vector<128x64xf32>
    %c15 = arith.constant 15 : index
    %c0_87 = arith.constant 0 : index
    %140 = vector.load %arg4[%c15, %c0_87] : memref<19x64xf32, #tpu.memory_space<vmem>>, vector<1x64xf32>
    %c16 = arith.constant 16 : index
    %c0_88 = arith.constant 0 : index
    %141 = vector.load %arg4[%c16, %c0_88] : memref<19x64xf32, #tpu.memory_space<vmem>>, vector<1x64xf32>
    %cst_89 = arith.constant 0.000000e+00 : f32
    %142 = vector.broadcast %cst_89 : f32 to vector<128x64xf32>
    %143 = arith.maximumf %139, %142 : vector<128x64xf32>
    %cst_90 = arith.constant dense<0.000000e+00> : vector<64xf32>
    %144 = vector.multi_reduction <add>, %143, %cst_90 [0] : vector<128x64xf32> to vector<64xf32>
    %145 = vector.shape_cast %144 : vector<64xf32> to vector<1x64xf32>
    %cst_91 = arith.constant 7.812500e-03 : f32
    %146 = vector.broadcast %cst_91 : f32 to vector<1x64xf32>
    %147 = arith.mulf %145, %146 : vector<1x64xf32>
    %148 = vector.broadcast %147 : vector<1x64xf32> to vector<128x64xf32>
    %149 = arith.subf %143, %148 : vector<128x64xf32>
    %150 = arith.mulf %149, %149 : vector<128x64xf32>
    %cst_92 = arith.constant dense<0.000000e+00> : vector<64xf32>
    %151 = vector.multi_reduction <add>, %150, %cst_92 [0] : vector<128x64xf32> to vector<64xf32>
    %152 = vector.shape_cast %151 : vector<64xf32> to vector<1x64xf32>
    %cst_93 = arith.constant 7.812500e-03 : f32
    %153 = vector.broadcast %cst_93 : f32 to vector<1x64xf32>
    %154 = arith.mulf %152, %153 : vector<1x64xf32>
    %cst_94 = arith.constant 9.99999974E-6 : f32
    %155 = vector.broadcast %cst_94 : f32 to vector<1x64xf32>
    %156 = arith.addf %154, %155 : vector<1x64xf32>
    %157 = math.rsqrt %156 : vector<1x64xf32>
    %158 = arith.mulf %157, %140 : vector<1x64xf32>
    %159 = vector.broadcast %158 : vector<1x64xf32> to vector<128x64xf32>
    %160 = arith.mulf %149, %159 : vector<128x64xf32>
    %161 = vector.broadcast %141 : vector<1x64xf32> to vector<128x64xf32>
    %162 = arith.addf %160, %161 : vector<128x64xf32>
    %c17 = arith.constant 17 : index
    %c0_95 = arith.constant 0 : index
    %163 = vector.load %arg4[%c17, %c0_95] : memref<19x64xf32, #tpu.memory_space<vmem>>, vector<1x64xf32>
    %cst_96 = arith.constant dense<0.000000e+00> : vector<1x128xf32>
    %164 = tpu.matmul %163, %162, %cst_96 {dimension_numbers = #tpu.dot_dimension_numbers<[1], [1], [0], [0], [0, 0, 1, 0], [], []>} : vector<1x64xf32>, vector<128x64xf32>, vector<1x128xf32> -> vector<1x128xf32>
    %c18 = arith.constant 18 : index
    %c0_97 = arith.constant 0 : index
    %165 = vector.load %arg4[%c18, %c0_97] : memref<19x64xf32, #tpu.memory_space<vmem>>, vector<1x1xf32>
    %166 = vector.broadcast %165 : vector<1x1xf32> to vector<1x128xf32>
    %167 = arith.addf %164, %166 : vector<1x128xf32>
    %c0_98 = arith.constant 0 : index
    %c0_99 = arith.constant 0 : index
    %c0_100 = arith.constant 0 : index
    %168 = vector.load %arg5[%c0_98, %c0_99, %c0_100] : memref<1x1x128xf32, #tpu.memory_space<vmem>>, vector<1x1x128xf32>
    %169 = vector.shape_cast %168 : vector<1x1x128xf32> to vector<1x128xf32>
    %170 = vector.shape_cast %167 : vector<1x128xf32> to vector<1x1x128xf32>
    tpu.vector_store %arg5[%c0_98, %c0_99, %c0_100], %170 {strides = array<i32>} : memref<1x1x128xf32, #tpu.memory_space<vmem>>, vector<1x1x128xf32>,
    return
  }
  func.func @transform_0(%arg0: i32) -> (i32, i32, i32) {
    %c0_i32 = arith.constant 0 : i32
    %c0_i32_0 = arith.constant 0 : i32
    %c0_i32_1 = arith.constant 0 : i32
    return %arg0, %c0_i32, %c0_i32_0 : i32, i32, i32
  }
  func.func @transform_1(%arg0: i32) -> (i32, i32, i32, i32) {
    %c0_i32 = arith.constant 0 : i32
    %c0_i32_0 = arith.constant 0 : i32
    %c0_i32_1 = arith.constant 0 : i32
    %c0_i32_2 = arith.constant 0 : i32
    return %arg0, %c0_i32, %c0_i32_0, %c0_i32_1 : i32, i32, i32, i32
  }
  func.func @transform_2(%arg0: i32) -> (i32, i32, i32) {
    %c0_i32 = arith.constant 0 : i32
    %c0_i32_0 = arith.constant 0 : i32
    %c0_i32_1 = arith.constant 0 : i32
    %c0_i32_2 = arith.constant 0 : i32
    return %c0_i32, %c0_i32_0, %c0_i32_1 : i32, i32, i32
  }
  func.func @transform_3(%arg0: i32) -> (i32, i32) {
    %c0_i32 = arith.constant 0 : i32
    %c0_i32_0 = arith.constant 0 : i32
    %c0_i32_1 = arith.constant 0 : i32
    return %c0_i32, %c0_i32_0 : i32, i32
  }
  func.func @transform_4(%arg0: i32) -> (i32, i32, i32) {
    %c0_i32 = arith.constant 0 : i32
    %c0_i32_0 = arith.constant 0 : i32
    %c0_i32_1 = arith.constant 0 : i32
    return %arg0, %c0_i32, %c0_i32_0 : i32, i32, i32
  }
}

</mosaic_0001>

<bundles_post_ra>
// kernel: tpu_custom_call.1
= control target key start
LH: loop header
LB: loop body
LE: loop exit
PB: predicated region body
PF: predicated region fallthrough
CT: control target
= control target key end

     0   :  { %9 = vsyncpa [#allocation3], 0  ;;  %s6236_s0 = inlined_call_operand.vmem [shape: f32[2,128,1], index: 0, kind: input, shape index: {}]   ;;  %s6237_s1 = inlined_call_operand.hbm [shape: f32[2,4,128,128], index: 1, kind: input, shape index: {}]   ;;  %s6238_s2 = inlined_call_operand.hbm [shape: f32[7,64,64], index: 2, kind: input, shape index: {}]   ;;  %s6239_s3 = inlined_call_operand.vmem [shape: f32[19,64], index: 3, kind: input, shape index: {}]   ;;  %s6240_s4 = inlined_call_operand.hbm [shape: f32[2,1,128], index: 4, kind: output, shape index: {}]  }
   0x1   :  { %11 = vsyncpa [#allocation3 + $0x1], 0 }
   0x2   :  { %12 = vsyncpa [#allocation6], 0 }
   0x3   :  { %13 = vsyncpa [#allocation4], 0 }
   0x4   :  { %15 = vsyncpa [#allocation4 + $0x1], 0  ;;  %s5022_s15 = smov 0   ;;  %s5024_s16 = smov 0  }
   0x5   :  { %s5026_s17 = smov 0   ;;  %s5028_s18 = smov 0  }
   0x6 LB: > { %s5043_s19 = sadd.s32 4294967295, %s4986_s18   ;;  %s3438_s20 = sadd.s32 4294967294, %s4986_s18   ;;  %s4986_s18 = sphi %s5028_s18, %s6262_s18   ;;  %s4982_s17 = sphi %s5026_s17, %s6261_s17   ;;  %s4978_s16 = sphi %s5024_s16, %s6260_s16   ;;  %s4974_s15 = sphi %s5022_s15, %s6259_s15  }
   0x7   : > { %p67_p0 = scmp.ne.s32.totalorder %s4978_s16, %s4974_s15  ;;  %p6241_p1 = scmp.eq.s32.totalorder %s5043_s19, 0 }
   0x8   : > { %p139_p3 = scmp.eq.s32.totalorder %s3438_s20, 1  ;;  %p3439_p5 = scmp.ge.s32.totalorder %s4986_s18, 1 }
   0x9   : > { %p5052_p4 = por %p6241_p1, %p67_p0  ;;  %p146_p7 = scmp.lt.s32.totalorder %s4986_s18, 3 }
   0xa   : > { %p5057_p6 = por %p139_p3, %p67_p0  ;;  %s4988_s24 = smov [#allocation5]  }
   0xb   : > { %s6244_s21 = scalar_select %p5052_p4, 1, 0 }
   0xc   : > { %s6245_s22 = scalar_select %p5057_p6, 1, 0 }
   0xd   : > { %p5062_p8 = pnand %p3439_p5, %p146_p7  ;;  %s158_s25 = sshll.u32 %s4988_s24, 4  ;;  %s5066_s25 = int_to_ptr.vmem [resolvable:$true] %s158_s25 }
   0xe   : > { %s5078_s27 = sadd.s32 1, %s4986_s18   ;;  %s54_s28 = sadd.s32 1, %s4982_s17 }
   0xf   : > { %s6246_s23 = scalar_select %p5062_p8, 1, 0 }
  0x10   : > { %p4793_p9 = pneg %p5062_p8  ;;  %s51_s29 = ssub.s32 %s4986_s18, %s5078_s27 }
  0x11   : > { %s4858_s6 = scalar_lea.hbm %s6238_s2, 7168 }
  0x12   : > { %p5073_p11 = pnand %p4793_p9, %p6241_p1  ;;  %p4859_p12 = scmp.ne.s32.totalorder %s6238_s2, %s4858_s6 }
  0x13   : > { %p4865_p5 = scmp.lt.u32.totalorder %s4858_s6, %s6238_s2 }
  0x14   : > { %p4860_p13 = pneg %p5073_p11 }
  0x16   : > { %p4861_p0 = pnand %p4860_p13, %p4859_p12 }
  0x18   : > { %p4862_p3 = pneg %p4861_p0 }
  0x1a   : > { %p4867_p7 = pnand %p4865_p5, %p4862_p3 }
  0x1c   : > { %4870 = shalt.err (!%p4867_p7)
}
  0x1d   : > { %s4871_s11 = scalar_lea.vmem %s5066_s25, 7168  ;;  %p4879_p2 = scmp.lt.s32.totalorder %s5066_s25, %s5066_s25 }
  0x1e   : > { %p4872_p9 = scmp.ne.s32.totalorder %s5066_s25, %s4871_s11  ;;  %p4880_p6 = scmp.lt.s32.totalorder %s4871_s11, %s4871_s11 }
  0x20   : > { %p4874_p10 = pnand %p4872_p9, %p4860_p13  ;;  %p4881_p4 = por %p4880_p6, %p4879_p2 }
  0x22   : > { %p4875_p1 = pneg %p4874_p10 }
  0x24   : > { %p4882_p8 = pnand %p4881_p4, %p4875_p1 }
  0x26   : > { %4885 = shalt.err (!%p4882_p8)
}
  0x27   : > { %s4989_s12 = smov 128   ;;  %s4990_s13 = smov 8  }
  0x28   : > { %4796 = dma.hbm_to_vmem [thread:$0]  (!%p5073_p11), %s6238_s2, 7168, %s5066_s25, [#allocation6], %s4989_s12, %s4989_s12, %s4990_s13  }
  0x29   : > { %p52_p1 = scmp.eq.s32.totalorder %s51_s29, 0  ;;  %p61_p2 = scmp.ne.s32.totalorder %s4982_s17, %s4978_s16 }
  0x2a   : > { %p62_p4 = scmp.eq.s32.totalorder %s4986_s18, 0  ;;  %p4806_p6 = scmp.lt.s32.totalorder %s4986_s18, 2 }
  0x2b   : > { %s5112_s24 = scalar_select %p52_p1, %s4982_s17, %s54_s28  }
  0x2c   : > { %p63_p8 = por %p62_p4, %p61_p2  ;;  %p6248_p10 = scmp.eq.s32.totalorder %s5043_s19, 1 }
  0x2d   : > { %s183_s26 = sand.u32 1, %s4982_s17   ;;  %s3643_s5 = sshll.u32 %s4986_s18, 13 }
  0x2e   : > { %p5116_p12 = por %p6248_p10, %p61_p2  ;;  %s3442_s6 = sshll.u32 %s183_s26, 9 }
  0x2f   : > { %s5125_s9 = scalar_lea.hbm %s6237_s1, %s3643_s5  ;;  %s187_s25 = scalar_lea.vmem [#allocation2], %s3442_s6 }
  0x30   : > { %s194_s28 = sshll.u32 %s187_s25, 4  ;;  %p5127_p11 = pnand %p4806_p6, %p63_p8  ;;  %s5131_s28 = int_to_ptr.vmem [resolvable:$true] %s194_s28 }
  0x31   : > { %s5133_s10 = scalar_lea.sflag [#allocation3], %s183_s26  ;;  %s4886_s11 = scalar_lea.hbm %s5125_s9, 8192 }
  0x32   : > { %p4887_p13 = scmp.ne.s32.totalorder %s5125_s9, %s4886_s11  ;;  %p4888_p0 = pneg %p5127_p11 }
  0x33   : > { %s4891_s5 = scalar_lea.hbm %s6237_s1, 16384  ;;  %p4892_p7 = scmp.lt.u32.totalorder %s5125_s9, %s6237_s1 }
  0x34   : > { %p4889_p3 = pnand %p4888_p0, %p4887_p13  ;;  %p4893_p9 = scmp.lt.u32.totalorder %s4891_s5, %s4886_s11 }
  0x35   : > { %p4895_p2 = scmp.lt.u32.totalorder %s4886_s11, %s5125_s9 }
  0x36   : > { %p4890_p5 = pneg %p4889_p3  ;;  %p4894_p1 = por %p4893_p9, %p4892_p7 }
  0x38   : > { %p4896_p4 = por %p4895_p2, %p4894_p1 }
  0x3a   : > { %p4897_p6 = pnand %p4896_p4, %p4890_p5 }
  0x3c   : > { %4900 = shalt.err (!%p4897_p6)
}
  0x3d   : > { %s4901_s26 = scalar_lea.vmem %s5131_s28, 8192  ;;  %s4991_s8 = smov [#allocation2]  }
  0x3e   : > { %p4902_p8 = scmp.ne.s32.totalorder %s5131_s28, %s4901_s26  ;;  %s4906_s25 = sshll.u32 %s4991_s8, 4  ;;  %s4907_s25 = int_to_ptr.vmem [resolvable:$false] %s4906_s25 }
  0x3f   : > { %s4908_s14 = scalar_lea.vmem %s4907_s25, 16384  ;;  %p4909_p3 = scmp.lt.s32.totalorder %s5131_s28, %s4907_s25 }
  0x40   : > { %p4904_p10 = pnand %p4902_p8, %p4888_p0  ;;  %p4910_p7 = scmp.lt.s32.totalorder %s4908_s14, %s4901_s26 }
  0x42   : > { %p4905_p13 = pneg %p4904_p10  ;;  %p4911_p9 = por %p4910_p7, %p4909_p3 }
  0x44   : > { %p4912_p1 = pnand %p4911_p9, %p4905_p13 }
  0x46   : > { %4915 = shalt.err (!%p4912_p1)
}
  0x47   : > { %4800 = dma.hbm_to_vmem [thread:$0]  (!%p5127_p11), %s5125_s9, 8192, %s5131_s28, %s5133_s10, %s4989_s12, %s4989_s12, %s4990_s13  }
  0x48   : > { %p6251_p0 = scmp.ne.s32.totalorder %s6246_s23, 0 }
  0x49   : > { %s5167_s11 = sand.u32 (!%p6251_p0), 1, %s4978_s16   ;;  %p6252_p5 = scmp.ne.s32.totalorder (!%p6251_p0), %s6244_s21, 0 }
  0x4a   : > { %206 = sbr.rel (%p6251_p0) target bundleno = 3513 (0xdb9), region = 36  ;;  %s3446_s20 = sshll.u32 (!%p6251_p0), %s5167_s11, 9 }
  0x4b   : > { %s209_s5 = scalar_lea.sflag (!%p6251_p0), [#allocation3], %s5167_s11  ;;  %s5171_s6 = scalar_lea.vmem (!%p6251_p0), [#allocation2], %s3446_s20 }
  0x51   : > { %4961 = dma.done.wait (%p6252_p5), %s209_s5, 8192  }
  0x52   : > { %4963 = vsyncadd (%p6252_p5), %s209_s5, 4294959104  ;;  %p6253_p11 = scmp.eq.s32.totalorder %s5043_s19, 0 }
  0x54   : > { %4965 = dma.done.wait (%p6253_p11), [#allocation6], 7168   ;;  %p6254_p2 = pmov %p6253_p11 }
  0x55   : > { %p245_p4 = scmp.lt.s32.totalorder %s5043_s19, 1  ;;  %v4992_v0 = vmov 0   ;;  %v3209_v17 = vld [vmem:[%s6239_s3 + $0x12] sm:$0x1]  ;;  %v367_v18 = vld [vmem:[%s5171_s6] sm:$0xff]  ;;  %v550_v20 = vld [vmem:[#allocation5 + $0x8] sm:$0xff] }
  0x56   : > { %4967 = vsyncadd (%p6254_p2), [#allocation6], 4294960128  ;;  %4849 = vset.pattern.permute.xlu1 %v4992_v0  ;;  %4848 = vset.pattern.permute.xlu0 %v4992_v0  ;;  %v549_v19 = vld [vmem:[#allocation5] sm:$0xff]  ;;  %v551_v21 = vld [vmem:[#allocation5 + $0x10] sm:$0xff]  ;;  %vm562_vm0 = vcmask 523264   ;;  %vm4994_vm1 = vmmov 0  }
  0x57   : > { %s246_s23 = scalar_select %p245_p4, %s5043_s19, 1  ;;  %3990 = vmatprep.mubr.f32.mxu0 %v367_v18  ;;  %v4529_v22 = vpack.c.bf16 %v550_v20, %v549_v19  ;;  %v552_v23 = vld [vmem:[#allocation5 + $0x18] sm:$0xff]  ;;  %v553_v25 = vld [vmem:[#allocation5 + $0x20] sm:$0xff]  ;;  %v554_v26 = vld [vmem:[#allocation5 + $0x28] sm:$0xff] }
  0x58   : > { %v4533_v24 = vpack.c.bf16 %v552_v23, %v551_v21  ;;  %v4537_v27 = vpack.c.bf16 %v554_v26, %v553_v25  ;;  %v3450_v30 = vld [vmem:[%s6239_s3] ss:$0 sm:$0xff]  ;;  %v381_v18 = vld [vmem:[%s5171_s6 + $0x70] sm:$0xff]  ;;  %v382_v19 = vld [vmem:[%s5171_s6 + $0x78] sm:$0xff]  ;;  %s3640_s14 = sshll.u32 %s5043_s19, 4  ;;  %s244_s20 = scalar_lea.vmem [#allocation7], %s5167_s11 }
  0x59   : > { %s3644_s12 = sshll.u32 %s246_s23, 7  ;;  %4530 = vmatprep.subr.bf16.mxu1 %v4529_v22  ;;  %v555_v20 = vld [vmem:[#allocation5 + $0x30] sm:$0xff]  ;;  %v556_v21 = vld [vmem:[#allocation5 + $0x38] sm:$0xff]  ;;  %v3451_v23 = vld [vmem:[%s6239_s3 + $0x1] ss:$0 sm:$0xff]  ;;  %s3350_s5 = sshll.u32 %s244_s20, 4  ;;  %s6194_s5 = int_to_ptr.vmem [resolvable:$true] %s3350_s5 }
  0x5a   : > { %s249_s28 = scalar_lea.vmem %s6236_s0, %s3644_s12  ;;  %4532 = vmatpush3.bf16.msra.mxu1 %v4529_v22  ;;  %v4541_v22 = vpack.c.bf16 %v556_v21, %v555_v20  ;;  %vm6144_vm2 = vmpackc.low %vm562_vm0, %vm562_vm0  ;;  %s6192_s13 = scalar_lea.hbm %s6240_s4, %s3640_s14 }
  0x5b   : > { %v252_v1 = vld [vmem:[%s249_s28 + $0x10] sm:$0xff]  ;;  %v250_v2 = vld [vmem:[%s249_s28] sm:$0xff]  ;;  %v253_v3 = vld [vmem:[%s249_s28 + $0x18] sm:$0xff]  ;;  %4534 = vmatprep.subr.bf16.mxu1 %v4533_v24  ;;  %s4916_s9 = scalar_lea.vmem %s6194_s5, 16  ;;  %s4996_s19 = smov [#allocation7]  }
  0x5c   : > { %279 = vperm.xlu1 %4849, %v252_v1   ;;  %269 = vperm.xlu0 %4848, %v250_v2   ;;  %v251_v4 = vld [vmem:[%s249_s28 + $0x8] sm:$0xff]  ;;  %v254_v6 = vld [vmem:[%s249_s28 + $0x20] sm:$0xff]  ;;  %v257_v7 = vld [vmem:[%s249_s28 + $0x38] sm:$0xff]  ;;  %p4917_p6 = scmp.ne.s32.totalorder %s6194_s5, %s4916_s9 }
  0x5d   : > { %v255_v5 = vld [vmem:[%s249_s28 + $0x28] sm:$0xff]  ;;  %v256_v8 = vld [vmem:[%s249_s28 + $0x30] sm:$0xff]  ;;  %v258_v10 = vld [vmem:[%s249_s28 + $0x40] sm:$0xff] }
  0x5e   : > { %v259_v9 = vld [vmem:[%s249_s28 + $0x48] sm:$0xff]  ;;  %v261_v11 = vld [vmem:[%s249_s28 + $0x58] sm:$0xff]  ;;  %v260_v12 = vld [vmem:[%s249_s28 + $0x50] sm:$0xff]  ;;  %4536 = vmatpush3.bf16.msra.mxu1 %v4533_v24  ;;  %p4918_p8 = pnand %p4917_p6, %p5116_p12 }
  0x5f   : > { %v263_v13 = vld [vmem:[%s249_s28 + $0x68] sm:$0xff]  ;;  %v262_v14 = vld [vmem:[%s249_s28 + $0x60] sm:$0xff]  ;;  %v265_v15 = vld [vmem:[%s249_s28 + $0x78] sm:$0xff]  ;;  %4538 = vmatprep.subr.bf16.mxu1 %v4537_v27 }
  0x60   : > { %284 = vperm.xlu1 %4849, %v253_v3   ;;  %274 = vperm.xlu0 %4848, %v251_v4   ;;  %v264_v16 = vld [vmem:[%s249_s28 + $0x70] sm:$0xff]  ;;  %p4919_p10 = pneg %p4918_p8  ;;  %s4920_s28 = sshll.u32 %s4996_s19, 4  ;;  %s4921_s28 = int_to_ptr.vmem [resolvable:$false] %s4920_s28 }
  0x61   : > { %s4922_s21 = scalar_lea.vmem %s4921_s28, 32  ;;  %p4923_p13 = scmp.lt.s32.totalorder %s6194_s5, %s4921_s28 }
  0x62   : > { %4540 = vmatpush3.bf16.msra.mxu1 %v4537_v27  ;;  %p4924_p3 = scmp.lt.s32.totalorder %s4922_s21, %s4916_s9 }
  0x63   : > { %4542 = vmatprep.subr.bf16.mxu1 %v4541_v22 }
  0x64   : > { %294 = vperm.xlu1 %4849, %v255_v5   ;;  %289 = vperm.xlu0 %4848, %v254_v6   ;;  %v368_v5 = vld [vmem:[%s5171_s6 + $0x8] sm:$0xff]  ;;  %v369_v6 = vld [vmem:[%s5171_s6 + $0x10] sm:$0xff]  ;;  %p4925_p7 = por %p4924_p3, %p4923_p13 }
  0x66   : > { %4544 = vmatpush3.bf16.msra.mxu1 %v4541_v22  ;;  %p4926_p9 = pnand %p4925_p7, %p4919_p10 }
  0x68   : > { %304 = vperm.xlu1 %4849, %v257_v7   ;;  %299 = vperm.xlu0 %4848, %v256_v8   ;;  %v370_v7 = vld [vmem:[%s5171_s6 + $0x18] sm:$0xff]  ;;  %v371_v8 = vld [vmem:[%s5171_s6 + $0x20] sm:$0xff] }
  0x6c   : > { %314 = vperm.xlu1 %4849, %v259_v9   ;;  %309 = vperm.xlu0 %4848, %v258_v10   ;;  %v372_v9 = vld [vmem:[%s5171_s6 + $0x28] sm:$0xff]  ;;  %v373_v10 = vld [vmem:[%s5171_s6 + $0x30] sm:$0xff] }
  0x70   : > { %324 = vperm.xlu1 %4849, %v261_v11   ;;  %319 = vperm.xlu0 %4848, %v260_v12   ;;  %v374_v11 = vld [vmem:[%s5171_s6 + $0x38] sm:$0xff]  ;;  %v375_v12 = vld [vmem:[%s5171_s6 + $0x40] sm:$0xff] }
  0x74   : > { %334 = vperm.xlu1 %4849, %v263_v13   ;;  %329 = vperm.xlu0 %4848, %v262_v14   ;;  %v376_v13 = vld [vmem:[%s5171_s6 + $0x48] sm:$0xff]  ;;  %v377_v14 = vld [vmem:[%s5171_s6 + $0x50] sm:$0xff] }
  0x78   : > { %344 = vperm.xlu1 %4849, %v265_v15   ;;  %339 = vperm.xlu0 %4848, %v264_v16   ;;  %v378_v15 = vld [vmem:[%s5171_s6 + $0x58] sm:$0xff]  ;;  %v379_v16 = vld [vmem:[%s5171_s6 + $0x60] sm:$0xff] }
  0x7c   : > { %3212 = vperm.xlu0 %4848, %v3209_v17   ;;  %v380_v17 = vld [vmem:[%s5171_s6 + $0x68] sm:$0xff] }
  0xdb   : > { %v280_v28 = vpop.permute.xlu1 %279  ;;  %v270_v29 = vpop.permute.xlu0 %269 }
  0xdc   : > { %v353_v33 = vmul.f32 %v3450_v30, %v280_v28  ;;  %v351_v34 = vmul.f32 %v3450_v30, %v270_v29 }
  0xdf   : > { %v285_v31 = vpop.permute.xlu1 %284  ;;  %v275_v32 = vpop.permute.xlu0 %274 }
  0xe0   : > { %v354_v35 = vmul.f32 %v3450_v30, %v285_v31  ;;  %v352_v36 = vmul.f32 %v3450_v30, %v275_v32 }
  0xe2   : > { %v4497_v37 = vpack.c.bf16 %v352_v36, %v351_v34  ;;  %v4501_v40 = vpack.c.bf16 %v354_v35, %v353_v33 }
  0xe3   : > { %v295_v38 = vpop.permute.xlu1 %294  ;;  %v290_v39 = vpop.permute.xlu0 %289 }
  0xe4   : > { %v356_v41 = vmul.f32 %v3450_v30, %v295_v38  ;;  %v355_v42 = vmul.f32 %v3450_v30, %v290_v39  ;;  %4498 = vmatprep.subr.bf16.mxu0 %v4497_v37 }
  0xe5   : > { %4500 = vmatpush3.bf16.msra.mxu0 %v4497_v37 }
  0xe6   : > { %4502 = vmatprep.subr.bf16.mxu0 %v4501_v40  ;;  %v4505_v45 = vpack.c.bf16 %v356_v41, %v355_v42 }
  0xe7   : > { %v305_v43 = vpop.permute.xlu1 %304  ;;  %v300_v44 = vpop.permute.xlu0 %299 }
  0xe8   : > { %v358_v46 = vmul.f32 %v3450_v30, %v305_v43  ;;  %v357_v47 = vmul.f32 %v3450_v30, %v300_v44 }
  0xe9   : > { %4504 = vmatpush3.bf16.msra.mxu0 %v4501_v40 }
  0xea   : > { %4506 = vmatprep.subr.bf16.mxu0 %v4505_v45  ;;  %v4509_v50 = vpack.c.bf16 %v358_v46, %v357_v47 }
  0xeb   : > { %v315_v48 = vpop.permute.xlu1 %314  ;;  %v310_v49 = vpop.permute.xlu0 %309 }
  0xec   : > { %v360_v51 = vmul.f32 %v3450_v30, %v315_v48  ;;  %v359_v52 = vmul.f32 %v3450_v30, %v310_v49 }
  0xed   : > { %4508 = vmatpush3.bf16.msra.mxu0 %v4505_v45 }
  0xee   : > { %4510 = vmatprep.subr.bf16.mxu0 %v4509_v50  ;;  %v4513_v55 = vpack.c.bf16 %v360_v51, %v359_v52 }
  0xef   : > { %v325_v53 = vpop.permute.xlu1 %324  ;;  %v320_v54 = vpop.permute.xlu0 %319 }
  0xf0   : > { %v362_v56 = vmul.f32 %v3450_v30, %v325_v53  ;;  %v361_v57 = vmul.f32 %v3450_v30, %v320_v54 }
  0xf1   : > { %4512 = vmatpush3.bf16.msra.mxu0 %v4509_v50 }
  0xf2   : > { %4514 = vmatprep.subr.bf16.mxu0 %v4513_v55  ;;  %v4517_v60 = vpack.c.bf16 %v362_v56, %v361_v57 }
  0xf3   : > { %v335_v58 = vpop.permute.xlu1 %334  ;;  %v330_v59 = vpop.permute.xlu0 %329 }
  0xf4   : > { %v364_v61 = vmul.f32 %v3450_v30, %v335_v58  ;;  %v363_v62 = vmul.f32 %v3450_v30, %v330_v59 }
  0xf5   : > { %4516 = vmatpush3.bf16.msra.mxu0 %v4513_v55 }
  0xf6   : > { %4518 = vmatprep.subr.bf16.mxu0 %v4517_v60  ;;  %v4521_v1 = vpack.c.bf16 %v364_v61, %v363_v62 }
  0xf7   : > { %v345_v63 = vpop.permute.xlu1 %344  ;;  %v340_v0 = vpop.permute.xlu0 %339 }
  0xf8   : > { %v366_v2 = vmul.f32 %v3450_v30, %v345_v63  ;;  %v365_v3 = vmul.f32 %v3450_v30, %v340_v0 }
  0xf9   : > { %4520 = vmatpush3.bf16.msra.mxu0 %v4517_v60 }
  0xfa   : > { %4522 = vmatprep.subr.bf16.mxu0 %v4521_v1  ;;  %v4525_v4 = vpack.c.bf16 %v366_v2, %v365_v3 }
  0xfd   : > { %4524 = vmatpush3.bf16.msra.mxu0 %v4521_v1 }
  0xfe   : > { %4526 = vmatprep.subr.bf16.mxu0 %v4525_v4 }
 0x101   : > { %4528 = vmatpush3.bf16.msra.mxu0 %v4525_v4 }
 0x104   : > { %3991 = vmatmul.mubr.f32.vlgmr.msra.gmra.mrb[0].mxu0 %v368_v5 }
 0x105   : > { %3993 = vmatprep.mubr.f32.mxu0 %v369_v6 }
 0x108   : > { %3994 = vmatmul.mubr.f32.gmra.mrb[2].mxu0 %v370_v7 }
 0x109   : > { %3996 = vmatprep.mubr.f32.mxu0 %v371_v8  ;;  %v5230_v8 = vld [vmem:[%s6239_s3 + $0x2] ss:$0 sm:$0xff] }
 0x10c   : > { %3997 = vmatmul.mubr.f32.gmra.mrb[4].mxu0 %v372_v9 }
 0x10d   : > { %3999 = vmatprep.mubr.f32.mxu0 %v373_v10 }
 0x110   : > { %4000 = vmatmul.mubr.f32.gmra.mrb[6].mxu0 %v374_v11 }
 0x111   : > { %4002 = vmatprep.mubr.f32.mxu0 %v375_v12 }
 0x114   : > { %4003 = vmatmul.mubr.f32.gmra.mrb[8].mxu0 %v376_v13 }
 0x115   : > { %4005 = vmatprep.mubr.f32.mxu0 %v377_v14 }
 0x118   : > { %4006 = vmatmul.mubr.f32.gmra.mrb[10].mxu0 %v378_v15 }
 0x119   : > { %4008 = vmatprep.mubr.f32.mxu0 %v379_v16 }
 0x11c   : > { %4009 = vmatmul.mubr.f32.gmra.mrb[12].mxu0 %v380_v17 }
 0x11d   : > { %4011 = vmatprep.mubr.f32.mxu0 %v381_v18 }
 0x120   : > { %4012 = vmatmul.mubr.f32.gmra.mrb[14].mxu0 %v382_v19 }
 0x1d7   : > { %v3992_v24 = vpop.f32.mrb[0].mxu0 }
 0x1d8   : > { %v460_v25 = vadd.f32 %v3992_v24, %v3451_v23  ;;  %v454_v26 = vpop.f32.mrb[1].mxu0 }
 0x1d9   : > { %v455_v27 = vadd.f32 %v3451_v23, %v454_v26 }
 0x1da   : > { %v534_v30 = vmax.f32 %v460_v25, 0.0 }
 0x1db   : > { %v533_v28 = vmax.f32 %v455_v27, 0.0  ;;  %v3995_v29 = vpop.f32.mrb[2].mxu0 }
 0x1dc   : > { %v470_v31 = vadd.f32 %v3995_v29, %v3451_v23  ;;  %v464_v32 = vpop.f32.mrb[3].mxu0 }
 0x1dd   : > { %v465_v33 = vadd.f32 %v3451_v23, %v464_v32  ;;  %4030 = vmatprep.mubr.msk.f32.mxu1 %vm562_vm0, %v533_v28 }
 0x1de   : > { %4031 = vmatmul.mubr.msk.f32.vlgmr.msra.gmra.mrb[0].mxu1 %vm562_vm0, %v534_v30  ;;  %v536_v36 = vmax.f32 %v470_v31, 0.0 }
 0x1df   : > { %v535_v34 = vmax.f32 %v465_v33, 0.0  ;;  %v3998_v35 = vpop.f32.mrb[4].mxu0 }
 0x1e0   : > { %v480_v37 = vadd.f32 %v3998_v35, %v3451_v23  ;;  %v474_v38 = vpop.f32.mrb[5].mxu0 }
 0x1e1   : > { %v475_v39 = vadd.f32 %v3451_v23, %v474_v38  ;;  %4033 = vmatprep.mubr.msk.f32.mxu1 %vm562_vm0, %v535_v34 }
 0x1e2   : > { %4034 = vmatmul.mubr.msk.f32.gmra.mrb[2].mxu1 %vm562_vm0, %v536_v36  ;;  %v538_v42 = vmax.f32 %v480_v37, 0.0 }
 0x1e3   : > { %v537_v40 = vmax.f32 %v475_v39, 0.0  ;;  %v4001_v41 = vpop.f32.mrb[6].mxu0 }
 0x1e4   : > { %v490_v43 = vadd.f32 %v4001_v41, %v3451_v23  ;;  %v484_v44 = vpop.f32.mrb[7].mxu0 }
 0x1e5   : > { %v485_v45 = vadd.f32 %v3451_v23, %v484_v44  ;;  %4036 = vmatprep.mubr.msk.f32.mxu1 %vm562_vm0, %v537_v40 }
 0x1e6   : > { %4037 = vmatmul.mubr.msk.f32.gmra.mrb[4].mxu1 %vm562_vm0, %v538_v42  ;;  %v540_v48 = vmax.f32 %v490_v43, 0.0 }
 0x1e7   : > { %v539_v46 = vmax.f32 %v485_v45, 0.0  ;;  %v4004_v47 = vpop.f32.mrb[8].mxu0 }
 0x1e8   : > { %v500_v49 = vadd.f32 %v4004_v47, %v3451_v23  ;;  %v494_v50 = vpop.f32.mrb[9].mxu0 }
 0x1e9   : > { %v495_v51 = vadd.f32 %v3451_v23, %v494_v50  ;;  %4039 = vmatprep.mubr.msk.f32.mxu1 %vm562_vm0, %v539_v46 }
 0x1ea   : > { %4040 = vmatmul.mubr.msk.f32.gmra.mrb[6].mxu1 %vm562_vm0, %v540_v48  ;;  %v542_v54 = vmax.f32 %v500_v49, 0.0 }
 0x1eb   : > { %v541_v52 = vmax.f32 %v495_v51, 0.0  ;;  %v4007_v53 = vpop.f32.mrb[10].mxu0 }
 0x1ec   : > { %v510_v55 = vadd.f32 %v4007_v53, %v3451_v23  ;;  %v504_v56 = vpop.f32.mrb[11].mxu0 }
 0x1ed   : > { %v505_v57 = vadd.f32 %v3451_v23, %v504_v56  ;;  %4042 = vmatprep.mubr.msk.f32.mxu1 %vm562_vm0, %v541_v52 }
 0x1ee   : > { %4043 = vmatmul.mubr.msk.f32.gmra.mrb[8].mxu1 %vm562_vm0, %v542_v54  ;;  %v544_v60 = vmax.f32 %v510_v55, 0.0 }
 0x1ef   : > { %v543_v58 = vmax.f32 %v505_v57, 0.0  ;;  %v4010_v59 = vpop.f32.mrb[12].mxu0 }
 0x1f0   : > { %v520_v61 = vadd.f32 %v4010_v59, %v3451_v23  ;;  %v514_v62 = vpop.f32.mrb[13].mxu0 }
 0x1f1   : > { %v515_v63 = vadd.f32 %v3451_v23, %v514_v62  ;;  %4045 = vmatprep.mubr.msk.f32.mxu1 %vm562_vm0, %v543_v58 }
 0x1f2   : > { %4046 = vmatmul.mubr.msk.f32.gmra.mrb[10].mxu1 %vm562_vm0, %v544_v60  ;;  %v546_v2 = vmax.f32 %v520_v61, 0.0 }
 0x1f3   : > { %v545_v0 = vmax.f32 %v515_v63, 0.0  ;;  %v4013_v1 = vpop.f32.mrb[14].mxu0 }
 0x1f4   : > { %v530_v3 = vadd.f32 %v4013_v1, %v3451_v23  ;;  %v524_v4 = vpop.f32.mrb[15].mxu0 }
 0x1f5   : > { %v525_v5 = vadd.f32 %v3451_v23, %v524_v4  ;;  %4048 = vmatprep.mubr.msk.f32.mxu1 %vm562_vm0, %v545_v0 }
 0x1f6   : > { %4049 = vmatmul.mubr.msk.f32.gmra.mrb[12].mxu1 %vm562_vm0, %v546_v2  ;;  %v548_v7 = vmax.f32 %v530_v3, 0.0 }
 0x1f7   : > { %v547_v6 = vmax.f32 %v525_v5, 0.0 }
 0x1f9   : > { %4051 = vmatprep.mubr.msk.f32.mxu1 %vm562_vm0, %v547_v6 }
 0x1fa   : > { %4052 = vmatmul.mubr.msk.f32.gmra.mrb[14].mxu1 %vm562_vm0, %v548_v7 }
 0x2b1   : > { %v4032_v9 = vpop.f32.mrb[0].mxu1 }
 0x2b2   : > { %v5233_v10 = vadd.f32 %v4032_v9, %v5230_v8  ;;  %v677_v11 = vpop.f32.mrb[1].mxu1 }
 0x2b3   : > { %v5236_v12 = vadd.f32 %v5230_v8, %v677_v11 }
 0x2b4   : > { %v759_v13 = vmax.f32 %v5233_v10, 0.0 }
 0x2b5   : > { %v758_v14 = vmax.f32 %v5236_v12, 0.0  ;;  %v4035_v15 = vpop.f32.mrb[2].mxu1 }
 0x2b6   : > { %v775_v16 = vsel %vm562_vm0, %v759_v13, 0.0  ;;  %v5244_v17 = vadd.f32 %v4035_v15, %v5230_v8  ;;  %v687_v18 = vpop.f32.mrb[3].mxu1 }
 0x2b7   : > { %v774_v19 = vsel %vm562_vm0, %v758_v14, 0.0  ;;  %v5250_v20 = vadd.f32 %v5230_v8, %v687_v18 }
 0x2b8   : > { %v776_v21 = vadd.f32 %v775_v16, %v774_v19  ;;  %v761_v22 = vmax.f32 %v5244_v17, 0.0 }
 0x2b9   : > { %v760_v23 = vmax.f32 %v5250_v20, 0.0  ;;  %v4038_v24 = vpop.f32.mrb[4].mxu1 }
 0x2ba   : > { %v5255_v25 = vadd.f32 %v4038_v24, %v5230_v8  ;;  %v697_v26 = vpop.f32.mrb[5].mxu1  ;;  %v779_v30 = vsel %vm562_vm0, %v761_v22, 0.0  ;;  %v3470_v24 = vld [vmem:[%s5171_s6 + $0x80] sm:$0xff] }
 0x2bb   : > { %v777_v27 = vsel %vm562_vm0, %v760_v23, 0.0  ;;  %v5261_v28 = vadd.f32 %v5230_v8, %v697_v26  ;;  %4086 = vmatprep.mubr.f32.mxu1 %v3470_v24 }
 0x2bc   : > { %v778_v29 = vadd.f32 %v777_v27, %v776_v21  ;;  %v763_v31 = vmax.f32 %v5255_v25, 0.0 }
 0x2bd   : > { %v762_v32 = vmax.f32 %v5261_v28, 0.0  ;;  %v4041_v33 = vpop.f32.mrb[6].mxu1 }
 0x2be   : > { %v780_v34 = vadd.f32 %v779_v30, %v778_v29  ;;  %v5269_v35 = vadd.f32 %v4041_v33, %v5230_v8  ;;  %v707_v36 = vpop.f32.mrb[7].mxu1  ;;  %v783_v40 = vsel %vm562_vm0, %v763_v31, 0.0 }
 0x2bf   : > { %v781_v37 = vsel %vm562_vm0, %v762_v32, 0.0  ;;  %v5275_v38 = vadd.f32 %v5230_v8, %v707_v36 }
 0x2c0   : > { %v782_v39 = vadd.f32 %v781_v37, %v780_v34  ;;  %v765_v41 = vmax.f32 %v5269_v35, 0.0 }
 0x2c1   : > { %v764_v42 = vmax.f32 %v5275_v38, 0.0  ;;  %v4044_v43 = vpop.f32.mrb[8].mxu1 }
 0x2c2   : > { %v784_v44 = vadd.f32 %v783_v40, %v782_v39  ;;  %v723_v45 = vadd.f32 %v4044_v43, %v5230_v8  ;;  %v717_v46 = vpop.f32.mrb[9].mxu1  ;;  %v787_v50 = vsel %vm562_vm0, %v765_v41, 0.0 }
 0x2c3   : > { %v785_v47 = vsel %vm562_vm0, %v764_v42, 0.0  ;;  %v718_v48 = vadd.f32 %v5230_v8, %v717_v46 }
 0x2c4   : > { %v786_v49 = vadd.f32 %v785_v47, %v784_v44  ;;  %v767_v51 = vmax.f32 %v723_v45, 0.0 }
 0x2c5   : > { %v766_v52 = vmax.f32 %v718_v48, 0.0  ;;  %v4047_v53 = vpop.f32.mrb[10].mxu1 }
 0x2c6   : > { %v788_v54 = vadd.f32 %v787_v50, %v786_v49  ;;  %v733_v55 = vadd.f32 %v4047_v53, %v5230_v8  ;;  %v727_v56 = vpop.f32.mrb[11].mxu1  ;;  %v791_v60 = vsel %vm562_vm0, %v767_v51, 0.0 }
 0x2c7   : > { %v789_v57 = vsel %vm562_vm0, %v766_v52, 0.0  ;;  %v728_v58 = vadd.f32 %v5230_v8, %v727_v56  ;;  %v1089_v56 = vld [vmem:[#allocation5 + $0x48] sm:$0xff] }
 0x2c8   : > { %v790_v59 = vadd.f32 %v789_v57, %v788_v54  ;;  %v769_v61 = vmax.f32 %v733_v55, 0.0  ;;  %v1088_v54 = vld [vmem:[#allocation5 + $0x40] sm:$0xff]  ;;  %v1090_v57 = vld [vmem:[#allocation5 + $0x50] sm:$0xff] }
 0x2c9   : > { %v768_v62 = vmax.f32 %v728_v58, 0.0  ;;  %v4050_v63 = vpop.f32.mrb[12].mxu1  ;;  %v1091_v58 = vld [vmem:[#allocation5 + $0x58] sm:$0xff] }
 0x2ca   : > { %v792_v0 = vadd.f32 %v791_v60, %v790_v59  ;;  %v743_v1 = vadd.f32 %v4050_v63, %v5230_v8  ;;  %v737_v2 = vpop.f32.mrb[13].mxu1  ;;  %v795_v6 = vsel %vm562_vm0, %v769_v61, 0.0 }
 0x2cb   : > { %v793_v3 = vsel %vm562_vm0, %v768_v62, 0.0  ;;  %v738_v4 = vadd.f32 %v5230_v8, %v737_v2 }
 0x2cc   : > { %v794_v5 = vadd.f32 %v793_v3, %v792_v0  ;;  %v771_v7 = vmax.f32 %v743_v1, 0.0  ;;  %v4577_v0 = vpack.c.bf16 %v1089_v56, %v1088_v54  ;;  %v4581_v1 = vpack.c.bf16 %v1091_v58, %v1090_v57  ;;  %v1092_v3 = vld [vmem:[#allocation5 + $0x60] sm:$0xff] }
 0x2cd   : > { %v770_v9 = vmax.f32 %v738_v4, 0.0  ;;  %v4053_v11 = vpop.f32.mrb[14].mxu1  ;;  %v1093_v4 = vld [vmem:[#allocation5 + $0x68] sm:$0xff] }
 0x2ce   : > { %v796_v15 = vadd.f32 %v795_v6, %v794_v5  ;;  %v753_v16 = vadd.f32 %v4053_v11, %v5230_v8  ;;  %v747_v18 = vpop.f32.mrb[15].mxu1  ;;  %v799_v27 = vsel %vm562_vm0, %v771_v7, 0.0  ;;  %4578 = vmatprep.subr.bf16.mxu0 %v4577_v0 }
 0x2cf   : > { %v797_v19 = vsel %vm562_vm0, %v770_v9, 0.0  ;;  %v748_v21 = vadd.f32 %v5230_v8, %v747_v18  ;;  %4580 = vmatpush3.bf16.msra.mxu0 %v4577_v0  ;;  %v1094_v18 = vld [vmem:[#allocation5 + $0x70] sm:$0xff] }
 0x2d0   : > { %v798_v26 = vadd.f32 %v797_v19, %v796_v15  ;;  %v773_v29 = vmax.f32 %v753_v16, 0.0  ;;  %4582 = vmatprep.subr.bf16.mxu0 %v4581_v1  ;;  %v4585_v15 = vpack.c.bf16 %v1093_v4, %v1092_v3  ;;  %v1095_v19 = vld [vmem:[#allocation5 + $0x78] sm:$0xff]  ;;  %v885_v3 = vlaneseq }
 0x2d1   : > { %v772_v30 = vmax.f32 %v748_v21, 0.0 }
 0x2d2   : > { %v800_v33 = vadd.f32 %v799_v27, %v798_v26  ;;  %v803_v37 = vsel %vm562_vm0, %v773_v29, 0.0  ;;  %v886_v4 = vshrl.u32 %v885_v3, 7  ;;  %v1312_v3 = vld [vmem:[#allocation5 + $0x88] sm:$0xff] }
 0x2d3   : > { %v801_v34 = vsel %vm562_vm0, %v772_v30, 0.0  ;;  %4584 = vmatpush3.bf16.msra.mxu0 %v4581_v1 }
 0x2d4   : > { %v802_v36 = vadd.f32 %v801_v34, %v800_v33  ;;  %4586 = vmatprep.subr.bf16.mxu0 %v4585_v15 }
 0x2d6   : > { %v804_v38 = vadd.f32 %v803_v37, %v802_v36 }
 0x2d7   : > { %4588 = vmatpush3.bf16.msra.mxu0 %v4585_v15  ;;  %v3469_v15 = vld [vmem:[%s6239_s3 + $0x4] ss:$0 sm:$0xff] }
 0x2d8   : > { %v805_v39 = vrot.slane %v804_v38, 4 }
 0x2da   : > { %v806_v40 = vadd.f32 %v805_v39, %v804_v38 }
 0x2dc   : > { %v807_v43 = vrot.slane %v806_v40, 2 }
 0x2de   : > { %v808_v44 = vadd.f32 %v807_v43, %v806_v40 }
 0x2e0   : > { %v809_v45 = vrot.slane %v808_v44, 1 }
 0x2e2   : > { %v810_v8 = vadd.f32 %v809_v45, %v808_v44 }
 0x2e4   : > { %v811_v46 = vmul.f32 0.0078125, %v810_v8 }
 0x2e6   : > { %v5305_v47 = vsub.f32 %v758_v14, %v811_v46  ;;  %v5309_v48 = vsub.f32 %v759_v13, %v811_v46  ;;  %v5313_v49 = vsub.f32 %v760_v23, %v811_v46  ;;  %v5317_v50 = vsub.f32 %v761_v22, %v811_v46 }
 0x2e7   : > { %v5321_v53 = vsub.f32 %v762_v32, %v811_v46  ;;  %v5325_v12 = vsub.f32 %v763_v31, %v811_v46  ;;  %v5327_v14 = vsub.f32 %v764_v42, %v811_v46  ;;  %v5331_v10 = vsub.f32 %v765_v41, %v811_v46 }
 0x2e8   : > { %v5333_v13 = vsub.f32 %v766_v52, %v811_v46  ;;  %v5335_v20 = vsub.f32 %v767_v51, %v811_v46  ;;  %v5337_v17 = vsub.f32 %v768_v62, %v811_v46  ;;  %v5339_v22 = vsub.f32 %v769_v61, %v811_v46 }
 0x2e9   : > { %v5341_v23 = vsub.f32 %v770_v9, %v811_v46  ;;  %v5343_v28 = vsub.f32 %v771_v7, %v811_v46  ;;  %v5345_v25 = vsub.f32 %v772_v30, %v811_v46  ;;  %v5347_v31 = vsub.f32 %v773_v29, %v811_v46 }
 0x2ea   : > { %v828_v32 = vmul.f32 %v5305_v47, %v5305_v47  ;;  %v829_v35 = vmul.f32 %v5309_v48, %v5309_v48  ;;  %v830_v41 = vmul.f32 %v5313_v49, %v5313_v49  ;;  %v831_v42 = vmul.f32 %v5317_v50, %v5317_v50 }
 0x2eb   : > { %v832_v59 = vmul.f32 %v5321_v53, %v5321_v53  ;;  %v833_v62 = vmul.f32 %v5325_v12, %v5325_v12  ;;  %v834_v5 = vmul.f32 %v5327_v14, %v5327_v14  ;;  %v835_v9 = vmul.f32 %v5331_v10, %v5331_v10 }
 0x2ec   : > { %v844_v51 = vsel %vm562_vm0, %v828_v32, 0.0  ;;  %v845_v52 = vsel %vm562_vm0, %v829_v35, 0.0  ;;  %v847_v60 = vsel %vm562_vm0, %v830_v41, 0.0  ;;  %v849_v63 = vsel %vm562_vm0, %v831_v42, 0.0 }
 0x2ed   : > { %v846_v55 = vadd.f32 %v845_v52, %v844_v51  ;;  %v851_v6 = vsel %vm562_vm0, %v832_v59, 0.0  ;;  %v853_v11 = vsel %vm562_vm0, %v833_v62, 0.0  ;;  %v836_v21 = vmul.f32 %v5333_v13, %v5333_v13 }
 0x2ee   : > { %v855_v24 = vsel %vm562_vm0, %v834_v5, 0.0  ;;  %v837_v27 = vmul.f32 %v5335_v20, %v5335_v20  ;;  %v857_v29 = vsel %vm562_vm0, %v835_v9, 0.0  ;;  %v4589_v30 = vpack.c.bf16 %v1095_v19, %v1094_v18  ;;  %v756_v5 = vld [vmem:[%s6239_s3 + $0x3] sm:$0x1] }
 0x2ef   : > { %v848_v61 = vadd.f32 %v847_v60, %v846_v55  ;;  %v838_v34 = vmul.f32 %v5337_v17, %v5337_v17  ;;  %v859_v36 = vsel %vm562_vm0, %v836_v21, 0.0  ;;  %v839_v38 = vmul.f32 %v5339_v22, %v5339_v22 }
 0x2f0   : > { %v861_v39 = vsel %vm562_vm0, %v837_v27, 0.0  ;;  %4590 = vmatprep.subr.bf16.mxu0 %v4589_v30  ;;  %v840_v43 = vmul.f32 %v5341_v23, %v5341_v23  ;;  %v841_v8 = vmul.f32 %v5343_v28, %v5343_v28  ;;  %v842_v35 = vmul.f32 %v5345_v25, %v5345_v25 }
 0x2f1   : > { %v850_v2 = vadd.f32 %v849_v63, %v848_v61  ;;  %v863_v44 = vsel %vm562_vm0, %v838_v34, 0.0  ;;  %4592 = vmatpush3.bf16.msra.mxu0 %v4589_v30  ;;  %v865_v46 = vsel %vm562_vm0, %v839_v38, 0.0  ;;  %v843_v51 = vmul.f32 %v5347_v31, %v5347_v31 }
 0x2f2   : > { %v867_v41 = vsel %vm562_vm0, %v840_v43, 0.0  ;;  %v869_v52 = vsel %vm562_vm0, %v841_v8, 0.0  ;;  %v871_v55 = vsel %vm562_vm0, %v842_v35, 0.0 }
 0x2f3   : > { %v852_v7 = vadd.f32 %v851_v6, %v850_v2  ;;  %v873_v57 = vsel %vm562_vm0, %v843_v51, 0.0  ;;  %v5400_v6 = vsub.s32 0, %v886_v4  ;;  %v1313_v4 = vld [vmem:[#allocation5 + $0x90] sm:$0xff] }
 0x2f5   : > { %v854_v16 = vadd.f32 %v853_v11, %v852_v7 }
 0x2f7   : > { %v856_v26 = vadd.f32 %v855_v24, %v854_v16 }
 0x2f9   : > { %v858_v33 = vadd.f32 %v857_v29, %v856_v26 }
 0x2fb   : > { %v860_v37 = vadd.f32 %v859_v36, %v858_v33 }
 0x2fd   : > { %v862_v40 = vadd.f32 %v861_v39, %v860_v37 }
 0x2ff   : > { %v864_v45 = vadd.f32 %v863_v44, %v862_v40 }
 0x301   : > { %v866_v32 = vadd.f32 %v865_v46, %v864_v45 }
 0x303   : > { %v868_v42 = vadd.f32 %v867_v41, %v866_v32 }
 0x305   : > { %v870_v54 = vadd.f32 %v869_v52, %v868_v42 }
 0x307   : > { %v872_v56 = vadd.f32 %v871_v55, %v870_v54  ;;  %v3474_v54 = vld [vmem:[%s5171_s6 + $0xa0] sm:$0xff]  ;;  %v3475_v55 = vld [vmem:[%s5171_s6 + $0xa8] sm:$0xff] }
 0x309   : > { %v874_v58 = vadd.f32 %v873_v57, %v872_v56  ;;  %v3476_v56 = vld [vmem:[%s5171_s6 + $0xb0] sm:$0xff]  ;;  %v3477_v57 = vld [vmem:[%s5171_s6 + $0xb8] sm:$0xff] }
 0x30b   : > { %v875_v59 = vrot.slane %v874_v58, 4 }
 0x30d   : > { %v876_v60 = vadd.f32 %v875_v59, %v874_v58  ;;  %v3478_v58 = vld [vmem:[%s5171_s6 + $0xc0] sm:$0xff]  ;;  %v3479_v59 = vld [vmem:[%s5171_s6 + $0xc8] sm:$0xff] }
 0x30f   : > { %v877_v61 = vrot.slane %v876_v60, 2 }
 0x311   : > { %v878_v62 = vadd.f32 %v877_v61, %v876_v60  ;;  %v3480_v60 = vld [vmem:[%s5171_s6 + $0xd0] sm:$0xff]  ;;  %v3481_v61 = vld [vmem:[%s5171_s6 + $0xd8] sm:$0xff] }
 0x313   : > { %v879_v63 = vrot.slane %v878_v62, 1 }
 0x315   : > { %v880_v0 = vadd.f32 %v879_v63, %v878_v62  ;;  %v3482_v62 = vld [vmem:[%s5171_s6 + $0xe0] sm:$0xff]  ;;  %v3483_v63 = vld [vmem:[%s5171_s6 + $0xe8] sm:$0xff] }
 0x317   : > { %v881_v1 = vmul.f32 0.0078125, %v880_v0  ;;  %v3484_v0 = vld [vmem:[%s5171_s6 + $0xf0] sm:$0xff] }
 0x319   : > { %v882_v2 = vadd.f32 1e-05, %v881_v1  ;;  %v3485_v1 = vld [vmem:[%s5171_s6 + $0xf8] sm:$0xff] }
 0x31b   : > { %4850 = vrsqrt.f32 %v882_v2  ;;  %v1311_v2 = vld [vmem:[#allocation5 + $0x80] sm:$0xff] }
 0x325   : > { %v4851_v7 = vpop.eup %4850 }
 0x326   : > { %v884_v9 = vmul.f32 %v4851_v7, %v756_v5  ;;  %v4593_v5 = vpack.c.bf16 %v1312_v3, %v1311_v2  ;;  %v1314_v7 = vld [vmem:[#allocation5 + $0x98] sm:$0xff] }
 0x328   : > { %v888_v11 = vrot.slane %v884_v9, %v5400_v6  ;;  %v4597_v9 = vpack.c.bf16 %v1314_v7, %v1313_v4 }
 0x32a   : > { %v903_v16 = vmul.f32 %v888_v11, %v5345_v25  ;;  %v889_v18 = vmul.f32 %v888_v11, %v5305_v47  ;;  %v890_v19 = vmul.f32 %v888_v11, %v5309_v48  ;;  %v891_v21 = vmul.f32 %v888_v11, %v5313_v49 }
 0x32b   : > { %v892_v24 = vmul.f32 %v888_v11, %v5317_v50  ;;  %v893_v26 = vmul.f32 %v888_v11, %v5321_v53  ;;  %v894_v27 = vmul.f32 %v888_v11, %v5325_v12  ;;  %v895_v29 = vmul.f32 %v888_v11, %v5327_v14 }
 0x32c   : > { %v909_v30 = vadd.f32 %v3469_v15, %v889_v18  ;;  %v910_v33 = vadd.f32 %v3469_v15, %v890_v19  ;;  %v911_v34 = vadd.f32 %v3469_v15, %v891_v21  ;;  %v896_v36 = vmul.f32 %v888_v11, %v5331_v10  ;;  %v1317_v18 = vld [vmem:[#allocation5 + $0xb0] sm:$0xff]  ;;  %v1318_v19 = vld [vmem:[#allocation5 + $0xb8] sm:$0xff] }
 0x32d   : > { %v912_v25 = vadd.f32 %v3469_v15, %v892_v24  ;;  %v913_v37 = vadd.f32 %v3469_v15, %v893_v26  ;;  %v914_v47 = vadd.f32 %v3469_v15, %v894_v27  ;;  %v915_v38 = vadd.f32 %v3469_v15, %v895_v29 }
 0x32e   : > { %v4545_v48 = vpack.c.bf16 %v910_v33, %v909_v30  ;;  %v916_v39 = vadd.f32 %v3469_v15, %v896_v36  ;;  %v897_v49 = vmul.f32 %v888_v11, %v5333_v13  ;;  %v898_v50 = vmul.f32 %v888_v11, %v5335_v20 }
 0x32f   : > { %v4549_v53 = vpack.c.bf16 %v912_v25, %v911_v34  ;;  %v4553_v40 = vpack.c.bf16 %v914_v47, %v913_v37  ;;  %v899_v12 = vmul.f32 %v888_v11, %v5337_v17  ;;  %v900_v14 = vmul.f32 %v888_v11, %v5339_v22 }
 0x330   : > { %4546 = vmatprep.subr.bf16.mxu1 %v4545_v48  ;;  %v4557_v43 = vpack.c.bf16 %v916_v39, %v915_v38  ;;  %v917_v44 = vadd.f32 %v3469_v15, %v897_v49  ;;  %v918_v10 = vadd.f32 %v3469_v15, %v898_v50  ;;  %v901_v45 = vmul.f32 %v888_v11, %v5341_v23  ;;  %v3471_v23 = vld [vmem:[%s5171_s6 + $0x88] sm:$0xff] }
 0x331   : > { %4548 = vmatpush3.bf16.msra.mxu1 %v4545_v48  ;;  %v919_v8 = vadd.f32 %v3469_v15, %v899_v12  ;;  %v920_v46 = vadd.f32 %v3469_v15, %v900_v14  ;;  %v902_v32 = vmul.f32 %v888_v11, %v5343_v28  ;;  %v904_v13 = vmul.f32 %v888_v11, %v5347_v31  ;;  %v3472_v28 = vld [vmem:[%s5171_s6 + $0x90] sm:$0xff]  ;;  %v3473_v31 = vld [vmem:[%s5171_s6 + $0x98] sm:$0xff]  ;;  %v1315_v11 = vld [vmem:[#allocation5 + $0xa0] sm:$0xff] }
 0x332   : > { %4550 = vmatprep.subr.bf16.mxu1 %v4549_v53  ;;  %v4561_v20 = vpack.c.bf16 %v918_v10, %v917_v44  ;;  %v921_v35 = vadd.f32 %v3469_v15, %v901_v45  ;;  %v923_v41 = vadd.f32 %v3469_v15, %v903_v16  ;;  %v4605_v21 = vpack.c.bf16 %v1318_v19, %v1317_v18 }
 0x333   : > { %v4565_v17 = vpack.c.bf16 %v920_v46, %v919_v8  ;;  %v922_v42 = vadd.f32 %v3469_v15, %v902_v32  ;;  %v924_v22 = vadd.f32 %v3469_v15, %v904_v13  ;;  %v1316_v15 = vld [vmem:[#allocation5 + $0xa8] sm:$0xff] }
 0x334   : > { %v4601_v16 = vpack.c.bf16 %v1316_v15, %v1315_v11 }
 0x335   : > { %4552 = vmatpush3.bf16.msra.mxu1 %v4549_v53  ;;  %v4569_v51 = vpack.c.bf16 %v922_v42, %v921_v35  ;;  %v4573_v52 = vpack.c.bf16 %v924_v22, %v923_v41  ;;  %v3486_v53 = vld [vmem:[%s6239_s3 + $0x5] ss:$0 sm:$0xff] }
 0x336   : > { %4554 = vmatprep.subr.bf16.mxu1 %v4553_v40 }
 0x339   : > { %4556 = vmatpush3.bf16.msra.mxu1 %v4553_v40 }
 0x33a   : > { %4558 = vmatprep.subr.bf16.mxu1 %v4557_v43 }
 0x33d   : > { %4560 = vmatpush3.bf16.msra.mxu1 %v4557_v43 }
 0x33e   : > { %4562 = vmatprep.subr.bf16.mxu1 %v4561_v20 }
 0x341   : > { %4564 = vmatpush3.bf16.msra.mxu1 %v4561_v20 }
 0x342   : > { %4566 = vmatprep.subr.bf16.mxu1 %v4565_v17 }
 0x345   : > { %4568 = vmatpush3.bf16.msra.mxu1 %v4565_v17 }
 0x346   : > { %4570 = vmatprep.subr.bf16.mxu1 %v4569_v51 }
 0x349   : > { %4572 = vmatpush3.bf16.msra.mxu1 %v4569_v51 }
 0x34a   : > { %4574 = vmatprep.subr.bf16.mxu1 %v4573_v52 }
 0x34d   : > { %4576 = vmatpush3.bf16.msra.mxu1 %v4573_v52 }
 0x34e   : > { %4594 = vmatprep.subr.bf16.mxu1 %v4593_v5 }
 0x350   : > { %4087 = vmatmul.mubr.f32.vlgmr.msra.gmra.mrb[16].mxu1 %v3471_v23 }
 0x351   : > { %4089 = vmatprep.mubr.f32.mxu1 %v3472_v28  ;;  %4596 = vmatpush3.bf16.msra.mxu1 %v4593_v5 }
 0x352   : > { %4598 = vmatprep.subr.bf16.mxu1 %v4597_v9 }
 0x354   : > { %4090 = vmatmul.mubr.f32.gmra.mrb[18].mxu1 %v3473_v31 }
 0x355   : > { %4092 = vmatprep.mubr.f32.mxu1 %v3474_v54  ;;  %4600 = vmatpush3.bf16.msra.mxu1 %v4597_v9 }
 0x356   : > { %4602 = vmatprep.subr.bf16.mxu1 %v4601_v16 }
 0x358   : > { %4093 = vmatmul.mubr.f32.gmra.mrb[20].mxu1 %v3475_v55 }
 0x359   : > { %4095 = vmatprep.mubr.f32.mxu1 %v3476_v56  ;;  %4604 = vmatpush3.bf16.msra.mxu1 %v4601_v16 }
 0x35a   : > { %4606 = vmatprep.subr.bf16.mxu1 %v4605_v21 }
 0x35c   : > { %4096 = vmatmul.mubr.f32.gmra.mrb[22].mxu1 %v3477_v57 }
 0x35d   : > { %4098 = vmatprep.mubr.f32.mxu1 %v3478_v58  ;;  %4608 = vmatpush3.bf16.msra.mxu1 %v4605_v21 }
 0x360   : > { %4099 = vmatmul.mubr.f32.gmra.mrb[24].mxu1 %v3479_v59 }
 0x361   : > { %4101 = vmatprep.mubr.f32.mxu1 %v3480_v60 }
 0x364   : > { %4102 = vmatmul.mubr.f32.gmra.mrb[26].mxu1 %v3481_v61 }
 0x365   : > { %4104 = vmatprep.mubr.f32.mxu1 %v3482_v62 }
 0x368   : > { %4105 = vmatmul.mubr.f32.gmra.mrb[28].mxu1 %v3483_v63 }
 0x369   : > { %4107 = vmatprep.mubr.f32.mxu1 %v3484_v0 }
 0x36c   : > { %4108 = vmatmul.mubr.f32.gmra.mrb[30].mxu1 %v3485_v1 }
 0x423   : > { %v4088_v24 = vpop.f32.mrb[16].mxu1 }
 0x424   : > { %v1008_v26 = vpop.f32.mrb[17].mxu1 }
 0x425   : > { %4126 = vmatprep.mubr.msk.f32.mxu0 %vm562_vm0, %v1008_v26 }
 0x426   : > { %4127 = vmatmul.mubr.msk.f32.vlgmr.msra.gmra.mrb[16].mxu0 %vm562_vm0, %v4088_v24 }
 0x427   : > { %v4091_v27 = vpop.f32.mrb[18].mxu1 }
 0x428   : > { %v1018_v29 = vpop.f32.mrb[19].mxu1 }
 0x429   : > { %4129 = vmatprep.mubr.msk.f32.mxu0 %vm562_vm0, %v1018_v29 }
 0x42a   : > { %4130 = vmatmul.mubr.msk.f32.gmra.mrb[18].mxu0 %vm562_vm0, %v4091_v27  ;;  %v5475_v27 = vld [vmem:[%s6239_s3 + $0x6] ss:$0 sm:$0xff] }
 0x42b   : > { %v4094_v30 = vpop.f32.mrb[20].mxu1 }
 0x42c   : > { %v1028_v33 = vpop.f32.mrb[21].mxu1 }
 0x42d   : > { %4132 = vmatprep.mubr.msk.f32.mxu0 %vm562_vm0, %v1028_v33 }
 0x42e   : > { %4133 = vmatmul.mubr.msk.f32.gmra.mrb[20].mxu0 %vm562_vm0, %v4094_v30 }
 0x42f   : > { %v4097_v34 = vpop.f32.mrb[22].mxu1 }
 0x430   : > { %v1038_v36 = vpop.f32.mrb[23].mxu1 }
 0x431   : > { %4135 = vmatprep.mubr.msk.f32.mxu0 %vm562_vm0, %v1038_v36 }
 0x432   : > { %4136 = vmatmul.mubr.msk.f32.gmra.mrb[22].mxu0 %vm562_vm0, %v4097_v34 }
 0x433   : > { %v4100_v25 = vpop.f32.mrb[24].mxu1 }
 0x434   : > { %v1048_v37 = vpop.f32.mrb[25].mxu1 }
 0x435   : > { %4138 = vmatprep.mubr.msk.f32.mxu0 %vm562_vm0, %v1048_v37 }
 0x436   : > { %4139 = vmatmul.mubr.msk.f32.gmra.mrb[24].mxu0 %vm562_vm0, %v4100_v25 }
 0x437   : > { %v4103_v47 = vpop.f32.mrb[26].mxu1 }
 0x438   : > { %v1058_v38 = vpop.f32.mrb[27].mxu1 }
 0x439   : > { %4141 = vmatprep.mubr.msk.f32.mxu0 %vm562_vm0, %v1058_v38 }
 0x43a   : > { %4142 = vmatmul.mubr.msk.f32.gmra.mrb[26].mxu0 %vm562_vm0, %v4103_v47 }
 0x43b   : > { %v4106_v48 = vpop.f32.mrb[28].mxu1 }
 0x43c   : > { %v1068_v39 = vpop.f32.mrb[29].mxu1 }
 0x43d   : > { %4144 = vmatprep.mubr.msk.f32.mxu0 %vm562_vm0, %v1068_v39 }
 0x43e   : > { %4145 = vmatmul.mubr.msk.f32.gmra.mrb[28].mxu0 %vm562_vm0, %v4106_v48 }
 0x43f   : > { %v4109_v49 = vpop.f32.mrb[30].mxu1 }
 0x440   : > { %v1078_v50 = vpop.f32.mrb[31].mxu1 }
 0x441   : > { %4147 = vmatprep.mubr.msk.f32.mxu0 %vm562_vm0, %v1078_v50 }
 0x442   : > { %4148 = vmatmul.mubr.msk.f32.gmra.mrb[30].mxu0 %vm562_vm0, %v4109_v49 }
 0x4f9   : > { %v4128_v40 = vpop.f32.mrb[16].mxu0 }
 0x4fa   : > { %v1221_v12 = vadd.f32 %v4128_v40, %v3486_v53  ;;  %v1215_v14 = vpop.f32.mrb[17].mxu0 }
 0x4fb   : > { %v1216_v43 = vadd.f32 %v3486_v53, %v1215_v14 }
 0x4fc   : > { %v1295_v45 = vmax.f32 %v1221_v12, 0.0 }
 0x4fd   : > { %v1294_v44 = vmax.f32 %v1216_v43, 0.0  ;;  %v4131_v10 = vpop.f32.mrb[18].mxu0 }
 0x4fe   : > { %v1231_v8 = vadd.f32 %v4131_v10, %v3486_v53  ;;  %v1225_v46 = vpop.f32.mrb[19].mxu0 }
 0x4ff   : > { %v1226_v32 = vadd.f32 %v3486_v53, %v1225_v46  ;;  %4166 = vmatprep.mubr.msk.f32.mxu1 %vm562_vm0, %v1294_v44 }
 0x500   : > { %4167 = vmatmul.mubr.msk.f32.vlgmr.msra.gmra.mrb[32].mxu1 %vm562_vm0, %v1295_v45  ;;  %v1297_v35 = vmax.f32 %v1231_v8, 0.0 }
 0x501   : > { %v1296_v13 = vmax.f32 %v1226_v32, 0.0  ;;  %v4134_v20 = vpop.f32.mrb[20].mxu0 }
 0x502   : > { %v1241_v41 = vadd.f32 %v4134_v20, %v3486_v53  ;;  %v1235_v17 = vpop.f32.mrb[21].mxu0 }
 0x503   : > { %v1236_v42 = vadd.f32 %v3486_v53, %v1235_v17  ;;  %4169 = vmatprep.mubr.msk.f32.mxu1 %vm562_vm0, %v1296_v13 }
 0x504   : > { %4170 = vmatmul.mubr.msk.f32.gmra.mrb[34].mxu1 %vm562_vm0, %v1297_v35  ;;  %v1299_v52 = vmax.f32 %v1241_v41, 0.0 }
 0x505   : > { %v1298_v22 = vmax.f32 %v1236_v42, 0.0  ;;  %v4137_v51 = vpop.f32.mrb[22].mxu0 }
 0x506   : > { %v1251_v23 = vadd.f32 %v4137_v51, %v3486_v53  ;;  %v1245_v28 = vpop.f32.mrb[23].mxu0 }
 0x507   : > { %v1246_v31 = vadd.f32 %v3486_v53, %v1245_v28  ;;  %4172 = vmatprep.mubr.msk.f32.mxu1 %vm562_vm0, %v1298_v22 }
 0x508   : > { %4173 = vmatmul.mubr.msk.f32.gmra.mrb[36].mxu1 %vm562_vm0, %v1299_v52  ;;  %v1301_v56 = vmax.f32 %v1251_v23, 0.0 }
 0x509   : > { %v1300_v54 = vmax.f32 %v1246_v31, 0.0  ;;  %v4140_v55 = vpop.f32.mrb[24].mxu0 }
 0x50a   : > { %v1261_v57 = vadd.f32 %v4140_v55, %v3486_v53  ;;  %v1255_v58 = vpop.f32.mrb[25].mxu0 }
 0x50b   : > { %v1256_v59 = vadd.f32 %v3486_v53, %v1255_v58  ;;  %4175 = vmatprep.mubr.msk.f32.mxu1 %vm562_vm0, %v1300_v54 }
 0x50c   : > { %4176 = vmatmul.mubr.msk.f32.gmra.mrb[38].mxu1 %vm562_vm0, %v1301_v56  ;;  %v1303_v62 = vmax.f32 %v1261_v57, 0.0 }
 0x50d   : > { %v1302_v60 = vmax.f32 %v1256_v59, 0.0  ;;  %v4143_v61 = vpop.f32.mrb[26].mxu0 }
 0x50e   : > { %v1271_v63 = vadd.f32 %v4143_v61, %v3486_v53  ;;  %v1265_v0 = vpop.f32.mrb[27].mxu0 }
 0x50f   : > { %v1266_v1 = vadd.f32 %v3486_v53, %v1265_v0  ;;  %4178 = vmatprep.mubr.msk.f32.mxu1 %vm562_vm0, %v1302_v60 }
 0x510   : > { %4179 = vmatmul.mubr.msk.f32.gmra.mrb[40].mxu1 %vm562_vm0, %v1303_v62  ;;  %v1305_v4 = vmax.f32 %v1271_v63, 0.0 }
 0x511   : > { %v1304_v2 = vmax.f32 %v1266_v1, 0.0  ;;  %v4146_v3 = vpop.f32.mrb[28].mxu0 }
 0x512   : > { %v1281_v5 = vadd.f32 %v4146_v3, %v3486_v53  ;;  %v1275_v7 = vpop.f32.mrb[29].mxu0 }
 0x513   : > { %v1276_v9 = vadd.f32 %v3486_v53, %v1275_v7  ;;  %4181 = vmatprep.mubr.msk.f32.mxu1 %vm562_vm0, %v1304_v2 }
 0x514   : > { %4182 = vmatmul.mubr.msk.f32.gmra.mrb[42].mxu1 %vm562_vm0, %v1305_v4  ;;  %v1307_v16 = vmax.f32 %v1281_v5, 0.0 }
 0x515   : > { %v1306_v11 = vmax.f32 %v1276_v9, 0.0  ;;  %v4149_v15 = vpop.f32.mrb[30].mxu0 }
 0x516   : > { %v1291_v18 = vadd.f32 %v4149_v15, %v3486_v53  ;;  %v1285_v19 = vpop.f32.mrb[31].mxu0 }
 0x517   : > { %v1286_v21 = vadd.f32 %v3486_v53, %v1285_v19  ;;  %4184 = vmatprep.mubr.msk.f32.mxu1 %vm562_vm0, %v1306_v11 }
 0x518   : > { %4185 = vmatmul.mubr.msk.f32.gmra.mrb[44].mxu1 %vm562_vm0, %v1307_v16  ;;  %v1309_v26 = vmax.f32 %v1291_v18, 0.0 }
 0x519   : > { %v1308_v24 = vmax.f32 %v1286_v21, 0.0 }
 0x51b   : > { %4187 = vmatprep.mubr.msk.f32.mxu1 %vm562_vm0, %v1308_v24 }
 0x51c   : > { %4188 = vmatmul.mubr.msk.f32.gmra.mrb[46].mxu1 %vm562_vm0, %v1309_v26 }
 0x5d3   : > { %v4168_v29 = vpop.f32.mrb[32].mxu1 }
 0x5d4   : > { %v5478_v30 = vadd.f32 %v4168_v29, %v5475_v27  ;;  %v1438_v33 = vpop.f32.mrb[33].mxu1 }
 0x5d5   : > { %v5481_v34 = vadd.f32 %v5475_v27, %v1438_v33 }
 0x5d6   : > { %v1520_v36 = vmax.f32 %v5478_v30, 0.0 }
 0x5d7   : > { %v1519_v25 = vmax.f32 %v5481_v34, 0.0  ;;  %v4171_v37 = vpop.f32.mrb[34].mxu1 }
 0x5d8   : > { %v1536_v47 = vsel %vm562_vm0, %v1520_v36, 0.0  ;;  %v5489_v38 = vadd.f32 %v4171_v37, %v5475_v27  ;;  %v1448_v48 = vpop.f32.mrb[35].mxu1 }
 0x5d9   : > { %v1535_v39 = vsel %vm562_vm0, %v1519_v25, 0.0  ;;  %v5495_v49 = vadd.f32 %v5475_v27, %v1448_v48 }
 0x5da   : > { %v1537_v50 = vadd.f32 %v1536_v47, %v1535_v39  ;;  %v1522_v53 = vmax.f32 %v5489_v38, 0.0 }
 0x5db   : > { %v1521_v40 = vmax.f32 %v5495_v49, 0.0  ;;  %v4174_v12 = vpop.f32.mrb[36].mxu1 }
 0x5dc   : > { %v5500_v14 = vadd.f32 %v4174_v12, %v5475_v27  ;;  %v1458_v43 = vpop.f32.mrb[37].mxu1  ;;  %v1540_v8 = vsel %vm562_vm0, %v1522_v53, 0.0 }
 0x5dd   : > { %v1538_v44 = vsel %vm562_vm0, %v1521_v40, 0.0  ;;  %v5506_v10 = vadd.f32 %v5475_v27, %v1458_v43  ;;  %v3521_v43 = vld [vmem:[%s5171_s6 + $0x100] sm:$0xff] }
 0x5de   : > { %v1539_v45 = vadd.f32 %v1538_v44, %v1537_v50  ;;  %v1524_v46 = vmax.f32 %v5500_v14, 0.0  ;;  %4222 = vmatprep.mubr.f32.mxu0 %v3521_v43 }
 0x5df   : > { %v1523_v32 = vmax.f32 %v5506_v10, 0.0  ;;  %v4177_v13 = vpop.f32.mrb[38].mxu1 }
 0x5e0   : > { %v1541_v20 = vadd.f32 %v1540_v8, %v1539_v45  ;;  %v5514_v35 = vadd.f32 %v4177_v13, %v5475_v27  ;;  %v1468_v41 = vpop.f32.mrb[39].mxu1  ;;  %v1544_v51 = vsel %vm562_vm0, %v1524_v46, 0.0 }
 0x5e1   : > { %v1542_v17 = vsel %vm562_vm0, %v1523_v32, 0.0  ;;  %v5520_v42 = vadd.f32 %v5475_v27, %v1468_v41 }
 0x5e2   : > { %v1543_v22 = vadd.f32 %v1542_v17, %v1541_v20  ;;  %v1526_v52 = vmax.f32 %v5514_v35, 0.0 }
 0x5e3   : > { %v1525_v23 = vmax.f32 %v5520_v42, 0.0  ;;  %v4180_v28 = vpop.f32.mrb[40].mxu1 }
 0x5e4   : > { %v1545_v31 = vadd.f32 %v1544_v51, %v1543_v22  ;;  %v5528_v54 = vadd.f32 %v4180_v28, %v5475_v27  ;;  %v1478_v55 = vpop.f32.mrb[41].mxu1  ;;  %v1548_v59 = vsel %vm562_vm0, %v1526_v52, 0.0 }
 0x5e5   : > { %v1546_v56 = vsel %vm562_vm0, %v1525_v23, 0.0  ;;  %v1479_v57 = vadd.f32 %v5475_v27, %v1478_v55 }
 0x5e6   : > { %v1547_v58 = vadd.f32 %v1546_v56, %v1545_v31  ;;  %v1528_v60 = vmax.f32 %v5528_v54, 0.0 }
 0x5e7   : > { %v1527_v61 = vmax.f32 %v1479_v57, 0.0  ;;  %v4183_v62 = vpop.f32.mrb[42].mxu1 }
 0x5e8   : > { %v1549_v63 = vadd.f32 %v1548_v59, %v1547_v58  ;;  %v1494_v0 = vadd.f32 %v4183_v62, %v5475_v27  ;;  %v1488_v1 = vpop.f32.mrb[43].mxu1  ;;  %v1552_v5 = vsel %vm562_vm0, %v1528_v60, 0.0 }
 0x5e9   : > { %v1550_v2 = vsel %vm562_vm0, %v1527_v61, 0.0  ;;  %v1489_v3 = vadd.f32 %v5475_v27, %v1488_v1 }
 0x5ea   : > { %v1551_v4 = vadd.f32 %v1550_v2, %v1549_v63  ;;  %v1530_v7 = vmax.f32 %v1494_v0, 0.0 }
 0x5eb   : > { %v1529_v9 = vmax.f32 %v1489_v3, 0.0  ;;  %v4186_v11 = vpop.f32.mrb[44].mxu1 }
 0x5ec   : > { %v1553_v15 = vadd.f32 %v1552_v5, %v1551_v4  ;;  %v1504_v16 = vadd.f32 %v4186_v11, %v5475_v27  ;;  %v1498_v18 = vpop.f32.mrb[45].mxu1  ;;  %v1556_v26 = vsel %vm562_vm0, %v1530_v7, 0.0 }
 0x5ed   : > { %v1554_v19 = vsel %vm562_vm0, %v1529_v9, 0.0  ;;  %v1499_v21 = vadd.f32 %v5475_v27, %v1498_v18 }
 0x5ee   : > { %v1555_v24 = vadd.f32 %v1554_v19, %v1553_v15  ;;  %v1532_v29 = vmax.f32 %v1504_v16, 0.0 }
 0x5ef   : > { %v1531_v33 = vmax.f32 %v1499_v21, 0.0  ;;  %v4189_v37 = vpop.f32.mrb[46].mxu1 }
 0x5f0   : > { %v1557_v47 = vadd.f32 %v1556_v26, %v1555_v24  ;;  %v1514_v48 = vadd.f32 %v4189_v37, %v5475_v27  ;;  %v1508_v39 = vpop.f32.mrb[47].mxu1  ;;  %v1560_v45 = vsel %vm562_vm0, %v1532_v29, 0.0 }
 0x5f1   : > { %v1558_v50 = vsel %vm562_vm0, %v1531_v33, 0.0  ;;  %v1509_v12 = vadd.f32 %v5475_v27, %v1508_v39  ;;  %v3529_v27 = vld [vmem:[%s5171_s6 + $0x140] sm:$0xff] }
 0x5f2   : > { %v1559_v44 = vadd.f32 %v1558_v50, %v1557_v47  ;;  %v1534_v8 = vmax.f32 %v1514_v48, 0.0  ;;  %4234 = vmatprep.mubr.f32.mxu1 %v3529_v27 }
 0x5f3   : > { %v1533_v13 = vmax.f32 %v1509_v12, 0.0 }
 0x5f4   : > { %v1561_v20 = vadd.f32 %v1560_v45, %v1559_v44  ;;  %v1564_v22 = vsel %vm562_vm0, %v1534_v8, 0.0 }
 0x5f5   : > { %v1562_v41 = vsel %vm562_vm0, %v1533_v13, 0.0 }
 0x5f6   : > { %v1563_v17 = vadd.f32 %v1562_v41, %v1561_v20 }
 0x5f8   : > { %v1565_v51 = vadd.f32 %v1564_v22, %v1563_v17 }
 0x5fa   : > { %v1566_v28 = vrot.slane %v1565_v51, 4 }
 0x5fc   : > { %v1567_v31 = vadd.f32 %v1566_v28, %v1565_v51 }
 0x5fe   : > { %v1568_v54 = vrot.slane %v1567_v31, 2 }
 0x600   : > { %v1569_v55 = vadd.f32 %v1568_v54, %v1567_v31 }
 0x602   : > { %v1570_v56 = vrot.slane %v1569_v55, 1 }
 0x604   : > { %v1571_v57 = vadd.f32 %v1570_v56, %v1569_v55 }
 0x606   : > { %v1572_v58 = vmul.f32 0.0078125, %v1571_v57 }
 0x608   : > { %v5556_v59 = vsub.f32 %v1519_v25, %v1572_v58  ;;  %v5560_v62 = vsub.f32 %v1520_v36, %v1572_v58  ;;  %v5564_v63 = vsub.f32 %v1521_v40, %v1572_v58  ;;  %v5568_v0 = vsub.f32 %v1522_v53, %v1572_v58 }
 0x609   : > { %v5572_v1 = vsub.f32 %v1523_v32, %v1572_v58  ;;  %v5576_v34 = vsub.f32 %v1524_v46, %v1572_v58  ;;  %v5580_v30 = vsub.f32 %v1525_v23, %v1572_v58  ;;  %v5584_v36 = vsub.f32 %v1526_v52, %v1572_v58 }
 0x60a   : > { %v5586_v25 = vsub.f32 %v1527_v61, %v1572_v58  ;;  %v5588_v38 = vsub.f32 %v1528_v60, %v1572_v58  ;;  %v5590_v49 = vsub.f32 %v1529_v9, %v1572_v58  ;;  %v5592_v53 = vsub.f32 %v1530_v7, %v1572_v58 }
 0x60b   : > { %v5594_v40 = vsub.f32 %v1531_v33, %v1572_v58  ;;  %v5596_v14 = vsub.f32 %v1532_v29, %v1572_v58  ;;  %v5598_v10 = vsub.f32 %v1533_v13, %v1572_v58  ;;  %v5600_v46 = vsub.f32 %v1534_v8, %v1572_v58 }
 0x60c   : > { %v1589_v32 = vmul.f32 %v5556_v59, %v5556_v59  ;;  %v1590_v35 = vmul.f32 %v5560_v62, %v5560_v62  ;;  %v1591_v42 = vmul.f32 %v5564_v63, %v5564_v63  ;;  %v1592_v52 = vmul.f32 %v5568_v0, %v5568_v0 }
 0x60d   : > { %v1593_v2 = vmul.f32 %v5572_v1, %v5572_v1  ;;  %v1594_v5 = vmul.f32 %v5576_v34, %v5576_v34  ;;  %v1595_v11 = vmul.f32 %v5580_v30, %v5580_v30  ;;  %v1596_v18 = vmul.f32 %v5584_v36, %v5584_v36 }
 0x60e   : > { %v1605_v23 = vsel %vm562_vm0, %v1589_v32, 0.0  ;;  %v1606_v60 = vsel %vm562_vm0, %v1590_v35, 0.0  ;;  %v1608_v3 = vsel %vm562_vm0, %v1591_v42, 0.0  ;;  %v1610_v7 = vsel %vm562_vm0, %v1592_v52, 0.0 }
 0x60f   : > { %v1607_v61 = vadd.f32 %v1606_v60, %v1605_v23  ;;  %v1612_v15 = vsel %vm562_vm0, %v1593_v2, 0.0  ;;  %v1614_v19 = vsel %vm562_vm0, %v1594_v5, 0.0  ;;  %v1597_v24 = vmul.f32 %v5586_v25, %v5586_v25 }
 0x610   : > { %v1616_v26 = vsel %vm562_vm0, %v1595_v11, 0.0  ;;  %v1598_v33 = vmul.f32 %v5588_v38, %v5588_v38  ;;  %v1618_v37 = vsel %vm562_vm0, %v1596_v18, 0.0  ;;  %v1599_v48 = vmul.f32 %v5590_v49, %v5590_v49 }
 0x611   : > { %v1609_v4 = vadd.f32 %v1608_v3, %v1607_v61  ;;  %v1620_v39 = vsel %vm562_vm0, %v1597_v24, 0.0  ;;  %v1600_v12 = vmul.f32 %v5592_v53, %v5592_v53  ;;  %v1601_v45 = vmul.f32 %v5594_v40, %v5594_v40  ;;  %v1517_v3 = vld [vmem:[%s6239_s3 + $0x7] sm:$0x1] }
 0x612   : > { %v1622_v43 = vsel %vm562_vm0, %v1598_v33, 0.0  ;;  %v1624_v8 = vsel %vm562_vm0, %v1599_v48, 0.0  ;;  %v1602_v20 = vmul.f32 %v5596_v14, %v5596_v14  ;;  %v1603_v22 = vmul.f32 %v5598_v10, %v5598_v10 }
 0x613   : > { %v1611_v9 = vadd.f32 %v1610_v7, %v1609_v4  ;;  %v1626_v41 = vsel %vm562_vm0, %v1600_v12, 0.0  ;;  %v1628_v51 = vsel %vm562_vm0, %v1601_v45, 0.0  ;;  %v1604_v31 = vmul.f32 %v5600_v46, %v5600_v46 }
 0x614   : > { %v1630_v54 = vsel %vm562_vm0, %v1602_v20, 0.0  ;;  %v1632_v27 = vsel %vm562_vm0, %v1603_v22, 0.0 }
 0x615   : > { %v1613_v16 = vadd.f32 %v1612_v15, %v1611_v9  ;;  %v1634_v57 = vsel %vm562_vm0, %v1604_v31, 0.0  ;;  %v3520_v9 = vld [vmem:[%s6239_s3 + $0x8] ss:$0 sm:$0xff] }
 0x616   : > { %v1851_v31 = vld [vmem:[#allocation5 + $0xd0] sm:$0xff] }
 0x617   : > { %v1615_v21 = vadd.f32 %v1614_v19, %v1613_v16 }
 0x619   : > { %v1617_v29 = vadd.f32 %v1616_v26, %v1615_v21 }
 0x61b   : > { %v1619_v47 = vadd.f32 %v1618_v37, %v1617_v29 }
 0x61d   : > { %v1621_v50 = vadd.f32 %v1620_v39, %v1619_v47 }
 0x61f   : > { %v1623_v44 = vadd.f32 %v1622_v43, %v1621_v50 }
 0x621   : > { %v1625_v13 = vadd.f32 %v1624_v8, %v1623_v44 }
 0x623   : > { %v1627_v17 = vadd.f32 %v1626_v41, %v1625_v13 }
 0x625   : > { %v1629_v28 = vadd.f32 %v1628_v51, %v1627_v17 }
 0x627   : > { %v1631_v55 = vadd.f32 %v1630_v54, %v1629_v28  ;;  %v1852_v54 = vld [vmem:[#allocation5 + $0xd8] sm:$0xff] }
 0x629   : > { %v1633_v56 = vadd.f32 %v1632_v27, %v1631_v55  ;;  %v3522_v55 = vld [vmem:[%s5171_s6 + $0x108] sm:$0xff] }
 0x62a   : > { %v3530_v27 = vld [vmem:[%s5171_s6 + $0x148] sm:$0xff] }
 0x62b   : > { %v1635_v58 = vadd.f32 %v1634_v57, %v1633_v56  ;;  %v3523_v56 = vld [vmem:[%s5171_s6 + $0x110] sm:$0xff] }
 0x62c   : > { %v3531_v57 = vld [vmem:[%s5171_s6 + $0x150] sm:$0xff] }
 0x62d   : > { %v1636_v32 = vrot.slane %v1635_v58, 4 }
 0x62f   : > { %v1637_v35 = vadd.f32 %v1636_v32, %v1635_v58  ;;  %v4645_v58 = vpack.c.bf16 %v1852_v54, %v1851_v31  ;;  %v1853_v32 = vld [vmem:[#allocation5 + $0xe0] sm:$0xff] }
 0x631   : > { %v1638_v42 = vrot.slane %v1637_v35, 2 }
 0x633   : > { %v1639_v52 = vadd.f32 %v1638_v42, %v1637_v35  ;;  %v1854_v35 = vld [vmem:[#allocation5 + $0xe8] sm:$0xff]  ;;  %v3524_v42 = vld [vmem:[%s5171_s6 + $0x118] sm:$0xff] }
 0x635   : > { %v1640_v23 = vrot.slane %v1639_v52, 1 }
 0x637   : > { %v1641_v60 = vadd.f32 %v1640_v23, %v1639_v52  ;;  %v3532_v52 = vld [vmem:[%s5171_s6 + $0x158] sm:$0xff]  ;;  %v3525_v23 = vld [vmem:[%s5171_s6 + $0x120] sm:$0xff] }
 0x639   : > { %v1642_v61 = vmul.f32 0.0078125, %v1641_v60  ;;  %v3533_v60 = vld [vmem:[%s5171_s6 + $0x160] sm:$0xff] }
 0x63b   : > { %v1643_v2 = vadd.f32 1e-05, %v1642_v61  ;;  %v4649_v61 = vpack.c.bf16 %v1854_v35, %v1853_v32 }
 0x63d   : > { %4852 = vrsqrt.f32 %v1643_v2  ;;  %v1855_v2 = vld [vmem:[#allocation5 + $0xf0] sm:$0xff] }
 0x647   : > { %v4853_v4 = vpop.eup %4852 }
 0x648   : > { %v1645_v5 = vmul.f32 %v4853_v4, %v1517_v3  ;;  %v1856_v3 = vld [vmem:[#allocation5 + $0xf8] sm:$0xff]  ;;  %v3526_v4 = vld [vmem:[%s5171_s6 + $0x128] sm:$0xff] }
 0x64a   : > { %v1649_v7 = vrot.slane %v1645_v5, %v5400_v6  ;;  %v3534_v5 = vld [vmem:[%s5171_s6 + $0x168] sm:$0xff] }
 0x64c   : > { %v1664_v11 = vmul.f32 %v1649_v7, %v5598_v10  ;;  %v1650_v15 = vmul.f32 %v1649_v7, %v5556_v59  ;;  %v1651_v16 = vmul.f32 %v1649_v7, %v5560_v62  ;;  %v1652_v18 = vmul.f32 %v1649_v7, %v5564_v63 }
 0x64d   : > { %v1653_v19 = vmul.f32 %v1649_v7, %v5568_v0  ;;  %v1654_v21 = vmul.f32 %v1649_v7, %v5572_v1  ;;  %v1655_v24 = vmul.f32 %v1649_v7, %v5576_v34  ;;  %v1656_v26 = vmul.f32 %v1649_v7, %v5580_v30 }
 0x64e   : > { %v1670_v29 = vadd.f32 %v3520_v9, %v1650_v15  ;;  %v1671_v33 = vadd.f32 %v3520_v9, %v1651_v16  ;;  %v1672_v37 = vadd.f32 %v3520_v9, %v1652_v18  ;;  %v1657_v59 = vmul.f32 %v1649_v7, %v5584_v36  ;;  %v3528_v15 = vld [vmem:[%s5171_s6 + $0x138] sm:$0xff]  ;;  %v2072_v18 = vld [vmem:[#allocation5 + $0x100] sm:$0xff] }
 0x64f   : > { %v1673_v47 = vadd.f32 %v3520_v9, %v1653_v19  ;;  %v1674_v48 = vadd.f32 %v3520_v9, %v1654_v21  ;;  %v1675_v10 = vadd.f32 %v3520_v9, %v1655_v24  ;;  %v1676_v62 = vadd.f32 %v3520_v9, %v1656_v26  ;;  %v3536_v16 = vld [vmem:[%s5171_s6 + $0x178] sm:$0xff]  ;;  %v2073_v19 = vld [vmem:[#allocation5 + $0x108] sm:$0xff]  ;;  %v2074_v21 = vld [vmem:[#allocation5 + $0x110] sm:$0xff] }
 0x650   : > { %v4609_v39 = vpack.c.bf16 %v1671_v33, %v1670_v29  ;;  %v1658_v63 = vmul.f32 %v1649_v7, %v5586_v25  ;;  %v1659_v0 = vmul.f32 %v1649_v7, %v5588_v38  ;;  %v1677_v12 = vadd.f32 %v3520_v9, %v1657_v59  ;;  %v2075_v26 = vld [vmem:[#allocation5 + $0x118] sm:$0xff]  ;;  %v2076_v33 = vld [vmem:[#allocation5 + $0x120] sm:$0xff] }
 0x651   : > { %v4613_v50 = vpack.c.bf16 %v1673_v47, %v1672_v37  ;;  %v4617_v1 = vpack.c.bf16 %v1675_v10, %v1674_v48  ;;  %v1660_v34 = vmul.f32 %v1649_v7, %v5590_v49  ;;  %v1661_v44 = vmul.f32 %v1649_v7, %v5592_v53  ;;  %v2077_v37 = vld [vmem:[#allocation5 + $0x128] sm:$0xff] }
 0x652   : > { %4610 = vmatprep.subr.bf16.mxu0 %v4609_v39  ;;  %4769 = vmatprep.subr.bf16.mxu1 %v4609_v39  ;;  %v1678_v30 = vadd.f32 %v3520_v9, %v1658_v63  ;;  %v1679_v43 = vadd.f32 %v3520_v9, %v1659_v0  ;;  %v4621_v36 = vpack.c.bf16 %v1677_v12, %v1676_v62 }
 0x653   : > { %4612 = vmatpush3.bf16.msra.mxu0 %v4609_v39  ;;  %4777 = vmatpush3.bf16.msra.mxu1 %v4609_v39  ;;  %v1680_v45 = vadd.f32 %v3520_v9, %v1660_v34  ;;  %v1662_v8 = vmul.f32 %v1649_v7, %v5594_v40  ;;  %v1681_v38 = vadd.f32 %v3520_v9, %v1661_v44  ;;  %v1849_v40 = vld [vmem:[#allocation5 + $0xc0] sm:$0xff] }
 0x654   : > { %4614 = vmatprep.subr.bf16.mxu0 %v4613_v50  ;;  %4770 = vmatprep.subr.bf16.mxu1 %v4613_v50  ;;  %v4625_v25 = vpack.c.bf16 %v1679_v43, %v1678_v30  ;;  %v1663_v13 = vmul.f32 %v1649_v7, %v5596_v14  ;;  %v1684_v20 = vadd.f32 %v3520_v9, %v1664_v11  ;;  %v1850_v14 = vld [vmem:[#allocation5 + $0xc8] sm:$0xff] }
 0x655   : > { %v1682_v49 = vadd.f32 %v3520_v9, %v1662_v8  ;;  %v1665_v41 = vmul.f32 %v1649_v7, %v5600_v46  ;;  %v4629_v17 = vpack.c.bf16 %v1681_v38, %v1680_v45  ;;  %v4641_v46 = vpack.c.bf16 %v1850_v14, %v1849_v40  ;;  %v3527_v7 = vld [vmem:[%s5171_s6 + $0x130] sm:$0xff] }
 0x656   : > { %v1683_v22 = vadd.f32 %v3520_v9, %v1663_v13  ;;  %v4653_v11 = vpack.c.bf16 %v1856_v3, %v1855_v2  ;;  %v4657_v24 = vpack.c.bf16 %v2073_v19, %v2072_v18  ;;  %v4661_v29 = vpack.c.bf16 %v2075_v26, %v2074_v21  ;;  %v2078_v8 = vld [vmem:[#allocation5 + $0x130] sm:$0xff] }
 0x657   : > { %4616 = vmatpush3.bf16.msra.mxu0 %v4613_v50  ;;  %4778 = vmatpush3.bf16.msra.mxu1 %v4613_v50  ;;  %v1685_v53 = vadd.f32 %v3520_v9, %v1665_v41  ;;  %v3535_v9 = vld [vmem:[%s5171_s6 + $0x170] sm:$0xff]  ;;  %v4665_v47 = vpack.c.bf16 %v2077_v37, %v2076_v33 }
 0x658   : > { %4618 = vmatprep.subr.bf16.mxu0 %v4617_v1  ;;  %4771 = vmatprep.subr.bf16.mxu1 %v4617_v1  ;;  %v4633_v51 = vpack.c.bf16 %v1683_v22, %v1682_v49  ;;  %v3537_v13 = vld [vmem:[%s6239_s3 + $0x9] ss:$0 sm:$0xff] }
 0x659   : > { %v4637_v28 = vpack.c.bf16 %v1685_v53, %v1684_v20 }
 0x65b   : > { %4620 = vmatpush3.bf16.msra.mxu0 %v4617_v1  ;;  %4779 = vmatpush3.bf16.msra.mxu1 %v4617_v1 }
 0x65c   : > { %4622 = vmatprep.subr.bf16.mxu0 %v4621_v36  ;;  %4772 = vmatprep.subr.bf16.mxu1 %v4621_v36 }
 0x65f   : > { %4624 = vmatpush3.bf16.msra.mxu0 %v4621_v36  ;;  %4780 = vmatpush3.bf16.msra.mxu1 %v4621_v36 }
 0x660   : > { %4626 = vmatprep.subr.bf16.mxu0 %v4625_v25  ;;  %4773 = vmatprep.subr.bf16.mxu1 %v4625_v25 }
 0x663   : > { %4628 = vmatpush3.bf16.msra.mxu0 %v4625_v25  ;;  %4781 = vmatpush3.bf16.msra.mxu1 %v4625_v25  ;;  %v2079_v25 = vld [vmem:[#allocation5 + $0x138] sm:$0xff] }
 0x664   : > { %4630 = vmatprep.subr.bf16.mxu0 %v4629_v17  ;;  %4774 = vmatprep.subr.bf16.mxu1 %v4629_v17  ;;  %v4669_v38 = vpack.c.bf16 %v2079_v25, %v2078_v8 }
 0x667   : > { %4632 = vmatpush3.bf16.msra.mxu0 %v4629_v17  ;;  %4782 = vmatpush3.bf16.msra.mxu1 %v4629_v17 }
 0x668   : > { %4634 = vmatprep.subr.bf16.mxu0 %v4633_v51  ;;  %4775 = vmatprep.subr.bf16.mxu1 %v4633_v51 }
 0x66b   : > { %4636 = vmatpush3.bf16.msra.mxu0 %v4633_v51  ;;  %4783 = vmatpush3.bf16.msra.mxu1 %v4633_v51 }
 0x66c   : > { %4638 = vmatprep.subr.bf16.mxu0 %v4637_v28  ;;  %4776 = vmatprep.subr.bf16.mxu1 %v4637_v28 }
 0x66f   : > { %4640 = vmatpush3.bf16.msra.mxu0 %v4637_v28  ;;  %4784 = vmatpush3.bf16.msra.mxu1 %v4637_v28 }
 0x670   : > { %4642 = vmatprep.subr.bf16.mxu1 %v4641_v46  ;;  %4658 = vmatprep.subr.bf16.mxu0 %v4657_v24 }
 0x672   : > { %4223 = vmatmul.mubr.f32.vlgmr.msra.gmra.mrb[32].mxu0 %v3522_v55  ;;  %4235 = vmatmul.mubr.f32.vlgmr.msra.gmra.mrb[48].mxu1 %v3530_v27 }
 0x673   : > { %4225 = vmatprep.mubr.f32.mxu0 %v3523_v56  ;;  %4237 = vmatprep.mubr.f32.mxu1 %v3531_v57 }
 0x674   : > { %4644 = vmatpush3.bf16.msra.mxu1 %v4641_v46  ;;  %4660 = vmatpush3.bf16.msra.mxu0 %v4657_v24 }
 0x675   : > { %4646 = vmatprep.subr.bf16.mxu1 %v4645_v58  ;;  %4662 = vmatprep.subr.bf16.mxu0 %v4661_v29 }
 0x676   : > { %4226 = vmatmul.mubr.f32.gmra.mrb[34].mxu0 %v3524_v42  ;;  %4238 = vmatmul.mubr.f32.gmra.mrb[50].mxu1 %v3532_v52 }
 0x677   : > { %4228 = vmatprep.mubr.f32.mxu0 %v3525_v23  ;;  %4240 = vmatprep.mubr.f32.mxu1 %v3533_v60 }
 0x678   : > { %4648 = vmatpush3.bf16.msra.mxu1 %v4645_v58  ;;  %4664 = vmatpush3.bf16.msra.mxu0 %v4661_v29 }
 0x679   : > { %4650 = vmatprep.subr.bf16.mxu1 %v4649_v61  ;;  %4666 = vmatprep.subr.bf16.mxu0 %v4665_v47 }
 0x67a   : > { %4229 = vmatmul.mubr.f32.gmra.mrb[36].mxu0 %v3526_v4  ;;  %4241 = vmatmul.mubr.f32.gmra.mrb[52].mxu1 %v3534_v5 }
 0x67b   : > { %4231 = vmatprep.mubr.f32.mxu0 %v3527_v7  ;;  %4243 = vmatprep.mubr.f32.mxu1 %v3535_v9 }
 0x67c   : > { %4652 = vmatpush3.bf16.msra.mxu1 %v4649_v61  ;;  %4668 = vmatpush3.bf16.msra.mxu0 %v4665_v47 }
 0x67d   : > { %4654 = vmatprep.subr.bf16.mxu1 %v4653_v11  ;;  %4670 = vmatprep.subr.bf16.mxu0 %v4669_v38 }
 0x67e   : > { %4232 = vmatmul.mubr.f32.gmra.mrb[38].mxu0 %v3528_v15  ;;  %4244 = vmatmul.mubr.f32.gmra.mrb[54].mxu1 %v3536_v16 }
 0x680   : > { %4656 = vmatpush3.bf16.msra.mxu1 %v4653_v11  ;;  %4672 = vmatpush3.bf16.msra.mxu0 %v4669_v38 }
 0x745   : > { %v4224_v48 = vpop.f32.mrb[32].mxu0  ;;  %v4236_v10 = vpop.f32.mrb[48].mxu1 }
 0x746   : > { %v1769_v59 = vpop.f32.mrb[33].mxu0  ;;  %v1809_v39 = vpop.f32.mrb[49].mxu1 }
 0x747   : > { %4262 = vmatprep.mubr.msk.f32.mxu1 %vm562_vm0, %v1769_v59 }
 0x748   : > { %4263 = vmatmul.mubr.msk.f32.vlgmr.msra.gmra.mrb[56].mxu1 %vm562_vm0, %v4224_v48 }
 0x749   : > { %v4227_v62 = vpop.f32.mrb[34].mxu0  ;;  %v4239_v63 = vpop.f32.mrb[50].mxu1 }
 0x74a   : > { %v1779_v0 = vpop.f32.mrb[35].mxu0  ;;  %v1819_v50 = vpop.f32.mrb[51].mxu1 }
 0x74b   : > { %4265 = vmatprep.mubr.msk.f32.mxu1 %vm562_vm0, %v1779_v0 }
 0x74c   : > { %4266 = vmatmul.mubr.msk.f32.gmra.mrb[58].mxu1 %vm562_vm0, %v4227_v62 }
 0x74d   : > { %v4230_v1 = vpop.f32.mrb[36].mxu0  ;;  %v4242_v12 = vpop.f32.mrb[52].mxu1 }
 0x74e   : > { %v1789_v34 = vpop.f32.mrb[37].mxu0  ;;  %v1829_v30 = vpop.f32.mrb[53].mxu1 }
 0x74f   : > { %4268 = vmatprep.mubr.msk.f32.mxu1 %vm562_vm0, %v1789_v34 }
 0x750   : > { %4269 = vmatmul.mubr.msk.f32.gmra.mrb[60].mxu1 %vm562_vm0, %v4230_v1 }
 0x751   : > { %v4233_v43 = vpop.f32.mrb[38].mxu0  ;;  %v4245_v44 = vpop.f32.mrb[54].mxu1 }
 0x752   : > { %v1799_v36 = vpop.f32.mrb[39].mxu0  ;;  %v1839_v45 = vpop.f32.mrb[55].mxu1 }
 0x753   : > { %4271 = vmatprep.mubr.msk.f32.mxu1 %vm562_vm0, %v1799_v36 }
 0x754   : > { %4272 = vmatmul.mubr.msk.f32.gmra.mrb[62].mxu1 %vm562_vm0, %v4233_v43 }
 0x755   : > { %4274 = vmatprep.mubr.msk.f32.mxu1 %vm562_vm0, %v1809_v39 }
 0x758   : > { %4275 = vmatmul.mubr.msk.f32.gmra.mrb[64].mxu1 %vm562_vm0, %v4236_v10 }
 0x759   : > { %4277 = vmatprep.mubr.msk.f32.mxu1 %vm562_vm0, %v1819_v50 }
 0x75c   : > { %4278 = vmatmul.mubr.msk.f32.gmra.mrb[66].mxu1 %vm562_vm0, %v4239_v63  ;;  %v5725_v63 = vld [vmem:[%s6239_s3 + $0xa] ss:$0 sm:$0xff] }
 0x75d   : > { %4280 = vmatprep.mubr.msk.f32.mxu1 %vm562_vm0, %v1829_v30 }
 0x760   : > { %4281 = vmatmul.mubr.msk.f32.gmra.mrb[68].mxu1 %vm562_vm0, %v4242_v12 }
 0x761   : > { %4283 = vmatprep.mubr.msk.f32.mxu1 %vm562_vm0, %v1839_v45 }
 0x764   : > { %4284 = vmatmul.mubr.msk.f32.gmra.mrb[70].mxu1 %vm562_vm0, %v4245_v44 }
 0x81b   : > { %v4264_v20 = vpop.f32.mrb[56].mxu1 }
 0x81c   : > { %v1982_v49 = vadd.f32 %v4264_v20, %v3537_v13  ;;  %v1976_v41 = vpop.f32.mrb[57].mxu1 }
 0x81d   : > { %v1977_v17 = vadd.f32 %v3537_v13, %v1976_v41 }
 0x81e   : > { %v2056_v51 = vmax.f32 %v1982_v49, 0.0 }
 0x81f   : > { %v2055_v22 = vmax.f32 %v1977_v17, 0.0  ;;  %v4267_v53 = vpop.f32.mrb[58].mxu1 }
 0x820   : > { %v1992_v28 = vadd.f32 %v4267_v53, %v3537_v13  ;;  %v1986_v40 = vpop.f32.mrb[59].mxu1 }
 0x821   : > { %v1987_v14 = vadd.f32 %v3537_v13, %v1986_v40  ;;  %4302 = vmatprep.mubr.msk.f32.mxu0 %vm562_vm0, %v2055_v22 }
 0x822   : > { %4303 = vmatmul.mubr.msk.f32.vlgmr.msra.gmra.mrb[40].mxu0 %vm562_vm0, %v2056_v51  ;;  %v2058_v54 = vmax.f32 %v1992_v28, 0.0 }
 0x823   : > { %v2057_v46 = vmax.f32 %v1987_v14, 0.0  ;;  %v4270_v31 = vpop.f32.mrb[60].mxu1 }
 0x824   : > { %v2002_v55 = vadd.f32 %v4270_v31, %v3537_v13  ;;  %v1996_v27 = vpop.f32.mrb[61].mxu1 }
 0x825   : > { %v1997_v56 = vadd.f32 %v3537_v13, %v1996_v27  ;;  %4305 = vmatprep.mubr.msk.f32.mxu0 %vm562_vm0, %v2057_v46 }
 0x826   : > { %4306 = vmatmul.mubr.msk.f32.gmra.mrb[42].mxu0 %vm562_vm0, %v2058_v54  ;;  %v2060_v32 = vmax.f32 %v2002_v55, 0.0 }
 0x827   : > { %v2059_v57 = vmax.f32 %v1997_v56, 0.0  ;;  %v4273_v58 = vpop.f32.mrb[62].mxu1 }
 0x828   : > { %v2012_v35 = vadd.f32 %v4273_v58, %v3537_v13  ;;  %v2006_v42 = vpop.f32.mrb[63].mxu1 }
 0x829   : > { %v2007_v52 = vadd.f32 %v3537_v13, %v2006_v42  ;;  %4308 = vmatprep.mubr.msk.f32.mxu0 %vm562_vm0, %v2059_v57 }
 0x82a   : > { %4309 = vmatmul.mubr.msk.f32.gmra.mrb[44].mxu0 %vm562_vm0, %v2060_v32  ;;  %v2062_v61 = vmax.f32 %v2012_v35, 0.0 }
 0x82b   : > { %v2061_v23 = vmax.f32 %v2007_v52, 0.0  ;;  %v4276_v60 = vpop.f32.mrb[64].mxu1 }
 0x82c   : > { %v2022_v2 = vadd.f32 %v4276_v60, %v3537_v13  ;;  %v2016_v3 = vpop.f32.mrb[65].mxu1 }
 0x82d   : > { %v2017_v4 = vadd.f32 %v3537_v13, %v2016_v3  ;;  %4311 = vmatprep.mubr.msk.f32.mxu0 %vm562_vm0, %v2061_v23 }
 0x82e   : > { %4312 = vmatmul.mubr.msk.f32.gmra.mrb[46].mxu0 %vm562_vm0, %v2062_v61  ;;  %v2064_v9 = vmax.f32 %v2022_v2, 0.0 }
 0x82f   : > { %v2063_v5 = vmax.f32 %v2017_v4, 0.0  ;;  %v4279_v7 = vpop.f32.mrb[66].mxu1 }
 0x830   : > { %v2032_v11 = vadd.f32 %v4279_v7, %v3537_v13  ;;  %v2026_v15 = vpop.f32.mrb[67].mxu1 }
 0x831   : > { %v2027_v16 = vadd.f32 %v3537_v13, %v2026_v15  ;;  %4314 = vmatprep.mubr.msk.f32.mxu0 %vm562_vm0, %v2063_v5 }
 0x832   : > { %4315 = vmatmul.mubr.msk.f32.gmra.mrb[48].mxu0 %vm562_vm0, %v2064_v9  ;;  %v2066_v21 = vmax.f32 %v2032_v11, 0.0 }
 0x833   : > { %v2065_v18 = vmax.f32 %v2027_v16, 0.0  ;;  %v4282_v19 = vpop.f32.mrb[68].mxu1 }
 0x834   : > { %v2042_v24 = vadd.f32 %v4282_v19, %v3537_v13  ;;  %v2036_v26 = vpop.f32.mrb[69].mxu1 }
 0x835   : > { %v2037_v29 = vadd.f32 %v3537_v13, %v2036_v26  ;;  %4317 = vmatprep.mubr.msk.f32.mxu0 %vm562_vm0, %v2065_v18 }
 0x836   : > { %4318 = vmatmul.mubr.msk.f32.gmra.mrb[50].mxu0 %vm562_vm0, %v2066_v21  ;;  %v2068_v47 = vmax.f32 %v2042_v24, 0.0 }
 0x837   : > { %v2067_v33 = vmax.f32 %v2037_v29, 0.0  ;;  %v4285_v37 = vpop.f32.mrb[70].mxu1 }
 0x838   : > { %v2052_v48 = vadd.f32 %v4285_v37, %v3537_v13  ;;  %v2046_v10 = vpop.f32.mrb[71].mxu1 }
 0x839   : > { %v2047_v59 = vadd.f32 %v3537_v13, %v2046_v10  ;;  %4320 = vmatprep.mubr.msk.f32.mxu0 %vm562_vm0, %v2067_v33 }
 0x83a   : > { %4321 = vmatmul.mubr.msk.f32.gmra.mrb[52].mxu0 %vm562_vm0, %v2068_v47  ;;  %v2070_v62 = vmax.f32 %v2052_v48, 0.0 }
 0x83b   : > { %v2069_v39 = vmax.f32 %v2047_v59, 0.0 }
 0x83d   : > { %4323 = vmatprep.mubr.msk.f32.mxu0 %vm562_vm0, %v2069_v39 }
 0x83e   : > { %4324 = vmatmul.mubr.msk.f32.gmra.mrb[54].mxu0 %vm562_vm0, %v2070_v62 }
 0x8f5   : > { %v4304_v0 = vpop.f32.mrb[40].mxu0 }
 0x8f6   : > { %v5728_v50 = vadd.f32 %v4304_v0, %v5725_v63  ;;  %v2199_v1 = vpop.f32.mrb[41].mxu0 }
 0x8f7   : > { %v5731_v12 = vadd.f32 %v5725_v63, %v2199_v1 }
 0x8f8   : > { %v2281_v34 = vmax.f32 %v5728_v50, 0.0 }
 0x8f9   : > { %v2280_v30 = vmax.f32 %v5731_v12, 0.0  ;;  %v4307_v43 = vpop.f32.mrb[42].mxu0 }
 0x8fa   : > { %v2297_v44 = vsel %vm562_vm0, %v2281_v34, 0.0  ;;  %v5739_v36 = vadd.f32 %v4307_v43, %v5725_v63  ;;  %v2209_v45 = vpop.f32.mrb[43].mxu0 }
 0x8fb   : > { %v2296_v8 = vsel %vm562_vm0, %v2280_v30, 0.0  ;;  %v5745_v25 = vadd.f32 %v5725_v63, %v2209_v45 }
 0x8fc   : > { %v2298_v38 = vadd.f32 %v2297_v44, %v2296_v8  ;;  %v2283_v13 = vmax.f32 %v5739_v36, 0.0 }
 0x8fd   : > { %v2282_v20 = vmax.f32 %v5745_v25, 0.0  ;;  %v4310_v49 = vpop.f32.mrb[44].mxu0 }
 0x8fe   : > { %v5750_v41 = vadd.f32 %v4310_v49, %v5725_v63  ;;  %v2219_v17 = vpop.f32.mrb[45].mxu0  ;;  %v2301_v28 = vsel %vm562_vm0, %v2283_v13, 0.0 }
 0x8ff   : > { %v2299_v22 = vsel %vm562_vm0, %v2282_v20, 0.0  ;;  %v5756_v53 = vadd.f32 %v5725_v63, %v2219_v17  ;;  %v3572_v17 = vld [vmem:[%s5171_s6 + $0x180] sm:$0xff] }
 0x900   : > { %v2300_v51 = vadd.f32 %v2299_v22, %v2298_v38  ;;  %v2285_v40 = vmax.f32 %v5750_v41, 0.0  ;;  %4358 = vmatprep.mubr.f32.mxu1 %v3572_v17 }
 0x901   : > { %v2284_v14 = vmax.f32 %v5756_v53, 0.0  ;;  %v4313_v46 = vpop.f32.mrb[46].mxu0 }
 0x902   : > { %v2302_v31 = vadd.f32 %v2301_v28, %v2300_v51  ;;  %v5764_v54 = vadd.f32 %v4313_v46, %v5725_v63  ;;  %v2229_v55 = vpop.f32.mrb[47].mxu0  ;;  %v2305_v58 = vsel %vm562_vm0, %v2285_v40, 0.0 }
 0x903   : > { %v2303_v27 = vsel %vm562_vm0, %v2284_v14, 0.0  ;;  %v5770_v56 = vadd.f32 %v5725_v63, %v2229_v55 }
 0x904   : > { %v2304_v57 = vadd.f32 %v2303_v27, %v2302_v31  ;;  %v2287_v32 = vmax.f32 %v5764_v54, 0.0 }
 0x905   : > { %v2286_v35 = vmax.f32 %v5770_v56, 0.0  ;;  %v4316_v42 = vpop.f32.mrb[48].mxu0 }
 0x906   : > { %v2306_v52 = vadd.f32 %v2305_v58, %v2304_v57  ;;  %v2245_v23 = vadd.f32 %v4316_v42, %v5725_v63  ;;  %v2239_v60 = vpop.f32.mrb[49].mxu0  ;;  %v2309_v4 = vsel %vm562_vm0, %v2287_v32, 0.0 }
 0x907   : > { %v2307_v61 = vsel %vm562_vm0, %v2286_v35, 0.0  ;;  %v2240_v2 = vadd.f32 %v5725_v63, %v2239_v60 }
 0x908   : > { %v2308_v3 = vadd.f32 %v2307_v61, %v2306_v52  ;;  %v2289_v5 = vmax.f32 %v2245_v23, 0.0 }
 0x909   : > { %v2288_v7 = vmax.f32 %v2240_v2, 0.0  ;;  %v4319_v9 = vpop.f32.mrb[50].mxu0 }
 0x90a   : > { %v2310_v11 = vadd.f32 %v2309_v4, %v2308_v3  ;;  %v2255_v15 = vadd.f32 %v4319_v9, %v5725_v63  ;;  %v2249_v16 = vpop.f32.mrb[51].mxu0  ;;  %v2313_v24 = vsel %vm562_vm0, %v2289_v5, 0.0 }
 0x90b   : > { %v2311_v18 = vsel %vm562_vm0, %v2288_v7, 0.0  ;;  %v2250_v19 = vadd.f32 %v5725_v63, %v2249_v16 }
 0x90c   : > { %v2312_v21 = vadd.f32 %v2311_v18, %v2310_v11  ;;  %v2291_v26 = vmax.f32 %v2255_v15, 0.0  ;;  %v2610_v15 = vld [vmem:[#allocation5 + $0x140] sm:$0xff]  ;;  %v2611_v18 = vld [vmem:[#allocation5 + $0x148] sm:$0xff] }
 0x90d   : > { %v2290_v29 = vmax.f32 %v2250_v19, 0.0  ;;  %v4322_v33 = vpop.f32.mrb[52].mxu0  ;;  %v2612_v19 = vld [vmem:[#allocation5 + $0x150] sm:$0xff] }
 0x90e   : > { %v2314_v37 = vadd.f32 %v2313_v24, %v2312_v21  ;;  %v2265_v47 = vadd.f32 %v4322_v33, %v5725_v63  ;;  %v2259_v48 = vpop.f32.mrb[53].mxu0  ;;  %v2317_v62 = vsel %vm562_vm0, %v2291_v26, 0.0  ;;  %v2613_v21 = vld [vmem:[#allocation5 + $0x158] sm:$0xff] }
 0x90f   : > { %v2315_v10 = vsel %vm562_vm0, %v2290_v29, 0.0  ;;  %v2260_v59 = vadd.f32 %v5725_v63, %v2259_v48  ;;  %v4709_v48 = vpack.c.bf16 %v2613_v21, %v2612_v19 }
 0x910   : > { %v2316_v39 = vadd.f32 %v2315_v10, %v2314_v37  ;;  %v2293_v0 = vmax.f32 %v2265_v47, 0.0  ;;  %v4705_v47 = vpack.c.bf16 %v2611_v18, %v2610_v15 }
 0x911   : > { %v2292_v1 = vmax.f32 %v2260_v59, 0.0  ;;  %v4325_v43 = vpop.f32.mrb[54].mxu0  ;;  %v2614_v59 = vld [vmem:[#allocation5 + $0x160] sm:$0xff] }
 0x912   : > { %v2318_v44 = vadd.f32 %v2317_v62, %v2316_v39  ;;  %v2275_v45 = vadd.f32 %v4325_v43, %v5725_v63  ;;  %v2269_v8 = vpop.f32.mrb[55].mxu0  ;;  %v2321_v51 = vsel %vm562_vm0, %v2293_v0, 0.0  ;;  %v2615_v39 = vld [vmem:[#allocation5 + $0x168] sm:$0xff]  ;;  %4706 = vmatprep.subr.bf16.mxu0 %v4705_v47 }
 0x913   : > { %v2319_v38 = vsel %vm562_vm0, %v2292_v1, 0.0  ;;  %v2270_v49 = vadd.f32 %v5725_v63, %v2269_v8  ;;  %4708 = vmatpush3.bf16.msra.mxu0 %v4705_v47 }
 0x914   : > { %v2320_v22 = vadd.f32 %v2319_v38, %v2318_v44  ;;  %v2295_v28 = vmax.f32 %v2275_v45, 0.0  ;;  %4710 = vmatprep.subr.bf16.mxu0 %v4709_v48  ;;  %v4713_v45 = vpack.c.bf16 %v2615_v39, %v2614_v59  ;;  %v2616_v38 = vld [vmem:[#allocation5 + $0x170] sm:$0xff] }
 0x915   : > { %v2294_v46 = vmax.f32 %v2270_v49, 0.0  ;;  %v2617_v49 = vld [vmem:[#allocation5 + $0x178] sm:$0xff]  ;;  %v2278_v39 = vld [vmem:[%s6239_s3 + $0xb] sm:$0x1] }
 0x916   : > { %v2322_v31 = vadd.f32 %v2321_v51, %v2320_v22  ;;  %v2325_v56 = vsel %vm562_vm0, %v2295_v28, 0.0 }
 0x917   : > { %v2323_v55 = vsel %vm562_vm0, %v2294_v46, 0.0  ;;  %4712 = vmatpush3.bf16.msra.mxu0 %v4709_v48 }
 0x918   : > { %v2324_v27 = vadd.f32 %v2323_v55, %v2322_v31  ;;  %4714 = vmatprep.subr.bf16.mxu0 %v4713_v45  ;;  %v4717_v31 = vpack.c.bf16 %v2617_v49, %v2616_v38 }
 0x91a   : > { %v2326_v57 = vadd.f32 %v2325_v56, %v2324_v27 }
 0x91b   : > { %4716 = vmatpush3.bf16.msra.mxu0 %v4713_v45 }
 0x91c   : > { %v2327_v58 = vrot.slane %v2326_v57, 4  ;;  %4718 = vmatprep.subr.bf16.mxu0 %v4717_v31 }
 0x91e   : > { %v2328_v42 = vadd.f32 %v2327_v58, %v2326_v57 }
 0x91f   : > { %4720 = vmatpush3.bf16.msra.mxu0 %v4717_v31 }
 0x920   : > { %v2329_v52 = vrot.slane %v2328_v42, 2 }
 0x922   : > { %v2330_v23 = vadd.f32 %v2329_v52, %v2328_v42 }
 0x924   : > { %v2331_v60 = vrot.slane %v2330_v23, 1 }
 0x926   : > { %v2332_v63 = vadd.f32 %v2331_v60, %v2330_v23 }
 0x928   : > { %v2333_v61 = vmul.f32 0.0078125, %v2332_v63 }
 0x92a   : > { %v5800_v2 = vsub.f32 %v2280_v30, %v2333_v61  ;;  %v5804_v3 = vsub.f32 %v2281_v34, %v2333_v61  ;;  %v5808_v4 = vsub.f32 %v2282_v20, %v2333_v61  ;;  %v5812_v9 = vsub.f32 %v2283_v13, %v2333_v61 }
 0x92b   : > { %v5816_v11 = vsub.f32 %v2284_v14, %v2333_v61  ;;  %v5820_v12 = vsub.f32 %v2285_v40, %v2333_v61  ;;  %v5822_v30 = vsub.f32 %v2286_v35, %v2333_v61  ;;  %v5826_v50 = vsub.f32 %v2287_v32, %v2333_v61 }
 0x92c   : > { %v5828_v34 = vsub.f32 %v2288_v7, %v2333_v61  ;;  %v5830_v25 = vsub.f32 %v2289_v5, %v2333_v61  ;;  %v5832_v36 = vsub.f32 %v2290_v29, %v2333_v61  ;;  %v5834_v13 = vsub.f32 %v2291_v26, %v2333_v61 }
 0x92d   : > { %v5836_v20 = vsub.f32 %v2292_v1, %v2333_v61  ;;  %v5838_v53 = vsub.f32 %v2293_v0, %v2333_v61  ;;  %v5840_v41 = vsub.f32 %v2294_v46, %v2333_v61  ;;  %v5842_v40 = vsub.f32 %v2295_v28, %v2333_v61 }
 0x92e   : > { %v2350_v14 = vmul.f32 %v5800_v2, %v5800_v2  ;;  %v2351_v54 = vmul.f32 %v5804_v3, %v5804_v3  ;;  %v2352_v32 = vmul.f32 %v5808_v4, %v5808_v4  ;;  %v2353_v35 = vmul.f32 %v5812_v9, %v5812_v9 }
 0x92f   : > { %v2354_v24 = vmul.f32 %v5816_v11, %v5816_v11  ;;  %v2355_v33 = vmul.f32 %v5820_v12, %v5820_v12  ;;  %v2356_v62 = vmul.f32 %v5822_v30, %v5822_v30  ;;  %v2357_v43 = vmul.f32 %v5826_v50, %v5826_v50 }
 0x930   : > { %v2366_v5 = vsel %vm562_vm0, %v2350_v14, 0.0  ;;  %v2367_v7 = vsel %vm562_vm0, %v2351_v54, 0.0  ;;  %v2369_v26 = vsel %vm562_vm0, %v2352_v32, 0.0  ;;  %v2371_v37 = vsel %vm562_vm0, %v2353_v35, 0.0 }
 0x931   : > { %v2368_v16 = vadd.f32 %v2367_v7, %v2366_v5  ;;  %v2373_v0 = vsel %vm562_vm0, %v2354_v24, 0.0  ;;  %v2375_v44 = vsel %vm562_vm0, %v2355_v33, 0.0  ;;  %v2358_v17 = vmul.f32 %v5828_v34, %v5828_v34 }
 0x932   : > { %v2377_v22 = vsel %vm562_vm0, %v2356_v62, 0.0  ;;  %v2359_v28 = vmul.f32 %v5830_v25, %v5830_v25  ;;  %v2379_v46 = vsel %vm562_vm0, %v2357_v43, 0.0  ;;  %v2360_v27 = vmul.f32 %v5832_v36, %v5832_v36  ;;  %v3571_v43 = vld [vmem:[%s6239_s3 + $0xc] ss:$0 sm:$0xff] }
 0x933   : > { %v2370_v29 = vadd.f32 %v2369_v26, %v2368_v16  ;;  %v2381_v56 = vsel %vm562_vm0, %v2358_v17, 0.0  ;;  %v2361_v58 = vmul.f32 %v5834_v13, %v5834_v13  ;;  %v2362_v23 = vmul.f32 %v5836_v20, %v5836_v20 }
 0x934   : > { %v2383_v42 = vsel %vm562_vm0, %v2359_v28, 0.0  ;;  %v2385_v60 = vsel %vm562_vm0, %v2360_v27, 0.0  ;;  %v2363_v61 = vmul.f32 %v5838_v53, %v5838_v53  ;;  %v2364_v32 = vmul.f32 %v5840_v41, %v5840_v41 }
 0x935   : > { %v2372_v10 = vadd.f32 %v2371_v37, %v2370_v29  ;;  %v2387_v14 = vsel %vm562_vm0, %v2361_v58, 0.0  ;;  %v2389_v35 = vsel %vm562_vm0, %v2362_v23, 0.0  ;;  %v2365_v7 = vmul.f32 %v5842_v40, %v5842_v40 }
 0x936   : > { %v2391_v15 = vsel %vm562_vm0, %v2363_v61, 0.0  ;;  %v2393_v18 = vsel %vm562_vm0, %v2364_v32, 0.0 }
 0x937   : > { %v2374_v1 = vadd.f32 %v2373_v0, %v2372_v10  ;;  %v2395_v21 = vsel %vm562_vm0, %v2365_v7, 0.0  ;;  %v3576_v7 = vld [vmem:[%s5171_s6 + $0x1a0] sm:$0xff] }
 0x939   : > { %v2376_v8 = vadd.f32 %v2375_v44, %v2374_v1 }
 0x93b   : > { %v2378_v51 = vadd.f32 %v2377_v22, %v2376_v8 }
 0x93d   : > { %v2380_v55 = vadd.f32 %v2379_v46, %v2378_v51 }
 0x93f   : > { %v2382_v57 = vadd.f32 %v2381_v56, %v2380_v55 }
 0x941   : > { %v2384_v52 = vadd.f32 %v2383_v42, %v2382_v57 }
 0x943   : > { %v2386_v63 = vadd.f32 %v2385_v60, %v2384_v52 }
 0x945   : > { %v2388_v54 = vadd.f32 %v2387_v14, %v2386_v63 }
 0x947   : > { %v2390_v5 = vadd.f32 %v2389_v35, %v2388_v54 }
 0x949   : > { %v2392_v16 = vadd.f32 %v2391_v15, %v2390_v5  ;;  %v3577_v15 = vld [vmem:[%s5171_s6 + $0x1a8] sm:$0xff] }
 0x94b   : > { %v2394_v19 = vadd.f32 %v2393_v18, %v2392_v16  ;;  %v3578_v16 = vld [vmem:[%s5171_s6 + $0x1b0] sm:$0xff]  ;;  %v3579_v18 = vld [vmem:[%s5171_s6 + $0x1b8] sm:$0xff] }
 0x94d   : > { %v2396_v24 = vadd.f32 %v2395_v21, %v2394_v19  ;;  %v3580_v19 = vld [vmem:[%s5171_s6 + $0x1c0] sm:$0xff]  ;;  %v3581_v21 = vld [vmem:[%s5171_s6 + $0x1c8] sm:$0xff] }
 0x94f   : > { %v2397_v26 = vrot.slane %v2396_v24, 4 }
 0x951   : > { %v2398_v29 = vadd.f32 %v2397_v26, %v2396_v24  ;;  %v3582_v24 = vld [vmem:[%s5171_s6 + $0x1d0] sm:$0xff]  ;;  %v3583_v26 = vld [vmem:[%s5171_s6 + $0x1d8] sm:$0xff] }
 0x953   : > { %v2399_v33 = vrot.slane %v2398_v29, 2 }
 0x955   : > { %v2400_v37 = vadd.f32 %v2399_v33, %v2398_v29  ;;  %v3584_v29 = vld [vmem:[%s5171_s6 + $0x1e0] sm:$0xff]  ;;  %v3585_v33 = vld [vmem:[%s5171_s6 + $0x1e8] sm:$0xff] }
 0x957   : > { %v2401_v47 = vrot.slane %v2400_v37, 1 }
 0x959   : > { %v2402_v48 = vadd.f32 %v2401_v47, %v2400_v37  ;;  %v3586_v37 = vld [vmem:[%s5171_s6 + $0x1f0] sm:$0xff]  ;;  %v3587_v47 = vld [vmem:[%s5171_s6 + $0x1f8] sm:$0xff] }
 0x95b   : > { %v2403_v10 = vmul.f32 0.0078125, %v2402_v48  ;;  %v2833_v48 = vld [vmem:[#allocation5 + $0x180] sm:$0xff] }
 0x95d   : > { %v2404_v59 = vadd.f32 1e-05, %v2403_v10  ;;  %v2834_v10 = vld [vmem:[#allocation5 + $0x188] sm:$0xff] }
 0x95f   : > { %4854 = vrsqrt.f32 %v2404_v59  ;;  %v2835_v59 = vld [vmem:[#allocation5 + $0x190] sm:$0xff] }
 0x969   : > { %v4855_v62 = vpop.eup %4854 }
 0x96a   : > { %v2406_v0 = vmul.f32 %v4855_v62, %v2278_v39  ;;  %v4721_v39 = vpack.c.bf16 %v2834_v10, %v2833_v48  ;;  %v2836_v62 = vld [vmem:[#allocation5 + $0x198] sm:$0xff] }
 0x96c   : > { %v2410_v1 = vrot.slane %v2406_v0, %v5400_v6  ;;  %v4725_v0 = vpack.c.bf16 %v2836_v62, %v2835_v59 }
 0x96e   : > { %v2425_v44 = vmul.f32 %v2410_v1, %v5840_v41  ;;  %v2411_v45 = vmul.f32 %v2410_v1, %v5800_v2  ;;  %v2412_v8 = vmul.f32 %v2410_v1, %v5804_v3  ;;  %v2413_v38 = vmul.f32 %v2410_v1, %v5808_v4 }
 0x96f   : > { %v2414_v49 = vmul.f32 %v2410_v1, %v5812_v9  ;;  %v2415_v17 = vmul.f32 %v2410_v1, %v5816_v11  ;;  %v2416_v22 = vmul.f32 %v2410_v1, %v5820_v12  ;;  %v2417_v51 = vmul.f32 %v2410_v1, %v5822_v30 }
 0x970   : > { %v2431_v28 = vadd.f32 %v3571_v43, %v2411_v45  ;;  %v2432_v46 = vadd.f32 %v3571_v43, %v2412_v8  ;;  %v2433_v31 = vadd.f32 %v3571_v43, %v2413_v38  ;;  %v2418_v55 = vmul.f32 %v2410_v1, %v5826_v50  ;;  %v2839_v45 = vld [vmem:[#allocation5 + $0x1b0] sm:$0xff]  ;;  %v2840_v8 = vld [vmem:[#allocation5 + $0x1b8] sm:$0xff] }
 0x971   : > { %v2434_v41 = vadd.f32 %v3571_v43, %v2414_v49  ;;  %v2435_v27 = vadd.f32 %v3571_v43, %v2415_v17  ;;  %v2436_v2 = vadd.f32 %v3571_v43, %v2416_v22  ;;  %v2437_v56 = vadd.f32 %v3571_v43, %v2417_v51 }
 0x972   : > { %v4673_v3 = vpack.c.bf16 %v2432_v46, %v2431_v28  ;;  %v2438_v57 = vadd.f32 %v3571_v43, %v2418_v55  ;;  %v2419_v4 = vmul.f32 %v2410_v1, %v5828_v34  ;;  %v2420_v9 = vmul.f32 %v2410_v1, %v5830_v25 }
 0x973   : > { %v4677_v11 = vpack.c.bf16 %v2434_v41, %v2433_v31  ;;  %v4681_v58 = vpack.c.bf16 %v2436_v2, %v2435_v27  ;;  %v2421_v12 = vmul.f32 %v2410_v1, %v5832_v36  ;;  %v2422_v30 = vmul.f32 %v2410_v1, %v5834_v13 }
 0x974   : > { %4674 = vmatprep.subr.bf16.mxu1 %v4673_v3  ;;  %v4685_v42 = vpack.c.bf16 %v2438_v57, %v2437_v56  ;;  %v2439_v52 = vadd.f32 %v3571_v43, %v2419_v4  ;;  %v2440_v50 = vadd.f32 %v3571_v43, %v2420_v9  ;;  %v2423_v23 = vmul.f32 %v2410_v1, %v5836_v20  ;;  %v3573_v20 = vld [vmem:[%s5171_s6 + $0x188] sm:$0xff] }
 0x975   : > { %4676 = vmatpush3.bf16.msra.mxu1 %v4673_v3  ;;  %v2441_v60 = vadd.f32 %v3571_v43, %v2421_v12  ;;  %v2442_v63 = vadd.f32 %v3571_v43, %v2422_v30  ;;  %v2424_v61 = vmul.f32 %v2410_v1, %v5838_v53  ;;  %v2426_v34 = vmul.f32 %v2410_v1, %v5842_v40  ;;  %v3574_v53 = vld [vmem:[%s5171_s6 + $0x190] sm:$0xff]  ;;  %v3575_v40 = vld [vmem:[%s5171_s6 + $0x198] sm:$0xff]  ;;  %v2837_v1 = vld [vmem:[#allocation5 + $0x1a0] sm:$0xff]  ;;  %s3338_s6 = scalar_lea.sflag [#allocation4], %s5167_s11 }
 0x976   : > { %4678 = vmatprep.subr.bf16.mxu1 %v4677_v11  ;;  %v4689_v25 = vpack.c.bf16 %v2440_v50, %v2439_v52  ;;  %v2443_v14 = vadd.f32 %v3571_v43, %v2423_v23  ;;  %v2445_v54 = vadd.f32 %v3571_v43, %v2425_v44  ;;  %v4733_v38 = vpack.c.bf16 %v2840_v8, %v2839_v45 }
 0x977   : > { %v4693_v36 = vpack.c.bf16 %v2442_v63, %v2441_v60  ;;  %v2444_v32 = vadd.f32 %v3571_v43, %v2424_v61  ;;  %v2446_v13 = vadd.f32 %v3571_v43, %v2426_v34  ;;  %v2838_v43 = vld [vmem:[#allocation5 + $0x1a8] sm:$0xff] }
 0x978   : > { %v4729_v44 = vpack.c.bf16 %v2838_v43, %v2837_v1 }
 0x979   : > { %4680 = vmatpush3.bf16.msra.mxu1 %v4677_v11  ;;  %v4697_v35 = vpack.c.bf16 %v2444_v32, %v2443_v14  ;;  %v4701_v5 = vpack.c.bf16 %v2446_v13, %v2445_v54  ;;  %v3588_v11 = vld [vmem:[%s6239_s3 + $0xd] ss:$0 sm:$0xff] }
 0x97a   : > { %4682 = vmatprep.subr.bf16.mxu1 %v4681_v58 }
 0x97d   : > { %4684 = vmatpush3.bf16.msra.mxu1 %v4681_v58 }
 0x97e   : > { %4686 = vmatprep.subr.bf16.mxu1 %v4685_v42 }
 0x981   : > { %4688 = vmatpush3.bf16.msra.mxu1 %v4685_v42 }
 0x982   : > { %4690 = vmatprep.subr.bf16.mxu1 %v4689_v25 }
 0x985   : > { %4692 = vmatpush3.bf16.msra.mxu1 %v4689_v25 }
 0x986   : > { %4694 = vmatprep.subr.bf16.mxu1 %v4693_v36 }
 0x989   : > { %4696 = vmatpush3.bf16.msra.mxu1 %v4693_v36 }
 0x98a   : > { %4698 = vmatprep.subr.bf16.mxu1 %v4697_v35 }
 0x98d   : > { %4700 = vmatpush3.bf16.msra.mxu1 %v4697_v35 }
 0x98e   : > { %4702 = vmatprep.subr.bf16.mxu1 %v4701_v5 }
 0x991   : > { %4704 = vmatpush3.bf16.msra.mxu1 %v4701_v5 }
 0x992   : > { %4722 = vmatprep.subr.bf16.mxu1 %v4721_v39 }
 0x994   : > { %4359 = vmatmul.mubr.f32.vlgmr.msra.gmra.mrb[72].mxu1 %v3573_v20 }
 0x995   : > { %4361 = vmatprep.mubr.f32.mxu1 %v3574_v53  ;;  %4724 = vmatpush3.bf16.msra.mxu1 %v4721_v39 }
 0x996   : > { %4726 = vmatprep.subr.bf16.mxu1 %v4725_v0 }
 0x998   : > { %4362 = vmatmul.mubr.f32.gmra.mrb[74].mxu1 %v3575_v40 }
 0x999   : > { %4364 = vmatprep.mubr.f32.mxu1 %v3576_v7  ;;  %4728 = vmatpush3.bf16.msra.mxu1 %v4725_v0 }
 0x99a   : > { %4730 = vmatprep.subr.bf16.mxu1 %v4729_v44 }
 0x99c   : > { %4365 = vmatmul.mubr.f32.gmra.mrb[76].mxu1 %v3577_v15 }
 0x99d   : > { %4367 = vmatprep.mubr.f32.mxu1 %v3578_v16  ;;  %4732 = vmatpush3.bf16.msra.mxu1 %v4729_v44 }
 0x99e   : > { %4734 = vmatprep.subr.bf16.mxu1 %v4733_v38 }
 0x9a0   : > { %4368 = vmatmul.mubr.f32.gmra.mrb[78].mxu1 %v3579_v18 }
 0x9a1   : > { %4370 = vmatprep.mubr.f32.mxu1 %v3580_v19  ;;  %4736 = vmatpush3.bf16.msra.mxu1 %v4733_v38 }
 0x9a4   : > { %4371 = vmatmul.mubr.f32.gmra.mrb[80].mxu1 %v3581_v21 }
 0x9a5   : > { %4373 = vmatprep.mubr.f32.mxu1 %v3582_v24 }
 0x9a8   : > { %4374 = vmatmul.mubr.f32.gmra.mrb[82].mxu1 %v3583_v26 }
 0x9a9   : > { %4376 = vmatprep.mubr.f32.mxu1 %v3584_v29 }
 0x9ac   : > { %4377 = vmatmul.mubr.f32.gmra.mrb[84].mxu1 %v3585_v33 }
 0x9ad   : > { %4379 = vmatprep.mubr.f32.mxu1 %v3586_v37 }
 0x9b0   : > { %4380 = vmatmul.mubr.f32.gmra.mrb[86].mxu1 %v3587_v47 }
 0xa67   : > { %v4360_v49 = vpop.f32.mrb[72].mxu1 }
 0xa68   : > { %v2530_v17 = vpop.f32.mrb[73].mxu1 }
 0xa69   : > { %4398 = vmatprep.mubr.msk.f32.mxu0 %vm562_vm0, %v2530_v17 }
 0xa6a   : > { %4399 = vmatmul.mubr.msk.f32.vlgmr.msra.gmra.mrb[56].mxu0 %vm562_vm0, %v4360_v49 }
 0xa6b   : > { %v4363_v22 = vpop.f32.mrb[74].mxu1 }
 0xa6c   : > { %v2540_v51 = vpop.f32.mrb[75].mxu1 }
 0xa6d   : > { %4401 = vmatprep.mubr.msk.f32.mxu0 %vm562_vm0, %v2540_v51 }
 0xa6e   : > { %4402 = vmatmul.mubr.msk.f32.gmra.mrb[58].mxu0 %vm562_vm0, %v4363_v22  ;;  %v5968_v22 = vld [vmem:[%s6239_s3 + $0xe] ss:$0 sm:$0xff] }
 0xa6f   : > { %v4366_v28 = vpop.f32.mrb[76].mxu1 }
 0xa70   : > { %v2550_v46 = vpop.f32.mrb[77].mxu1 }
 0xa71   : > { %4404 = vmatprep.mubr.msk.f32.mxu0 %vm562_vm0, %v2550_v46 }
 0xa72   : > { %4405 = vmatmul.mubr.msk.f32.gmra.mrb[60].mxu0 %vm562_vm0, %v4366_v28  ;;  %v4993_v28 = vmov 0.0|0.0  }
 0xa73   : > { %v4369_v31 = vpop.f32.mrb[78].mxu1  ;;  %4737 = vmatprep.subr.bf16.mxu0 %v4993_v28 }
 0xa74   : > { %v2560_v55 = vpop.f32.mrb[79].mxu1 }
 0xa75   : > { %4407 = vmatprep.mubr.msk.f32.mxu0 %vm562_vm0, %v2560_v55 }
 0xa76   : > { %4408 = vmatmul.mubr.msk.f32.gmra.mrb[62].mxu0 %vm562_vm0, %v4369_v31 }
 0xa77   : > { %v4372_v41 = vpop.f32.mrb[80].mxu1 }
 0xa78   : > { %v2570_v27 = vpop.f32.mrb[81].mxu1 }
 0xa79   : > { %4410 = vmatprep.mubr.msk.f32.mxu0 %vm562_vm0, %v2570_v27 }
 0xa7a   : > { %4411 = vmatmul.mubr.msk.f32.gmra.mrb[64].mxu0 %vm562_vm0, %v4372_v41 }
 0xa7b   : > { %v4375_v2 = vpop.f32.mrb[82].mxu1 }
 0xa7c   : > { %v2580_v56 = vpop.f32.mrb[83].mxu1 }
 0xa7d   : > { %4413 = vmatprep.mubr.msk.f32.mxu0 %vm562_vm0, %v2580_v56 }
 0xa7e   : > { %4414 = vmatmul.mubr.msk.f32.gmra.mrb[66].mxu0 %vm562_vm0, %v4375_v2 }
 0xa7f   : > { %v4378_v3 = vpop.f32.mrb[84].mxu1 }
 0xa80   : > { %v2590_v57 = vpop.f32.mrb[85].mxu1 }
 0xa81   : > { %4416 = vmatprep.mubr.msk.f32.mxu0 %vm562_vm0, %v2590_v57 }
 0xa82   : > { %4417 = vmatmul.mubr.msk.f32.gmra.mrb[68].mxu0 %vm562_vm0, %v4378_v3 }
 0xa83   : > { %v4381_v4 = vpop.f32.mrb[86].mxu1 }
 0xa84   : > { %v2600_v9 = vpop.f32.mrb[87].mxu1 }
 0xa85   : > { %4419 = vmatprep.mubr.msk.f32.mxu0 %vm562_vm0, %v2600_v9 }
 0xa86   : > { %4420 = vmatmul.mubr.msk.f32.gmra.mrb[70].mxu0 %vm562_vm0, %v4381_v4 }
 0xb3d   : > { %v4400_v58 = vpop.f32.mrb[56].mxu0 }
 0xb3e   : > { %v2743_v12 = vadd.f32 %v4400_v58, %v3588_v11  ;;  %v2737_v30 = vpop.f32.mrb[57].mxu0 }
 0xb3f   : > { %v2738_v42 = vadd.f32 %v3588_v11, %v2737_v30 }
 0xb40   : > { %v2817_v23 = vmax.f32 %v2743_v12, 0.0 }
 0xb41   : > { %v2816_v52 = vmax.f32 %v2738_v42, 0.0  ;;  %v4403_v50 = vpop.f32.mrb[58].mxu0 }
 0xb42   : > { %v2753_v60 = vadd.f32 %v4403_v50, %v3588_v11  ;;  %v2747_v63 = vpop.f32.mrb[59].mxu0 }
 0xb43   : > { %v2748_v61 = vadd.f32 %v3588_v11, %v2747_v63  ;;  %4438 = vmatprep.mubr.msk.f32.mxu1 %vm562_vm0, %v2816_v52 }
 0xb44   : > { %4439 = vmatmul.mubr.msk.f32.vlgmr.msra.gmra.mrb[88].mxu1 %vm562_vm0, %v2817_v23  ;;  %v2819_v14 = vmax.f32 %v2753_v60, 0.0 }
 0xb45   : > { %v2818_v34 = vmax.f32 %v2748_v61, 0.0  ;;  %v4406_v25 = vpop.f32.mrb[60].mxu0 }
 0xb46   : > { %v2763_v54 = vadd.f32 %v4406_v25, %v3588_v11  ;;  %v2757_v36 = vpop.f32.mrb[61].mxu0 }
 0xb47   : > { %v2758_v32 = vadd.f32 %v3588_v11, %v2757_v36  ;;  %4441 = vmatprep.mubr.msk.f32.mxu1 %vm562_vm0, %v2818_v34 }
 0xb48   : > { %4442 = vmatmul.mubr.msk.f32.gmra.mrb[90].mxu1 %vm562_vm0, %v2819_v14  ;;  %v2821_v5 = vmax.f32 %v2763_v54, 0.0 }
 0xb49   : > { %v2820_v13 = vmax.f32 %v2758_v32, 0.0  ;;  %v4409_v35 = vpop.f32.mrb[62].mxu0 }
 0xb4a   : > { %v2773_v20 = vadd.f32 %v4409_v35, %v3588_v11  ;;  %v2767_v53 = vpop.f32.mrb[63].mxu0 }
 0xb4b   : > { %v2768_v40 = vadd.f32 %v3588_v11, %v2767_v53  ;;  %4444 = vmatprep.mubr.msk.f32.mxu1 %vm562_vm0, %v2820_v13 }
 0xb4c   : > { %4445 = vmatmul.mubr.msk.f32.gmra.mrb[92].mxu1 %vm562_vm0, %v2821_v5  ;;  %v2823_v16 = vmax.f32 %v2773_v20, 0.0 }
 0xb4d   : > { %v2822_v7 = vmax.f32 %v2768_v40, 0.0  ;;  %v4412_v15 = vpop.f32.mrb[64].mxu0 }
 0xb4e   : > { %v2783_v18 = vadd.f32 %v4412_v15, %v3588_v11  ;;  %v2777_v19 = vpop.f32.mrb[65].mxu0 }
 0xb4f   : > { %v2778_v21 = vadd.f32 %v3588_v11, %v2777_v19  ;;  %4447 = vmatprep.mubr.msk.f32.mxu1 %vm562_vm0, %v2822_v7 }
 0xb50   : > { %4448 = vmatmul.mubr.msk.f32.gmra.mrb[94].mxu1 %vm562_vm0, %v2823_v16  ;;  %v2825_v29 = vmax.f32 %v2783_v18, 0.0 }
 0xb51   : > { %v2824_v24 = vmax.f32 %v2778_v21, 0.0  ;;  %v4415_v26 = vpop.f32.mrb[66].mxu0 }
 0xb52   : > { %v2793_v33 = vadd.f32 %v4415_v26, %v3588_v11  ;;  %v2787_v37 = vpop.f32.mrb[67].mxu0 }
 0xb53   : > { %v2788_v47 = vadd.f32 %v3588_v11, %v2787_v37  ;;  %4450 = vmatprep.mubr.msk.f32.mxu1 %vm562_vm0, %v2824_v24 }
 0xb54   : > { %4451 = vmatmul.mubr.msk.f32.gmra.mrb[96].mxu1 %vm562_vm0, %v2825_v29  ;;  %v2827_v59 = vmax.f32 %v2793_v33, 0.0 }
 0xb55   : > { %v2826_v48 = vmax.f32 %v2788_v47, 0.0  ;;  %v4418_v10 = vpop.f32.mrb[68].mxu0 }
 0xb56   : > { %v2803_v39 = vadd.f32 %v4418_v10, %v3588_v11  ;;  %v2797_v62 = vpop.f32.mrb[69].mxu0 }
 0xb57   : > { %v2798_v0 = vadd.f32 %v3588_v11, %v2797_v62  ;;  %4453 = vmatprep.mubr.msk.f32.mxu1 %vm562_vm0, %v2826_v48 }
 0xb58   : > { %4454 = vmatmul.mubr.msk.f32.gmra.mrb[98].mxu1 %vm562_vm0, %v2827_v59  ;;  %v2829_v44 = vmax.f32 %v2803_v39, 0.0 }
 0xb59   : > { %v2828_v1 = vmax.f32 %v2798_v0, 0.0  ;;  %v4421_v43 = vpop.f32.mrb[70].mxu0 }
 0xb5a   : > { %v2813_v45 = vadd.f32 %v4421_v43, %v3588_v11  ;;  %v2807_v8 = vpop.f32.mrb[71].mxu0 }
 0xb5b   : > { %v2808_v38 = vadd.f32 %v3588_v11, %v2807_v8  ;;  %4456 = vmatprep.mubr.msk.f32.mxu1 %vm562_vm0, %v2828_v1 }
 0xb5c   : > { %4457 = vmatmul.mubr.msk.f32.gmra.mrb[100].mxu1 %vm562_vm0, %v2829_v44  ;;  %v2831_v17 = vmax.f32 %v2813_v45, 0.0 }
 0xb5d   : > { %v2830_v49 = vmax.f32 %v2808_v38, 0.0 }
 0xb5f   : > { %4459 = vmatprep.mubr.msk.f32.mxu1 %vm562_vm0, %v2830_v49 }
 0xb60   : > { %4460 = vmatmul.mubr.msk.f32.gmra.mrb[102].mxu1 %vm562_vm0, %v2831_v17 }
 0xc17   : > { %v4440_v51 = vpop.f32.mrb[88].mxu1 }
 0xc18   : > { %v5972_v46 = vadd.f32 %v4440_v51, %v5968_v22  ;;  %v2960_v31 = vpop.f32.mrb[89].mxu1 }
 0xc19   : > { %v5975_v55 = vadd.f32 %v5968_v22, %v2960_v31 }
 0xc1a   : > { %v3042_v41 = vmax.f32 %v5972_v46, 0.0 }
 0xc1b   : > { %v3041_v27 = vmax.f32 %v5975_v55, 0.0  ;;  %v4443_v2 = vpop.f32.mrb[90].mxu1 }
 0xc1c   : > { %v3058_v56 = vsel %vm562_vm0, %v3042_v41, 0.0  ;;  %v5983_v3 = vadd.f32 %v4443_v2, %v5968_v22  ;;  %v2970_v57 = vpop.f32.mrb[91].mxu1 }
 0xc1d   : > { %v3057_v4 = vsel %vm562_vm0, %v3041_v27, 0.0  ;;  %v5989_v9 = vadd.f32 %v5968_v22, %v2970_v57 }
 0xc1e   : > { %v3059_v11 = vadd.f32 %v3058_v56, %v3057_v4  ;;  %v3044_v58 = vmax.f32 %v5983_v3, 0.0 }
 0xc1f   : > { %v3043_v12 = vmax.f32 %v5989_v9, 0.0  ;;  %v4446_v30 = vpop.f32.mrb[92].mxu1 }
 0xc20   : > { %v5994_v42 = vadd.f32 %v4446_v30, %v5968_v22  ;;  %v2980_v52 = vpop.f32.mrb[93].mxu1  ;;  %v3062_v63 = vsel %vm562_vm0, %v3044_v58, 0.0 }
 0xc21   : > { %v3060_v50 = vsel %vm562_vm0, %v3043_v12, 0.0  ;;  %v6000_v23 = vadd.f32 %v5968_v22, %v2980_v52 }
 0xc22   : > { %v3061_v60 = vadd.f32 %v3060_v50, %v3059_v11  ;;  %v3046_v61 = vmax.f32 %v5994_v42, 0.0 }
 0xc23   : > { %v3045_v34 = vmax.f32 %v6000_v23, 0.0  ;;  %v4449_v25 = vpop.f32.mrb[94].mxu1 }
 0xc24   : > { %v3063_v14 = vadd.f32 %v3062_v63, %v3061_v60  ;;  %v6008_v54 = vadd.f32 %v4449_v25, %v5968_v22  ;;  %v2990_v36 = vpop.f32.mrb[95].mxu1  ;;  %v3066_v5 = vsel %vm562_vm0, %v3046_v61, 0.0 }
 0xc25   : > { %v3064_v32 = vsel %vm562_vm0, %v3045_v34, 0.0  ;;  %v6014_v13 = vadd.f32 %v5968_v22, %v2990_v36 }
 0xc26   : > { %v3065_v35 = vadd.f32 %v3064_v32, %v3063_v14  ;;  %v3048_v20 = vmax.f32 %v6008_v54, 0.0 }
 0xc27   : > { %v3047_v53 = vmax.f32 %v6014_v13, 0.0  ;;  %v4452_v40 = vpop.f32.mrb[96].mxu1 }
 0xc28   : > { %v3067_v7 = vadd.f32 %v3066_v5, %v3065_v35  ;;  %v3006_v15 = vadd.f32 %v4452_v40, %v5968_v22  ;;  %v3000_v16 = vpop.f32.mrb[97].mxu1  ;;  %v3070_v24 = vsel %vm562_vm0, %v3048_v20, 0.0 }
 0xc29   : > { %v3068_v18 = vsel %vm562_vm0, %v3047_v53, 0.0  ;;  %v3001_v19 = vadd.f32 %v5968_v22, %v3000_v16 }
 0xc2a   : > { %v3069_v21 = vadd.f32 %v3068_v18, %v3067_v7  ;;  %v3050_v26 = vmax.f32 %v3006_v15, 0.0 }
 0xc2b   : > { %v3049_v29 = vmax.f32 %v3001_v19, 0.0  ;;  %v4455_v33 = vpop.f32.mrb[98].mxu1 }
 0xc2c   : > { %v3071_v37 = vadd.f32 %v3070_v24, %v3069_v21  ;;  %v3016_v47 = vadd.f32 %v4455_v33, %v5968_v22  ;;  %v3010_v48 = vpop.f32.mrb[99].mxu1  ;;  %v3074_v62 = vsel %vm562_vm0, %v3050_v26, 0.0 }
 0xc2d   : > { %v3072_v10 = vsel %vm562_vm0, %v3049_v29, 0.0  ;;  %v3011_v59 = vadd.f32 %v5968_v22, %v3010_v48 }
 0xc2e   : > { %v3073_v39 = vadd.f32 %v3072_v10, %v3071_v37  ;;  %v3052_v0 = vmax.f32 %v3016_v47, 0.0 }
 0xc2f   : > { %v3051_v1 = vmax.f32 %v3011_v59, 0.0  ;;  %v4458_v43 = vpop.f32.mrb[100].mxu1 }
 0xc30   : > { %v3075_v44 = vadd.f32 %v3074_v62, %v3073_v39  ;;  %v3026_v45 = vadd.f32 %v4458_v43, %v5968_v22  ;;  %v3020_v8 = vpop.f32.mrb[101].mxu1  ;;  %v3078_v51 = vsel %vm562_vm0, %v3052_v0, 0.0 }
 0xc31   : > { %v3076_v38 = vsel %vm562_vm0, %v3051_v1, 0.0  ;;  %v3021_v49 = vadd.f32 %v5968_v22, %v3020_v8 }
 0xc32   : > { %v3077_v17 = vadd.f32 %v3076_v38, %v3075_v44  ;;  %v3054_v31 = vmax.f32 %v3026_v45, 0.0 }
 0xc33   : > { %v3053_v2 = vmax.f32 %v3021_v49, 0.0  ;;  %v4461_v56 = vpop.f32.mrb[102].mxu1 }
 0xc34   : > { %v3079_v57 = vadd.f32 %v3078_v51, %v3077_v17  ;;  %v3036_v4 = vadd.f32 %v4461_v56, %v5968_v22  ;;  %v3030_v11 = vpop.f32.mrb[103].mxu1  ;;  %v3082_v60 = vsel %vm562_vm0, %v3054_v31, 0.0 }
 0xc35   : > { %v3080_v30 = vsel %vm562_vm0, %v3053_v2, 0.0  ;;  %v3031_v52 = vadd.f32 %v5968_v22, %v3030_v11 }
 0xc36   : > { %v3081_v50 = vadd.f32 %v3080_v30, %v3079_v57  ;;  %v3056_v63 = vmax.f32 %v3036_v4, 0.0 }
 0xc37   : > { %v3055_v25 = vmax.f32 %v3031_v52, 0.0 }
 0xc38   : > { %v3083_v14 = vadd.f32 %v3082_v60, %v3081_v50  ;;  %v3086_v32 = vsel %vm562_vm0, %v3056_v63, 0.0 }
 0xc39   : > { %v3084_v54 = vsel %vm562_vm0, %v3055_v25, 0.0 }
 0xc3a   : > { %v3085_v36 = vadd.f32 %v3084_v54, %v3083_v14 }
 0xc3c   : > { %v3087_v13 = vadd.f32 %v3086_v32, %v3085_v36 }
 0xc3e   : > { %v3088_v35 = vrot.slane %v3087_v13, 4 }
 0xc40   : > { %v3089_v5 = vadd.f32 %v3088_v35, %v3087_v13 }
 0xc42   : > { %v3090_v40 = vrot.slane %v3089_v5, 2 }
 0xc44   : > { %v3091_v7 = vadd.f32 %v3090_v40, %v3089_v5 }
 0xc46   : > { %v3092_v15 = vrot.slane %v3091_v7, 1 }
 0xc48   : > { %v3093_v16 = vadd.f32 %v3092_v15, %v3091_v7 }
 0xc4a   : > { %v3094_v18 = vmul.f32 0.0078125, %v3093_v16 }
 0xc4c   : > { %v6041_v22 = vsub.f32 %v3041_v27, %v3094_v18  ;;  %v6045_v19 = vsub.f32 %v3042_v41, %v3094_v18  ;;  %v6049_v21 = vsub.f32 %v3043_v12, %v3094_v18  ;;  %v6053_v24 = vsub.f32 %v3044_v58, %v3094_v18 }
 0xc4d   : > { %v6057_v33 = vsub.f32 %v3045_v34, %v3094_v18  ;;  %v6061_v55 = vsub.f32 %v3046_v61, %v3094_v18  ;;  %v6063_v27 = vsub.f32 %v3047_v53, %v3094_v18  ;;  %v6065_v46 = vsub.f32 %v3048_v20, %v3094_v18 }
 0xc4e   : > { %v6067_v41 = vsub.f32 %v3049_v29, %v3094_v18  ;;  %v6069_v9 = vsub.f32 %v3050_v26, %v3094_v18  ;;  %v6071_v12 = vsub.f32 %v3051_v1, %v3094_v18  ;;  %v6073_v3 = vsub.f32 %v3052_v0, %v3094_v18 }
 0xc4f   : > { %v6075_v58 = vsub.f32 %v3053_v2, %v3094_v18  ;;  %v6077_v23 = vsub.f32 %v3054_v31, %v3094_v18  ;;  %v6079_v34 = vsub.f32 %v3055_v25, %v3094_v18  ;;  %v6081_v42 = vsub.f32 %v3056_v63, %v3094_v18 }
 0xc50   : > { %v3111_v61 = vmul.f32 %v6041_v22, %v6041_v22  ;;  %v3112_v20 = vmul.f32 %v6045_v19, %v6045_v19  ;;  %v3113_v53 = vmul.f32 %v6049_v21, %v6049_v21  ;;  %v3114_v26 = vmul.f32 %v6053_v24, %v6053_v24 }
 0xc51   : > { %v3115_v48 = vmul.f32 %v6057_v33, %v6057_v33  ;;  %v3116_v39 = vmul.f32 %v6061_v55, %v6061_v55  ;;  %v4995_v1 = vmov 0.0   ;;  %v3117_v43 = vmul.f32 %v6063_v27, %v6063_v27 }
 0xc52   : > { %v3127_v29 = vsel %vm562_vm0, %v3111_v61, 0.0  ;;  %v3128_v37 = vsel %vm562_vm0, %v3112_v20, 0.0  ;;  %v3130_v10 = vsel %vm562_vm0, %v3113_v53, 0.0  ;;  %v3132_v62 = vsel %vm562_vm0, %v3114_v26, 0.0  ;;  %4494 = vmatprep.mubr.msk.f32.mxu0 %vm4994_vm1, %v4995_v1 }
 0xc53   : > { %v3129_v47 = vadd.f32 %v3128_v37, %v3127_v29  ;;  %v3134_v44 = vsel %vm562_vm0, %v3115_v48, 0.0  ;;  %v3118_v8 = vmul.f32 %v6065_v46, %v6065_v46  ;;  %v3136_v38 = vsel %vm562_vm0, %v3116_v39, 0.0  ;;  %v3039_v39 = vld [vmem:[%s6239_s3 + $0xf] sm:$0x1] }
 0xc54   : > { %v3119_v17 = vmul.f32 %v6067_v41, %v6067_v41  ;;  %v3138_v51 = vsel %vm562_vm0, %v3117_v43, 0.0  ;;  %v3120_v2 = vmul.f32 %v6069_v9, %v6069_v9  ;;  %v3121_v4 = vmul.f32 %v6071_v12, %v6071_v12  ;;  %v3622_v43 = vld [vmem:[%s6239_s3 + $0x10] ss:$0 sm:$0xff] }
 0xc55   : > { %v3131_v59 = vadd.f32 %v3130_v10, %v3129_v47  ;;  %v3140_v56 = vsel %vm562_vm0, %v3118_v8, 0.0  ;;  %v3122_v52 = vmul.f32 %v6073_v3, %v6073_v3  ;;  %v3123_v63 = vmul.f32 %v6075_v58, %v6075_v58 }
 0xc56   : > { %v3142_v11 = vsel %vm562_vm0, %v3119_v17, 0.0  ;;  %v3144_v50 = vsel %vm562_vm0, %v3120_v2, 0.0  ;;  %v3146_v25 = vsel %vm562_vm0, %v3121_v4, 0.0  ;;  %v3124_v54 = vmul.f32 %v6077_v23, %v6077_v23 }
 0xc57   : > { %v3133_v0 = vadd.f32 %v3132_v62, %v3131_v59  ;;  %v3148_v36 = vsel %vm562_vm0, %v3122_v52, 0.0  ;;  %v3125_v13 = vmul.f32 %v6079_v34, %v6079_v34  ;;  %v3150_v35 = vsel %vm562_vm0, %v3123_v63, 0.0 }
 0xc58   : > { %v3126_v40 = vmul.f32 %v6081_v42, %v6081_v42  ;;  %v3152_v7 = vsel %vm562_vm0, %v3124_v54, 0.0 }
 0xc59   : > { %v3135_v45 = vadd.f32 %v3134_v44, %v3133_v0  ;;  %v3154_v16 = vsel %vm562_vm0, %v3125_v13, 0.0 }
 0xc5a   : > { %v3156_v61 = vsel %vm562_vm0, %v3126_v40, 0.0 }
 0xc5b   : > { %v3137_v49 = vadd.f32 %v3136_v38, %v3135_v45 }
 0xc5d   : > { %v3139_v31 = vadd.f32 %v3138_v51, %v3137_v49 }
 0xc5f   : > { %v3141_v57 = vadd.f32 %v3140_v56, %v3139_v31 }
 0xc61   : > { %v3143_v30 = vadd.f32 %v3142_v11, %v3141_v57 }
 0xc63   : > { %v3145_v60 = vadd.f32 %v3144_v50, %v3143_v30 }
 0xc65   : > { %v3147_v14 = vadd.f32 %v3146_v25, %v3145_v60 }
 0xc67   : > { %v3149_v32 = vadd.f32 %v3148_v36, %v3147_v14 }
 0xc69   : > { %v3151_v5 = vadd.f32 %v3150_v35, %v3149_v32 }
 0xc6b   : > { %v3153_v15 = vadd.f32 %v3152_v7, %v3151_v5 }
 0xc6d   : > { %v3155_v18 = vadd.f32 %v3154_v16, %v3153_v15 }
 0xc6f   : > { %v3157_v20 = vadd.f32 %v3156_v61, %v3155_v18 }
 0xc71   : > { %v3158_v53 = vrot.slane %v3157_v20, 4 }
 0xc73   : > { %v3159_v26 = vadd.f32 %v3158_v53, %v3157_v20 }
 0xc75   : > { %v3160_v29 = vrot.slane %v3159_v26, 2 }
 0xc77   : > { %v3161_v37 = vadd.f32 %v3160_v29, %v3159_v26 }
 0xc79   : > { %v3162_v47 = vrot.slane %v3161_v37, 1 }
 0xc7b   : > { %v3163_v48 = vadd.f32 %v3162_v47, %v3161_v37 }
 0xc7d   : > { %v3164_v10 = vmul.f32 0.0078125, %v3163_v48 }
 0xc7f   : > { %v3165_v59 = vadd.f32 1e-05, %v3164_v10 }
 0xc81   : > { %4856 = vrsqrt.f32 %v3165_v59 }
 0xc8b   : > { %v4857_v62 = vpop.eup %4856 }
 0xc8c   : > { %v3167_v0 = vmul.f32 %v4857_v62, %v3039_v39 }
 0xc8e   : > { %v3171_v1 = vrot.slane %v3167_v0, %v5400_v6 }
 0xc90   : > { %v3186_v44 = vmul.f32 %v3171_v1, %v6079_v34  ;;  %v3187_v45 = vmul.f32 %v3171_v1, %v6081_v42  ;;  %v3172_v8 = vmul.f32 %v3171_v1, %v6041_v22  ;;  %v3173_v38 = vmul.f32 %v3171_v1, %v6045_v19 }
 0xc91   : > { %v3174_v34 = vmul.f32 %v3171_v1, %v6049_v21  ;;  %v3175_v42 = vmul.f32 %v3171_v1, %v6053_v24  ;;  %v3176_v4 = vmul.f32 %v3171_v1, %v6057_v33  ;;  %v3177_v11 = vmul.f32 %v3171_v1, %v6061_v55 }
 0xc92   : > { %v3206_v49 = vadd.f32 %v3622_v43, %v3186_v44  ;;  %v3207_v17 = vadd.f32 %v3622_v43, %v3187_v45  ;;  %v3192_v51 = vadd.f32 %v3622_v43, %v3172_v8  ;;  %v3193_v31 = vadd.f32 %v3622_v43, %v3173_v38 }
 0xc93   : > { %v3194_v22 = vadd.f32 %v3622_v43, %v3174_v34  ;;  %v3195_v19 = vadd.f32 %v3622_v43, %v3175_v42  ;;  %v3196_v21 = vadd.f32 %v3622_v43, %v3176_v4  ;;  %v3197_v30 = vadd.f32 %v3622_v43, %v3177_v11 }
 0xc94   : > { %v4766_v2 = vpack.c.bf16 %v3207_v17, %v3206_v49  ;;  %v4738_v56 = vpack.c.bf16 %v3193_v31, %v3192_v51  ;;  %v3178_v52 = vmul.f32 %v3171_v1, %v6063_v27  ;;  %v3179_v50 = vmul.f32 %v3171_v1, %v6065_v46 }
 0xc95   : > { %v4742_v57 = vpack.c.bf16 %v3195_v19, %v3194_v22  ;;  %v4746_v24 = vpack.c.bf16 %v3197_v30, %v3196_v21  ;;  %v3180_v63 = vmul.f32 %v3171_v1, %v6067_v41  ;;  %v3181_v25 = vmul.f32 %v3171_v1, %v6069_v9 }
 0xc96   : > { %4740 = vmatpush3.bf16.xpose.msk.msra.mxu0 %vm6144_vm2, %v4738_v56  ;;  %v3198_v33 = vadd.f32 %v3622_v43, %v3178_v52  ;;  %v3199_v60 = vadd.f32 %v3622_v43, %v3179_v50  ;;  %v3182_v54 = vmul.f32 %v3171_v1, %v6071_v12  ;;  %v3183_v36 = vmul.f32 %v3171_v1, %v6073_v3 }
 0xc97   : > { %4741 = vmatprep.subr.bf16.mxu0 %v4993_v28  ;;  %v3200_v27 = vadd.f32 %v3622_v43, %v3180_v63  ;;  %v3201_v14 = vadd.f32 %v3622_v43, %v3181_v25  ;;  %v3184_v13 = vmul.f32 %v3171_v1, %v6075_v58  ;;  %v3185_v35 = vmul.f32 %v3171_v1, %v6077_v23  ;;  %v3208_v58 = vld [vmem:[%s6239_s3 + $0x11] sm:$0x1]  ;;  %v3213_v23 = vpop.permute.xlu0 %3212 }
 0xc98   : > { %v4750_v55 = vpack.c.bf16 %v3199_v60, %v3198_v33  ;;  %v3202_v41 = vadd.f32 %v3622_v43, %v3182_v54  ;;  %v3203_v9 = vadd.f32 %v3622_v43, %v3183_v36 }
 0xc99   : > { %v4754_v46 = vpack.c.bf16 %v3201_v14, %v3200_v27  ;;  %v3204_v12 = vadd.f32 %v3622_v43, %v3184_v13  ;;  %v3205_v3 = vadd.f32 %v3622_v43, %v3185_v35 }
 0xc9a   : > { %v4758_v32 = vpack.c.bf16 %v3203_v9, %v3202_v41 }
 0xc9b   : > { %v4762_v5 = vpack.c.bf16 %v3205_v3, %v3204_v12 }
 0xc9e   : > { %4744 = vmatpush3.bf16.xpose.msk.msra.mxu0 %vm6144_vm2, %v4742_v57 }
 0xc9f   : > { %4745 = vmatprep.subr.bf16.mxu0 %v4993_v28 }
 0xca6   : > { %4748 = vmatpush3.bf16.xpose.msk.msra.mxu0 %vm6144_vm2, %v4746_v24 }
 0xca7   : > { %4749 = vmatprep.subr.bf16.mxu0 %v4993_v28 }
 0xcae   : > { %4752 = vmatpush3.bf16.xpose.msk.msra.mxu0 %vm6144_vm2, %v4750_v55 }
 0xcaf   : > { %4753 = vmatprep.subr.bf16.mxu0 %v4993_v28 }
 0xcb6   : > { %4756 = vmatpush3.bf16.xpose.msk.msra.mxu0 %vm6144_vm2, %v4754_v46 }
 0xcb7   : > { %4757 = vmatprep.subr.bf16.mxu0 %v4993_v28 }
 0xcbe   : > { %4760 = vmatpush3.bf16.xpose.msk.msra.mxu0 %vm6144_vm2, %v4758_v32 }
 0xcbf   : > { %4761 = vmatprep.subr.bf16.mxu0 %v4993_v28 }
 0xcc6   : > { %4764 = vmatpush3.bf16.xpose.msk.msra.mxu0 %vm6144_vm2, %v4762_v5 }
 0xcc7   : > { %4765 = vmatprep.subr.bf16.mxu0 %v4993_v28 }
 0xcce   : > { %4768 = vmatpush3.bf16.xpose.msk.msra.mxu0 %vm6144_vm2, %v4766_v2 }
 0xcd5   : > { %4495 = vmatmul.mubr.msk.f32.vlgmr.msra.gmra.mrb[72].mxu0 %vm562_vm0, %v3208_v58 }
 0xda8   : > { %v3332_v40 = vpop.f32.mrb[72].mxu0 }
 0xda9   : > { %v3333_v7 = vadd.f32 %v3332_v40, %v3213_v23  ;;  %v4496_v15 = vpop.f32.mrb[73].mxu0 }
 0xdab   : > { %3336 = vst [vmem:[%s244_s20] sm:$0x1] %v3333_v7 }
 0xdac   : > { %4929 = shalt.err (!%p4926_p9)
}
 0xdad   : > { %s4930_s11 = scalar_lea.hbm %s6192_s13, 16  ;;  %s4934_s7 = scalar_lea.hbm %s6240_s4, 32 }
 0xdae   : > { %p4931_p1 = scmp.ne.s32.totalorder %s6192_s13, %s4930_s11  ;;  %p4935_p11 = scmp.lt.u32.totalorder %s6192_s13, %s6240_s4 }
 0xdaf   : > { %p4936_p2 = scmp.lt.u32.totalorder %s4934_s7, %s4930_s11  ;;  %p4938_p6 = scmp.lt.u32.totalorder %s4930_s11, %s6192_s13 }
 0xdb0   : > { %p4932_p0 = pnand %p4931_p1, %p5116_p12 }
 0xdb1   : > { %p4937_p4 = por %p4936_p2, %p4935_p11 }
 0xdb2   : > { %p4933_p5 = pneg %p4932_p0 }
 0xdb3   : > { %p4939_p8 = por %p4938_p6, %p4937_p4 }
 0xdb5   : > { %p4940_p10 = pnand %p4939_p8, %p4933_p5 }
 0xdb7   : > { %4943 = shalt.err (!%p4940_p10)
}
 0xdb8   : > { %4791 = dma.vmem_to_hbm [thread:$0]  (%p5116_p12), %s6194_s5, 16, %s6192_s13, %s3338_s6  }
 0xdb9 PF: > { %s3362_s25 = sand.u32 1, %s4974_s15   ;;  %p6257_p13 = scmp.ne.s32.totalorder %s6245_s22, 0 }
 0xdba   : > { %p6258_p3 = scmp.ge.s32.totalorder %s4986_s18, 2  ;;  %s3363_s14 = scalar_lea.sflag [#allocation4], %s3362_s25 }
 0xdbc   : > { %p4802_p7 = pnand %p6258_p3, %p6257_p13 }
 0xdbe   : > { %4969 = dma.done.wait (!%p4802_p7), %s3363_s14, 16  }
 0xdbf   : > { %4971 = vsyncadd (!%p4802_p7), %s3363_s14, 4294967280  ;;  %p18_p9 = scmp.ge.s32.totalorder %s5078_s27, 4   ;;  %s6259_s15 = smov %s4978_s16 }
 0xdc0   : > { %s6260_s16 = smov %s4982_s17  ;;  %s6261_s17 = smov %s5112_s24 }
 0xdc1   : > { %s6262_s18 = smov %s5078_s27  ;;  %20 = sbr.rel (!%p18_p9) target bundleno = 6 (0x6), region = 97 }
 0xdc8   :  { %3367 = vsyncpa [#allocation3], 1 }
 0xdc9   :  { %3369 = vsyncpa [#allocation3 + $0x1], 1 }
 0xdca   :  { %3370 = vsyncpa [#allocation6], 1 }
 0xdcb   :  { %3371 = vsyncpa [#allocation4], 1 }
 0xdcc   :  { %3373 = vsyncpa [#allocation4 + $0x1], 1 }

</bundles_post_ra>
